<compile_context>
chip_gen: v7x
topology: tpu7x:2x2x1
jax: 0.10.0
libtpu: 0.0.40
codegen_flags: <defaults>
</compile_context>

<pallas_src>
import math

import jax
import jax.numpy as jnp
from jax import lax
from jax.experimental import pallas as pl
from jax.experimental.pallas import tpu as pltpu

BN_EPS = 1e-5
_INV_SQRT2 = 0.7071067811865476

# Exact erf GELU matches PyTorch nn.GELU default.  Setting this True routes the
# transcendental to the EUP via the tanh approximation (v6e/v7x perf) at a
# small (<~1e-3) numeric deviation from the PyTorch reference.
_GELU_TANH_APPROX = False


def get_filter_nums(start=288, end=768, factor=1.1776, num_conv=7):
    filter_list = []
    for _ in range(num_conv):
        filter_list.append(start)
        start = int(round(start * factor))
    if filter_list[-1] != end:
        filter_list[-1] = 768
    return filter_list


def _round_up(n, m):
    return ((n + m - 1) // m) * m


def _pick_tile(L, tl_max):
    """Largest multiple-of-16 divisor of L that is <= tl_max (fallback: L)."""
    if L % 16 != 0:
        return L
    tl = min(L, max(16, tl_max - tl_max % 16))
    while L % tl != 0:
        tl -= 16
    return tl


def _conv_block_kernel(x_ref, lhalo_ref, rhalo_ref, w_ref, bias_ref, o_ref, win_ref):
    """One (L-tile, batch) grid step of Conv1d + BN + GELU + MaxPool2 (channels-last).

    x_ref:     (1, TL, Cpad)    bf16 main input tile (global rows [t*TL, t*TL+TL))
    lhalo_ref: (1, 8, Cpad)     bf16 rows [t*TL-8, t*TL)   (clamped/masked at t==0)
    rhalo_ref: (1, 8, Cpad)     bf16 rows [t*TL+TL, +8)    (clamped/masked at t==nt-1)
    w_ref:     (K, Cpad, Fpad)  bf16 weights with the BN scale folded in
    bias_ref:  (1, Fpad)        f32 fused conv-bias + BN shift
    o_ref:     (1, TL//2, Fpad) bf16 pooled output tile
    win_ref:   (TL+24, Cpad)    bf16 scratch: [.. | left halo @8 | main @16 | right halo]
    """
    TL = x_ref.shape[1]
    C = x_ref.shape[2]
    K = w_ref.shape[0]
    Fp = o_ref.shape[2]
    pad_l = (K - 1) // 2
    t = pl.program_id(0)
    nt = pl.num_programs(0)

    # Assemble the contiguous window once (main store is 16-row aligned).
    win_ref[pl.ds(16, TL), :] = x_ref[0]

    @pl.when(t > 0)
    def _():
        win_ref[pl.ds(8, 8), :] = lhalo_ref[0]

    @pl.when(t == 0)            # 'same' left edge: rows < 0 are zero
    def _():
        win_ref[pl.ds(8, 8), :] = jnp.zeros((8, C), win_ref.dtype)

    @pl.when(t < nt - 1)
    def _():
        win_ref[pl.ds(16 + TL, 8), :] = rhalo_ref[0]

    @pl.when(t == nt - 1)       # 'same' right edge: rows >= L are zero
    def _():
        win_ref[pl.ds(16 + TL, 8), :] = jnp.zeros((8, C), win_ref.dtype)

    # Conv1d as K accumulated MXU matmuls over shifted window slices
    # (no im2col buffer); bf16 operands, f32 accumulation.
    acc = jnp.dot(win_ref[pl.ds(16 - pad_l, TL), :], w_ref[0],
                  preferred_element_type=jnp.float32)
    for k in range(1, K):
        acc = acc + jnp.dot(win_ref[pl.ds(16 - pad_l + k, TL), :], w_ref[k],
                            preferred_element_type=jnp.float32)

    # Fused conv-bias + BatchNorm shift (scale already folded into the weights).
    y = acc + bias_ref[...]

    # GELU in f32 (exact erf -- PyTorch nn.GELU default).
    if _GELU_TANH_APPROX:
        y = jax.nn.gelu(y, approximate=True)
    else:
        y = 0.5 * y * (1.0 + lax.erf(y * _INV_SQRT2))

    # MaxPool1d(kernel_size=2) along the sequence dim (reshape-max; hides under MXU).
    y = jnp.max(y.reshape(TL // 2, 2, Fp), axis=1)

    o_ref[0, :, :] = y.astype(o_ref.dtype)


def prepare_conv_params(params):
    """Fold BN(inference) into conv weights; pad to lane multiples; cast bf16.

    Call ONCE per model (outside the per-request forward) for inference serving.
    """
    prepared = []
    for p in params:
        F, C_in, K = p["conv_w"].shape
        Cpad = _round_up(C_in, 128)
        Fpad = _round_up(F, 128)
        inv_std = (p["gamma"] / jnp.sqrt(p["running_var"] + BN_EPS)).astype(jnp.float32)
        w = jnp.transpose(p["conv_w"], (2, 1, 0)).astype(jnp.float32) * inv_std[None, None, :]
        w = jnp.pad(w, ((0, 0), (0, Cpad - C_in), (0, Fpad - F))).astype(jnp.bfloat16)
        bias = ((p["conv_b"] - p["running_mean"]) * inv_std + p["beta"]).astype(jnp.float32)
        bias = jnp.pad(bias, (0, Fpad - F))[None, :]
        prepared.append(dict(w=w, bias=bias, c_in=C_in, c_out=F))
    return prepared


def _conv_block(x_nlc, w_kcf, bias, tile_l=512):
    """One conv block, channels-last bf16.

    x_nlc: (B, L, Cpad) bf16, Cpad a multiple of 128 (padded channels must be 0).
    w_kcf: (K, Cpad, Fpad) bf16 with BN scale folded in.
    bias:  (1, Fpad) f32 fused conv bias + BN shift.
    Returns (B, L//2, Fpad) bf16; padded output channels stay exactly zero.
    """
    B, L, Cpad = x_nlc.shape
    K, Cw, Fpad = w_kcf.shape
    assert Cw == Cpad and Cpad % 128 == 0 and Fpad % 128 == 0
    assert K % 2 == 1 and (K - 1) // 2 <= 8
    assert L % 2 == 0 and L >= 8
    # Guard against the single-giant-tile fallback blowing VMEM for long sequences.
    assert L % 16 == 0 or L <= 4096, "pad sequence length to a multiple of 16"

    TL = _pick_tile(L, tile_l)
    nt = L // TL
    tlb = TL // 8            # tile length in 8-row halo blocks
    last_blk = L // 8 - 1

    return pl.pallas_call(
        _conv_block_kernel,
        out_shape=jax.ShapeDtypeStruct((B, L // 2, Fpad), jnp.bfloat16),
        grid_spec=pltpu.PrefetchScalarGridSpec(
            num_scalar_prefetch=0,
            grid=(nt, B),    # long axis first -> sharded across TCs on v7x
            in_specs=[
                pl.BlockSpec((1, TL, Cpad), lambda t, b: (b, t, 0)),
                pl.BlockSpec((1, 8, Cpad),
                             lambda t, b: (b, jnp.maximum(t * tlb - 1, 0), 0)),
                pl.BlockSpec((1, 8, Cpad),
                             lambda t, b: (b, jnp.minimum((t + 1) * tlb, last_blk), 0)),
                pl.BlockSpec((K, Cpad, Fpad), lambda t, b: (0, 0, 0)),
                pl.BlockSpec((1, Fpad), lambda t, b: (0, 0)),
            ],
            out_specs=pl.BlockSpec((1, TL // 2, Fpad), lambda t, b: (b, t, 0)),
            scratch_shapes=[pltpu.VMEM((TL + 24, Cpad), jnp.bfloat16)],
        ),
        compiler_params=pltpu.CompilerParams(
            dimension_semantics=("parallel", "parallel"),
            vmem_limit_bytes=40 << 20),
    )(x_nlc, x_nlc, x_nlc, w_kcf, bias)


def conv_layers_forward(x_ncl, params=None, *, prepared=None, tile_l=512):
    """ConvLayers.forward (inference BN).

    x_ncl:  (B, C0, L)  PyTorch NCL layout, C0 = filter_nums[0].
    params: list of per-layer dicts with conv_w (F, C_in, K), conv_b, gamma,
            beta, running_mean, running_var.  For serving, pass
            prepared=prepare_conv_params(params) to fold/pad/cast weights once.
    Returns (B, F_last, L // 2**n_layers) in PyTorch NCL layout, f32.
    """
    if prepared is None:
        prepared = prepare_conv_params(params)
    c0 = prepared[0]["c_in"]
    c0_pad = _round_up(c0, 128)
    # One transpose + channel pad + bf16 cast at the model input; the whole
    # tower then stays channels-last bf16 with lane-dense (128-mult) channels.
    x = jnp.transpose(x_ncl, (0, 2, 1))
    x = jnp.pad(x, ((0, 0), (0, 0), (0, c0_pad - c0))).astype(jnp.bfloat16)
    for p in prepared:
        x = _conv_block(x, p["w"], p["bias"], tile_l=tile_l)
    f_last = prepared[-1]["c_out"]
    # Slice off channel padding; final transpose/cast only for PyTorch parity
    # (a channels-last consumer should take x[:, :, :f_last] directly).
    return jnp.transpose(x[:, :, :f_last], (0, 2, 1)).astype(jnp.float32)


def _reference_forward(x_ncl, params):
    """Pure-JAX f32 reference matching the PyTorch forward (inference BN)."""
    y = x_ncl
    for p in params:
        F, _, K = p["conv_w"].shape
        pad = (K - 1) // 2
        y = lax.conv_general_dilated(
            y, p["conv_w"], window_strides=(1,), padding=[(pad, pad)],
            dimension_numbers=("NCH", "OIH", "NCH"),
            precision=lax.Precision.HIGHEST)
        y = y + p["conv_b"][None, :, None]
        y = (y - p["running_mean"][None, :, None]) / jnp.sqrt(
            p["running_var"][None, :, None] + BN_EPS)
        y = y * p["gamma"][None, :, None] + p["beta"][None, :, None]
        y = 0.5 * y * (1.0 + lax.erf(y * _INV_SQRT2))
        B, F_, L_ = y.shape
        y = y[:, :, :(L_ // 2) * 2].reshape(B, F_, L_ // 2, 2).max(axis=-1)
    return y


if __name__ == "__main__":
    # Small shapes consistent with the module: batch=2, first-layer channels=288,
    # seq length=32, two conv blocks (288 -> 339 -> 768).
    B, L = 2, 32
    N_CONV_LAYERS = 2
    FILTER_SIZE = 5
    filter_nums = get_filter_nums(start=288, end=768, factor=1.1776,
                                  num_conv=N_CONV_LAYERS + 1)  # [288, 339, 768]

    key = jax.random.PRNGKey(0)
    key, kx = jax.random.split(key)
    x = jax.random.normal(kx, (B, filter_nums[0], L), dtype=jnp.float32)

    params = []
    for i in range(len(filter_nums) - 1):
        c_in, c_out = filter_nums[i], filter_nums[i + 1]
        key, kw, kb, kg, kbe, km, kv = jax.random.split(key, 7)
        params.append(dict(
            conv_w=jax.random.normal(kw, (c_out, c_in, FILTER_SIZE), jnp.float32)
            / math.sqrt(FILTER_SIZE * c_in),
            conv_b=0.1 * jax.random.normal(kb, (c_out,), jnp.float32),
            gamma=1.0 + 0.1 * jax.random.normal(kg, (c_out,), jnp.float32),
            beta=0.1 * jax.random.normal(kbe, (c_out,), jnp.float32),
            running_mean=0.05 * jax.random.normal(km, (c_out,), jnp.float32),
            running_var=1.0 + 0.1 * jnp.abs(jax.random.normal(kv, (c_out,), jnp.float32)),
        ))

    prepared = prepare_conv_params(params)  # fold BN / pad / cast weights ONCE
    # tile_l=16 deliberately exercises the multi-tile halo + edge-masking path.
    out = conv_layers_forward(x, prepared=prepared, tile_l=16)
    out = jax.block_until_ready(out)

    ref = _reference_forward(x, params)
    n_layers = len(filter_nums) - 1
    assert out.shape == (B, filter_nums[-1], L // (2 ** n_layers)), out.shape
    # bf16 activations between layers + bf16 MXU operands (f32 accumulation)
    # -> tolerance loosened vs the f32 reference.
    err = float(jnp.max(jnp.abs(out - ref)))
    assert jnp.allclose(out, ref, atol=1e-1, rtol=5e-2), err

    print("KERNEL_OK")
</pallas_src>

<mosaic_0001>
module attributes {stable_mosaic.version = 11 : i64} {
  func.func @_conv_block_kernel(%arg0: i32, %arg1: i32, %arg2: memref<1x16x384xbf16, #tpu.memory_space<vmem>>, %arg3: memref<1x8x384xbf16, #tpu.memory_space<vmem>>, %arg4: memref<1x8x384xbf16, #tpu.memory_space<vmem>>, %arg5: memref<5x384x384xbf16, #tpu.memory_space<vmem>>, %arg6: memref<1x384xf32, #tpu.memory_space<vmem>>, %arg7: memref<1x8x384xbf16, #tpu.memory_space<vmem>>, %arg8: memref<40x384xbf16, #tpu.memory_space<vmem>>) attributes {dimension_semantics = [#tpu.dimension_semantics<parallel>, #tpu.dimension_semantics<parallel>], iteration_bounds = array<i64: 2, 2>, scalar_prefetch = 0 : i64, scratch_operands = 1 : i64, tpu.core_type = #tpu.core_type<tc>, window_params = [{transform_indices = @transform_0, window_bounds = array<i64: 1, 16, 384>}, {transform_indices = @transform_1, window_bounds = array<i64: 1, 8, 384>}, {transform_indices = @transform_2, window_bounds = array<i64: 1, 8, 384>}, {pipeline_mode = #tpu.pipeline_mode<synchronous>, transform_indices = @transform_3, window_bounds = array<i64: 5, 384, 384>}, {pipeline_mode = #tpu.pipeline_mode<synchronous>, transform_indices = @transform_4, window_bounds = array<i64: 1, 384>}, {transform_indices = @transform_5, window_bounds = array<i64: 1, 8, 384>}]} {
    %c0 = arith.constant 0 : index
    %c0_0 = arith.constant 0 : index
    %c0_1 = arith.constant 0 : index
    %0 = vector.load %arg2[%c0, %c0_0, %c0_1] : memref<1x16x384xbf16, #tpu.memory_space<vmem>>, vector<1x16x384xbf16>
    %1 = vector.shape_cast %0 : vector<1x16x384xbf16> to vector<16x384xbf16>
    %c16 = arith.constant 16 : index
    %c0_2 = arith.constant 0 : index
    %2 = vector.load %arg8[%c16, %c0_2] : memref<40x384xbf16, #tpu.memory_space<vmem>>, vector<16x384xbf16>
    tpu.vector_store %arg8[%c16, %c0_2], %1 {strides = array<i32>} : memref<40x384xbf16, #tpu.memory_space<vmem>>, vector<16x384xbf16>,
    %c0_i32 = arith.constant 0 : i32
    %3 = arith.cmpi sgt, %arg0, %c0_i32 : i32
    %4 = arith.extui %3 : i1 to i32
    %c0_i32_3 = arith.constant 0 : i32
    %5 = arith.cmpi ne, %4, %c0_i32_3 : i32
    scf.if %5 {
      %c0_39 = arith.constant 0 : index
      %c0_40 = arith.constant 0 : index
      %c0_41 = arith.constant 0 : index
      %56 = vector.load %arg3[%c0_39, %c0_40, %c0_41] : memref<1x8x384xbf16, #tpu.memory_space<vmem>>, vector<1x8x384xbf16>
      %57 = vector.shape_cast %56 : vector<1x8x384xbf16> to vector<8x384xbf16>
      %c8 = arith.constant 8 : index
      %c0_42 = arith.constant 0 : index
      %58 = vector.load %arg8[%c8, %c0_42] : memref<40x384xbf16, #tpu.memory_space<vmem>>, vector<8x384xbf16>
      tpu.vector_store %arg8[%c8, %c0_42], %57 {strides = array<i32>} : memref<40x384xbf16, #tpu.memory_space<vmem>>, vector<8x384xbf16>,
    } else {
    }
    %c0_i32_4 = arith.constant 0 : i32
    %6 = arith.cmpi eq, %arg0, %c0_i32_4 : i32
    %7 = arith.extui %6 : i1 to i32
    %c0_i32_5 = arith.constant 0 : i32
    %8 = arith.cmpi ne, %7, %c0_i32_5 : i32
    scf.if %8 {
      %cst_39 = arith.constant 0.000000e+00 : bf16
      %56 = vector.broadcast %cst_39 : bf16 to vector<8x384xbf16>
      %c8 = arith.constant 8 : index
      %c0_40 = arith.constant 0 : index
      %57 = vector.load %arg8[%c8, %c0_40] : memref<40x384xbf16, #tpu.memory_space<vmem>>, vector<8x384xbf16>
      tpu.vector_store %arg8[%c8, %c0_40], %56 {strides = array<i32>} : memref<40x384xbf16, #tpu.memory_space<vmem>>, vector<8x384xbf16>,
    } else {
    }
    %c1_i32 = arith.constant 1 : i32
    %9 = arith.cmpi slt, %arg0, %c1_i32 : i32
    %10 = arith.extui %9 : i1 to i32
    %c0_i32_6 = arith.constant 0 : i32
    %11 = arith.cmpi ne, %10, %c0_i32_6 : i32
    scf.if %11 {
      %c0_39 = arith.constant 0 : index
      %c0_40 = arith.constant 0 : index
      %c0_41 = arith.constant 0 : index
      %56 = vector.load %arg4[%c0_39, %c0_40, %c0_41] : memref<1x8x384xbf16, #tpu.memory_space<vmem>>, vector<1x8x384xbf16>
      %57 = vector.shape_cast %56 : vector<1x8x384xbf16> to vector<8x384xbf16>
      %c32 = arith.constant 32 : index
      %c0_42 = arith.constant 0 : index
      %58 = vector.load %arg8[%c32, %c0_42] : memref<40x384xbf16, #tpu.memory_space<vmem>>, vector<8x384xbf16>
      tpu.vector_store %arg8[%c32, %c0_42], %57 {strides = array<i32>} : memref<40x384xbf16, #tpu.memory_space<vmem>>, vector<8x384xbf16>,
    } else {
    }
    %c1_i32_7 = arith.constant 1 : i32
    %12 = arith.cmpi eq, %arg0, %c1_i32_7 : i32
    %13 = arith.extui %12 : i1 to i32
    %c0_i32_8 = arith.constant 0 : i32
    %14 = arith.cmpi ne, %13, %c0_i32_8 : i32
    scf.if %14 {
      %cst_39 = arith.constant 0.000000e+00 : bf16
      %56 = vector.broadcast %cst_39 : bf16 to vector<8x384xbf16>
      %c32 = arith.constant 32 : index
      %c0_40 = arith.constant 0 : index
      %57 = vector.load %arg8[%c32, %c0_40] : memref<40x384xbf16, #tpu.memory_space<vmem>>, vector<8x384xbf16>
      tpu.vector_store %arg8[%c32, %c0_40], %56 {strides = array<i32>} : memref<40x384xbf16, #tpu.memory_space<vmem>>, vector<8x384xbf16>,
    } else {
    }
    %c14 = arith.constant 14 : index
    %c0_9 = arith.constant 0 : index
    %15 = vector.load %arg8[%c14, %c0_9] : memref<40x384xbf16, #tpu.memory_space<vmem>>, vector<16x384xbf16>
    %c0_10 = arith.constant 0 : index
    %c0_11 = arith.constant 0 : index
    %c0_12 = arith.constant 0 : index
    %16 = vector.load %arg5[%c0_10, %c0_11, %c0_12] : memref<5x384x384xbf16, #tpu.memory_space<vmem>>, vector<1x384x384xbf16>
    %17 = vector.shape_cast %16 : vector<1x384x384xbf16> to vector<384x384xbf16>
    %cst = arith.constant dense<0.000000e+00> : vector<16x384xf32>
    %18 = tpu.matmul %15, %17, %cst {dimension_numbers = #tpu.dot_dimension_numbers<[1], [0], [0], [1], [0, 0, 1, 1], [], []>} : vector<16x384xbf16>, vector<384x384xbf16>, vector<16x384xf32> -> vector<16x384xf32>
    %c15 = arith.constant 15 : index
    %c0_13 = arith.constant 0 : index
    %19 = vector.load %arg8[%c15, %c0_13] : memref<40x384xbf16, #tpu.memory_space<vmem>>, vector<16x384xbf16>
    %c1 = arith.constant 1 : index
    %c0_14 = arith.constant 0 : index
    %c0_15 = arith.constant 0 : index
    %20 = vector.load %arg5[%c1, %c0_14, %c0_15] : memref<5x384x384xbf16, #tpu.memory_space<vmem>>, vector<1x384x384xbf16>
    %21 = vector.shape_cast %20 : vector<1x384x384xbf16> to vector<384x384xbf16>
    %cst_16 = arith.constant dense<0.000000e+00> : vector<16x384xf32>
    %22 = tpu.matmul %19, %21, %cst_16 {dimension_numbers = #tpu.dot_dimension_numbers<[1], [0], [0], [1], [0, 0, 1, 1], [], []>} : vector<16x384xbf16>, vector<384x384xbf16>, vector<16x384xf32> -> vector<16x384xf32>
    %23 = arith.addf %18, %22 : vector<16x384xf32>
    %c16_17 = arith.constant 16 : index
    %c0_18 = arith.constant 0 : index
    %24 = vector.load %arg8[%c16_17, %c0_18] : memref<40x384xbf16, #tpu.memory_space<vmem>>, vector<16x384xbf16>
    %c2 = arith.constant 2 : index
    %c0_19 = arith.constant 0 : index
    %c0_20 = arith.constant 0 : index
    %25 = vector.load %arg5[%c2, %c0_19, %c0_20] : memref<5x384x384xbf16, #tpu.memory_space<vmem>>, vector<1x384x384xbf16>
    %26 = vector.shape_cast %25 : vector<1x384x384xbf16> to vector<384x384xbf16>
    %cst_21 = arith.constant dense<0.000000e+00> : vector<16x384xf32>
    %27 = tpu.matmul %24, %26, %cst_21 {dimension_numbers = #tpu.dot_dimension_numbers<[1], [0], [0], [1], [0, 0, 1, 1], [], []>} : vector<16x384xbf16>, vector<384x384xbf16>, vector<16x384xf32> -> vector<16x384xf32>
    %28 = arith.addf %23, %27 : vector<16x384xf32>
    %c17 = arith.constant 17 : index
    %c0_22 = arith.constant 0 : index
    %29 = vector.load %arg8[%c17, %c0_22] : memref<40x384xbf16, #tpu.memory_space<vmem>>, vector<16x384xbf16>
    %c3 = arith.constant 3 : index
    %c0_23 = arith.constant 0 : index
    %c0_24 = arith.constant 0 : index
    %30 = vector.load %arg5[%c3, %c0_23, %c0_24] : memref<5x384x384xbf16, #tpu.memory_space<vmem>>, vector<1x384x384xbf16>
    %31 = vector.shape_cast %30 : vector<1x384x384xbf16> to vector<384x384xbf16>
    %cst_25 = arith.constant dense<0.000000e+00> : vector<16x384xf32>
    %32 = tpu.matmul %29, %31, %cst_25 {dimension_numbers = #tpu.dot_dimension_numbers<[1], [0], [0], [1], [0, 0, 1, 1], [], []>} : vector<16x384xbf16>, vector<384x384xbf16>, vector<16x384xf32> -> vector<16x384xf32>
    %33 = arith.addf %28, %32 : vector<16x384xf32>
    %c18 = arith.constant 18 : index
    %c0_26 = arith.constant 0 : index
    %34 = vector.load %arg8[%c18, %c0_26] : memref<40x384xbf16, #tpu.memory_space<vmem>>, vector<16x384xbf16>
    %c4 = arith.constant 4 : index
    %c0_27 = arith.constant 0 : index
    %c0_28 = arith.constant 0 : index
    %35 = vector.load %arg5[%c4, %c0_27, %c0_28] : memref<5x384x384xbf16, #tpu.memory_space<vmem>>, vector<1x384x384xbf16>
    %36 = vector.shape_cast %35 : vector<1x384x384xbf16> to vector<384x384xbf16>
    %cst_29 = arith.constant dense<0.000000e+00> : vector<16x384xf32>
    %37 = tpu.matmul %34, %36, %cst_29 {dimension_numbers = #tpu.dot_dimension_numbers<[1], [0], [0], [1], [0, 0, 1, 1], [], []>} : vector<16x384xbf16>, vector<384x384xbf16>, vector<16x384xf32> -> vector<16x384xf32>
    %38 = arith.addf %33, %37 : vector<16x384xf32>
    %c0_30 = arith.constant 0 : index
    %c0_31 = arith.constant 0 : index
    %39 = vector.load %arg6[%c0_30, %c0_31] : memref<1x384xf32, #tpu.memory_space<vmem>>, vector<1x384xf32>
    %40 = vector.broadcast %39 : vector<1x384xf32> to vector<16x384xf32>
    %41 = arith.addf %38, %40 : vector<16x384xf32>
    %cst_32 = arith.constant 5.000000e-01 : f32
    %42 = vector.broadcast %cst_32 : f32 to vector<16x384xf32>
    %43 = arith.mulf %42, %41 : vector<16x384xf32>
    %cst_33 = arith.constant 0.707106769 : f32
    %44 = vector.broadcast %cst_33 : f32 to vector<16x384xf32>
    %45 = arith.mulf %41, %44 : vector<16x384xf32>
    %46 = math.erf %45 : vector<16x384xf32>
    %cst_34 = arith.constant 1.000000e+00 : f32
    %47 = vector.broadcast %cst_34 : f32 to vector<16x384xf32>
    %48 = arith.addf %47, %46 : vector<16x384xf32>
    %49 = arith.mulf %43, %48 : vector<16x384xf32>
    %50 = vector.shape_cast %49 : vector<16x384xf32> to vector<8x2x384xf32>
    %cst_35 = arith.constant dense<0xFF800000> : vector<8x384xf32>
    %51 = vector.multi_reduction <maximumf>, %50, %cst_35 [1] : vector<8x2x384xf32> to vector<8x384xf32>
    %52 = arith.truncf %51 : vector<8x384xf32> to vector<8x384xbf16>
    %c0_36 = arith.constant 0 : index
    %c0_37 = arith.constant 0 : index
    %c0_38 = arith.constant 0 : index
    %53 = vector.load %arg7[%c0_36, %c0_37, %c0_38] : memref<1x8x384xbf16, #tpu.memory_space<vmem>>, vector<1x8x384xbf16>
    %54 = vector.shape_cast %53 : vector<1x8x384xbf16> to vector<8x384xbf16>
    %55 = vector.shape_cast %52 : vector<8x384xbf16> to vector<1x8x384xbf16>
    tpu.vector_store %arg7[%c0_36, %c0_37, %c0_38], %55 {strides = array<i32>} : memref<1x8x384xbf16, #tpu.memory_space<vmem>>, vector<1x8x384xbf16>,
    return
  }
  func.func @transform_0(%arg0: i32, %arg1: i32) -> (i32, i32, i32) {
    %c0_i32 = arith.constant 0 : i32
    %c0_i32_0 = arith.constant 0 : i32
    return %arg1, %arg0, %c0_i32 : i32, i32, i32
  }
  func.func @transform_1(%arg0: i32, %arg1: i32) -> (i32, i32, i32) {
    %c2_i32 = arith.constant 2 : i32
    %0 = arith.muli %arg0, %c2_i32 : i32
    %c1_i32 = arith.constant 1 : i32
    %1 = arith.subi %0, %c1_i32 : i32
    %c0_i32 = arith.constant 0 : i32
    %2 = arith.maxsi %1, %c0_i32 : i32
    %c0_i32_0 = arith.constant 0 : i32
    %c0_i32_1 = arith.constant 0 : i32
    return %arg1, %2, %c0_i32_0 : i32, i32, i32
  }
  func.func @transform_2(%arg0: i32, %arg1: i32) -> (i32, i32, i32) {
    %c1_i32 = arith.constant 1 : i32
    %0 = arith.addi %arg0, %c1_i32 : i32
    %c2_i32 = arith.constant 2 : i32
    %1 = arith.muli %0, %c2_i32 : i32
    %c3_i32 = arith.constant 3 : i32
    %2 = arith.minsi %1, %c3_i32 : i32
    %c0_i32 = arith.constant 0 : i32
    %c0_i32_0 = arith.constant 0 : i32
    return %arg1, %2, %c0_i32 : i32, i32, i32
  }
  func.func @transform_3(%arg0: i32, %arg1: i32) -> (i32, i32, i32) {
    %c0_i32 = arith.constant 0 : i32
    %c0_i32_0 = arith.constant 0 : i32
    %c0_i32_1 = arith.constant 0 : i32
    %c0_i32_2 = arith.constant 0 : i32
    return %c0_i32, %c0_i32_0, %c0_i32_1 : i32, i32, i32
  }
  func.func @transform_4(%arg0: i32, %arg1: i32) -> (i32, i32) {
    %c0_i32 = arith.constant 0 : i32
    %c0_i32_0 = arith.constant 0 : i32
    %c0_i32_1 = arith.constant 0 : i32
    return %c0_i32, %c0_i32_0 : i32, i32
  }
  func.func @transform_5(%arg0: i32, %arg1: i32) -> (i32, i32, i32) {
    %c0_i32 = arith.constant 0 : i32
    %c0_i32_0 = arith.constant 0 : i32
    return %arg1, %arg0, %c0_i32 : i32, i32, i32
  }
}

</mosaic_0001>

<bundles_post_ra>
// kernel: tpu_custom_call.1
= control target key start
LH: loop header
LB: loop body
LE: loop exit
PB: predicated region body
PF: predicated region fallthrough
CT: control target
= control target key end

     0   :  { %s7309_s0 = inlined_call_operand.hbm [shape: bf16[2,32,384], index: 0, kind: input, shape index: {}]   ;;  %s7310_s1 = inlined_call_operand.hbm [shape: bf16[2,32,384], index: 1, kind: input, shape index: {}]   ;;  %s7311_s2 = inlined_call_operand.hbm [shape: bf16[2,32,384], index: 2, kind: input, shape index: {}]   ;;  %s7312_s3 = inlined_call_operand.hbm [shape: bf16[5,384,384], index: 3, kind: input, shape index: {}]   ;;  %s7313_s4 = inlined_call_operand.hbm [shape: f32[1,384], index: 4, kind: input, shape index: {}]   ;;  %s7314_s5 = inlined_call_operand.hbm [shape: bf16[2,16,384], index: 5, kind: output, shape index: {}]  }
   0x1   :  { %7337 = sst [smem:[#allocation30_spill]] %s7310_s1 }
   0x2   :  { %7338 = sst [smem:[#allocation31_spill]] %s7311_s2 }
   0x3   :  { %7339 = sst [smem:[#allocation32_spill]] %s7312_s3 }
   0x4   :  { %7340 = sst [smem:[#allocation33_spill]] %s7314_s5 }
   0x5   :  { %10 = vsyncpa [#allocation4], 0 }
   0x6   :  { %12 = vsyncpa [#allocation4 + $0x1], 0 }
   0x7   :  { %13 = vsyncpa [#allocation7], 0 }
   0x8   :  { %15 = vsyncpa [#allocation7 + $0x1], 0 }
   0x9   :  { %16 = vsyncpa [#allocation10], 0 }
   0xa   :  { %17 = vsyncpa [#allocation5], 0 }
   0xb   :  { %19 = vsyncpa [#allocation5 + $0x1], 0  ;;  %s6464_s18 = smov 0   ;;  %s6466_s19 = smov 0  }
   0xc   :  { %s6468_s20 = smov 0   ;;  %s6470_s21 = smov 0  }
   0xd   :  { %s6472_s22 = smov 0   ;;  %s6474_s23 = smov 0  }
   0xe   :  { %s6476_s24 = smov 0   ;;  %s6478_s25 = smov 0  }
   0xf   :  { %s6480_s26 = smov 0   ;;  %s6482_s27 = smov 0  }
  0x10   :  { %s6484_s28 = smov 0   ;;  %s6486_s29 = smov 0  }
  0x11   :  { %s6488_s30 = smov 0   ;;  %s6490_s6 = smov 0  }
  0x12 LB: > { %7341 = sst [smem:[#allocation18_spill]] %s6366_s18  ;;  %s6535_s7 = sadd.s32 4294967295, %s6418_s6   ;;  %s6418_s6 = sphi %s6490_s6, %s25_s6   ;;  %s6414_s30 = sphi %s6488_s30, %s7419_s30   ;;  %s6410_s29 = sphi %s6486_s29, %s7409_s29   ;;  %s6406_s28 = sphi %s6484_s28, %s7418_s28   ;;  %s6402_s27 = sphi %s6482_s27, %s7408_s27   ;;  %s6398_s26 = sphi %s6480_s26, %s7417_s26   ;;  %s6394_s25 = sphi %s6478_s25, %s7416_s25   ;;  %s6390_s24 = sphi %s6476_s24, %s7415_s24   ;;  %s6386_s23 = sphi %s6474_s23, %s7407_s23   ;;  %s6382_s22 = sphi %s6472_s22, %s7406_s22   ;;  %s6378_s21 = sphi %s6470_s21, %s7405_s21   ;;  %s6374_s20 = sphi %s6468_s20, %s7414_s20   ;;  %s6370_s19 = sphi %s6466_s19, %s7413_s19   ;;  %s6366_s18 = sphi %s6464_s18, %s7412_s18  }
  0x13   : > { %7342 = sst [smem:[#allocation19_spill]] %s6382_s22  ;;  %p4679_p0 = scmp.ge.s32.totalorder %s6418_s6, 1 }
  0x14   : > { %7343 = sst [smem:[#allocation20_spill]] %s6386_s23  ;;  %p7315_p1 = scmp.eq.s32.totalorder %s6535_s7, 0 }
  0x15   : > { %7344 = sst [smem:[#allocation21_spill]] %s6402_s27  ;;  %p212_p3 = scmp.lt.s32.totalorder %s6418_s6, 5 }
  0x16   : > { %7345 = sst [smem:[#allocation22_spill]] %s6406_s28  ;;  %s6420_s9 = smov [#allocation9]  }
  0x17   : > { %7346 = sst [smem:[#allocation23_spill]] %s6410_s29  ;;  %p6541_p4 = pnand %p4679_p0, %p212_p3 }
  0x18   : > { %s224_s10 = sshll.u32 %s6420_s9, 4  ;;  %s7350_s3 = sld [smem:[#allocation32_spill]]  ;;  %s225_s10 = int_to_ptr.vmem [resolvable:$true] %s224_s10 }
  0x19   : > { %s7347_s8 = scalar_select %p6541_p4, 1, 0 }
  0x1a   : > { %p5450_p5 = pneg %p6541_p4 }
  0x1b   : > { %7348 = sst [smem:[#allocation24_spill]] %s7347_s8 }
  0x1c   : > { %p6549_p6 = pnand %p5450_p5, %p7315_p1 }
  0x1e   : > { %s6114_s14 = scalar_lea.hbm %s7350_s3, 46080  ;;  %p7332_p8 = pneg %p6549_p6 }
  0x1f   : > { %p6115_p7 = scmp.ne.s32.totalorder %s7350_s3, %s6114_s14  ;;  %p6121_p11 = scmp.lt.u32.totalorder %s6114_s14, %s7350_s3 }
  0x21   : > { %p6117_p9 = pnand %p7332_p8, %p6115_p7 }
  0x23   : > { %p6118_p10 = pneg %p6117_p9 }
  0x25   : > { %p6123_p12 = pnand %p6121_p11, %p6118_p10 }
  0x27   : > { %6126 = shalt.err (!%p6123_p12)
}
  0x28   : > { %s6127_s12 = scalar_lea.vmem %s225_s10, 46080  ;;  %p6135_p5 = scmp.lt.s32.totalorder %s225_s10, %s225_s10 }
  0x29   : > { %p6128_p13 = scmp.ne.s32.totalorder %s225_s10, %s6127_s12  ;;  %p6136_p2 = scmp.lt.s32.totalorder %s6127_s12, %s6127_s12 }
  0x2b   : > { %p6130_p0 = pnand %p6128_p13, %p7332_p8  ;;  %p6137_p1 = por %p6136_p2, %p6135_p5 }
  0x2d   : > { %p6131_p3 = pneg %p6130_p0 }
  0x2f   : > { %p6138_p4 = pnand %p6137_p1, %p6131_p3 }
  0x31   : > { %6141 = shalt.err (!%p6138_p4)
}
  0x32   : > { %s7318_s13 = smov 192   ;;  %s7319_s14 = smov 12  }
  0x33   : > { %5453 = dma.hbm_to_vmem [thread:$0]  (!%p6549_p6), %s7350_s3, 46080, %s225_s10, [#allocation10], %s7318_s13, %s7318_s13, %s7319_s14  }
  0x34   : > { %s34_s17 = sadd.s32 1, %s6410_s29  ;;  %s37_s9 = sadd.s32 1, %s6414_s30 }
  0x35   : > { %p35_p1 = scmp.ge.s32.totalorder %s34_s17, 2  ;;  %p7331_p2 = scmp.eq.s32.totalorder %s6418_s6, 0 }
  0x36   : > { %s4673_s12 = sshll.u32 %s6414_s30, 1  ;;  %p89_p9 = scmp.ne.s32.totalorder %s6386_s23, %s6382_s22 }
  0x37   : > { %s7421_s17 = smov (%p35_p1, %s34_s17), 0  ;;  %s7423_s9 = smov (!%p35_p1, %s37_s9), %s6414_s30 }
  0x38   : > { %7351 = sst [smem:[#allocation25_spill]] %s7421_s17  ;;  %s6588_s27 = ssub.s32 %s6410_s29, %s7421_s17 }
  0x39   : > { %7352 = sst [smem:[#allocation26_spill]] %s6588_s27  ;;  %s4674_s28 = sadd.s32 4294967295, %s4673_s12 }
  0x3a   : > { %p39_p4 = scmp.ge.s32.totalorder %s7423_s9, 2  ;;  %p71_p7 = scmp.gt.s32.totalorder %s4674_s28, 0 }
  0x3b   : > { %p95_p10 = scmp.ne.s32.totalorder %s6382_s22, %s6378_s21  ;;  %p6605_p13 = por %p89_p9, %p7331_p2 }
  0x3c   : > { %s7425_s9 = smov (%p39_p4, %s7423_s9), 0  ;;  %s7427_s28 = smov (!%p71_p7, %s4674_s28), 0 }
  0x3d   : > { %7353 = sst [smem:[#allocation27_spill]] %s7425_s9  ;;  %s42_s10 = ssub.s32 %s6414_s30, %s7425_s9 }
  0x3e   : > { %s4675_s15 = sshll.u32 %s7425_s9, 1  ;;  %s6600_s16 = sor.u32 %s42_s10, %s6588_s27 }
  0x3f   : > { %s4676_s13 = sadd.s32 4294967295, %s4675_s15  ;;  %p7355_p0 = scmp.eq.s32.totalorder %s6535_s7, 0 }
  0x40   : > { %p75_p12 = scmp.gt.s32.totalorder %s4676_s13, 0  ;;  %s6615_s10 = sadd.s32 2, %s4673_s12 }
  0x41   : > { %p6611_p3 = por %p95_p10, %p7355_p0  ;;  %s6617_s5 = sadd.s32 2, %s4675_s15 }
  0x42   : > { %s7429_s13 = smov (!%p75_p12, %s4676_s13), 0  ;;  %p7330_p7 = scmp.lt.s32.totalorder %s6418_s6, 4 }
  0x43   : > { %s7356_s14 = scalar_select %p6611_p3, 1, 0 }
  0x44   : > { %s78_s3 = ssub.s32 %s7427_s28, %s7429_s13  ;;  %s6624_s17 = smul.u32 12, %s6410_s29 }
  0x45   : > { %7357 = sst [smem:[#allocation28_spill]] %s7356_s14  ;;  %s79_s9 = sor.u32 %s78_s3, %s6588_s27 }
  0x46   : > { %p80_p4 = scmp.eq.s32.totalorder %s79_s9, 0  ;;  %s273_s22 = sand.u32 1, %s6418_s6  }
  0x47   : > { %s7358_s8 = sadd.s32 1, %s6386_s23  ;;  %s275_s14 = sand.u32 1, %s6386_s23  }
  0x48   : > { %s6630_s2 = scalar_select %p80_p4, %s6386_s23, %s7358_s8  }
  0x49   : > { %s5422_s12 = smul.u32 12, %s275_s14  ;;  %p6637_p9 = pnand %p7330_p7, %p6605_p13 }
  0x4a   : > { %7359 = sst [smem:[#allocation29_spill]] %s6630_s2  ;;  %s5423_s3 = smul.u32 3, %s7427_s28 }
  0x4b   : > { %s277_s9 = scalar_lea.vmem [#allocation6], %s5422_s12  ;;  %s7361_s1 = sld [smem:[#allocation30_spill]] }
  0x4c   : > { %s287_s13 = sadd.s32 %s5423_s3, %s6624_s17  ;;  %s291_s29 = sshll.u32 %s277_s9, 4  ;;  %s6642_s29 = int_to_ptr.vmem [resolvable:$true] %s291_s29 }
  0x4d   : > { %s4688_s27 = sshll.u32 %s287_s13, 6  ;;  %s6423_s14 = smov [#allocation11]  }
  0x4e   : > { %s6649_s21 = sshll.u32 %s6423_s14, 4  ;;  %s6651_s23 = scalar_lea.sflag [#allocation7], %s273_s22  ;;  %s239_s21 = int_to_ptr.vmem [resolvable:$true] %s6649_s21 }
  0x4f   : > { %p6144_p12 = pneg %p6637_p9 }
  0x51   : > { %s6647_s2 = scalar_lea.hbm %s7361_s1, %s4688_s27  ;;  %s6147_s12 = scalar_lea.hbm %s7361_s1, 1536 }
  0x52   : > { %s6142_s28 = scalar_lea.hbm %s6647_s2, 192  ;;  %p6148_p4 = scmp.lt.u32.totalorder %s6647_s2, %s7361_s1 }
  0x53   : > { %p6143_p10 = scmp.ne.s32.totalorder %s6647_s2, %s6142_s28  ;;  %p6149_p1 = scmp.lt.u32.totalorder %s6147_s12, %s6142_s28 }
  0x54   : > { %p6151_p7 = scmp.lt.u32.totalorder %s6142_s28, %s6647_s2 }
  0x55   : > { %p6145_p13 = pnand %p6144_p12, %p6143_p10  ;;  %p6150_p5 = por %p6149_p1, %p6148_p4 }
  0x57   : > { %p6146_p0 = pneg %p6145_p13  ;;  %p6152_p2 = por %p6151_p7, %p6150_p5 }
  0x59   : > { %p6153_p11 = pnand %p6152_p2, %p6146_p0 }
  0x5b   : > { %6156 = shalt.err (!%p6153_p11)
}
  0x5c   : > { %s6157_s22 = scalar_lea.vmem %s6642_s29, 192  ;;  %s6424_s9 = smov [#allocation6]  }
  0x5d   : > { %p6158_p10 = scmp.ne.s32.totalorder %s6642_s29, %s6157_s22  ;;  %s6162_s8 = sshll.u32 %s6424_s9, 4  ;;  %s6163_s8 = int_to_ptr.vmem [resolvable:$false] %s6162_s8 }
  0x5e   : > { %s6164_s14 = scalar_lea.vmem %s6163_s8, 384  ;;  %p6165_p3 = scmp.lt.s32.totalorder %s6642_s29, %s6163_s8 }
  0x5f   : > { %p6160_p13 = pnand %p6158_p10, %p6144_p12  ;;  %p6166_p1 = scmp.lt.s32.totalorder %s6164_s14, %s6157_s22 }
  0x61   : > { %p6161_p8 = pneg %p6160_p13  ;;  %p6167_p4 = por %p6166_p1, %p6165_p3 }
  0x63   : > { %p6168_p5 = pnand %p6167_p4, %p6161_p8 }
  0x65   : > { %6171 = shalt.err (!%p6168_p5)
}
  0x66   : > { %5463 = dma.hbm_to_vmem [thread:$0]  (!%p6637_p9), %s6647_s2, 192, %s6642_s29, %s6651_s23  }
  0x67   : > { %s6172_s27 = scalar_lea.hbm %s7313_s4, 48  ;;  %p7362_p8 = pneg %p6549_p6 }
  0x68   : > { %p6173_p2 = scmp.ne.s32.totalorder %s7313_s4, %s6172_s27  ;;  %p6179_p7 = scmp.lt.u32.totalorder %s6172_s27, %s7313_s4 }
  0x6a   : > { %p6175_p11 = pnand %p6173_p2, %p7362_p8 }
  0x6c   : > { %p6176_p3 = pneg %p6175_p11 }
  0x6e   : > { %p6181_p12 = pnand %p6179_p7, %p6176_p3 }
  0x70   : > { %6184 = shalt.err (!%p6181_p12)
}
  0x71   : > { %s6185_s2 = scalar_lea.vmem %s239_s21, 48  ;;  %p7363_p0 = pmov %p7362_p8 }
  0x72   : > { %p6186_p9 = scmp.ne.s32.totalorder %s239_s21, %s6185_s2  ;;  %s6192_s29 = scalar_lea.vmem %s239_s21, 64 }
  0x73   : > { %p6193_p1 = scmp.lt.s32.totalorder %s239_s21, %s239_s21  ;;  %p6194_p4 = scmp.lt.s32.totalorder %s6192_s29, %s6185_s2 }
  0x74   : > { %p6188_p10 = pnand %p6186_p9, %p7363_p0 }
  0x75   : > { %p6195_p5 = por %p6194_p4, %p6193_p1 }
  0x76   : > { %p6189_p13 = pneg %p6188_p10 }
  0x78   : > { %p6196_p2 = pnand %p6195_p5, %p6189_p13 }
  0x7a   : > { %6199 = shalt.err (!%p6196_p2)
}
  0x7b   : > { %5456 = dma.hbm_to_vmem [thread:$0]  (!%p6549_p6), %s7313_s4, 48, %s239_s21, [#allocation10]  }
  0x7c   : > { %s4672_s11 = sadd.s32 4294967294, %s6418_s6   ;;  %s46_s8 = sadd.s32 1, %s6398_s26 }
  0x7d   : > { %p53_p8 = scmp.ne.s32.totalorder %s6398_s26, %s6394_s25  ;;  %p7364_p11 = scmp.eq.s32.totalorder %s6600_s16, 0 }
  0x7e   : > { %p7365_p3 = scmp.eq.s32.totalorder %s6418_s6, 0  ;;  %p59_p12 = scmp.ne.s32.totalorder %s6394_s25, %s6390_s24 }
  0x7f   : > { %s6707_s14 = scalar_select %p7364_p11, %s6398_s26, %s46_s8  }
  0x80   : > { %p55_p7 = por %p7365_p3, %p53_p8  ;;  %p7366_p9 = scmp.eq.s32.totalorder %s6535_s7, 3 }
  0x81   : > { %p205_p10 = scmp.eq.s32.totalorder %s4672_s11, 3  ;;  %p7368_p13 = scmp.eq.s32.totalorder %s6535_s7, 0 }
  0x82   : > { %p6715_p0 = por %p7366_p9, %p53_p8  ;;  %s249_s21 = sand.u32 1, %s6398_s26  }
  0x83   : > { %p6721_p1 = por %p7368_p13, %p59_p12  ;;  %p6726_p6 = por %p205_p10, %p59_p12 }
  0x84   : > { %s7367_s28 = scalar_select %p6715_p0, 1, 0 }
  0x85   : > { %s7369_s18 = scalar_select %p6721_p1, 1, 0 }
  0x86   : > { %s7370_s27 = scalar_select %p6726_p6, 1, 0 }
  0x87   : > { %s5419_s16 = smul.u32 24, %s249_s21  ;;  %p7371_p4 = scmp.lt.s32.totalorder %s6418_s6, 4 }
  0x88   : > { %s5420_s3 = smul.u32 6, %s6414_s30  ;;  %s6745_s8 = scalar_lea.sflag [#allocation4], %s249_s21 }
  0x89   : > { %p6732_p5 = pnand %p7371_p4, %p55_p7  ;;  %s253_s13 = scalar_lea.vmem [#allocation3], %s5419_s16 }
  0x8a   : > { %s260_s15 = sadd.s32 %s6624_s17, %s5420_s3  ;;  %s263_s2 = sshll.u32 %s253_s13, 4  ;;  %s6738_s2 = int_to_ptr.vmem [resolvable:$true] %s263_s2 }
  0x8b   : > { %s4685_s29 = sshll.u32 %s260_s15, 6  ;;  %p6202_p8 = pneg %p6732_p5 }
  0x8c   : > { %s6743_s11 = scalar_lea.hbm %s7309_s0, %s4685_s29  ;;  %s6205_s15 = scalar_lea.hbm %s7309_s0, 1536 }
  0x8d   : > { %s6200_s1 = scalar_lea.hbm %s6743_s11, 384  ;;  %p6206_p7 = scmp.lt.u32.totalorder %s6743_s11, %s7309_s0 }
  0x8e   : > { %p6201_p2 = scmp.ne.s32.totalorder %s6743_s11, %s6200_s1  ;;  %p6207_p12 = scmp.lt.u32.totalorder %s6205_s15, %s6200_s1 }
  0x8f   : > { %p6209_p10 = scmp.lt.u32.totalorder %s6200_s1, %s6743_s11 }
  0x90   : > { %p6203_p11 = pnand %p6202_p8, %p6201_p2  ;;  %p6208_p9 = por %p6207_p12, %p6206_p7 }
  0x92   : > { %p6204_p3 = pneg %p6203_p11  ;;  %p6210_p13 = por %p6209_p10, %p6208_p9 }
  0x94   : > { %p6211_p4 = pnand %p6210_p13, %p6204_p3 }
  0x96   : > { %6214 = shalt.err (!%p6211_p4)
}
  0x97   : > { %s6215_s21 = scalar_lea.vmem %s6738_s2, 384  ;;  %s6425_s22 = smov [#allocation3]  }
  0x98   : > { %p6216_p2 = scmp.ne.s32.totalorder %s6738_s2, %s6215_s21  ;;  %s6220_s9 = sshll.u32 %s6425_s22, 4  ;;  %s6221_s9 = int_to_ptr.vmem [resolvable:$false] %s6220_s9 }
  0x99   : > { %s6222_s16 = scalar_lea.vmem %s6221_s9, 768  ;;  %p6223_p0 = scmp.lt.s32.totalorder %s6738_s2, %s6221_s9 }
  0x9a   : > { %p6218_p11 = pnand %p6216_p2, %p6202_p8  ;;  %p6224_p7 = scmp.lt.s32.totalorder %s6222_s16, %s6215_s21 }
  0x9c   : > { %p6219_p6 = pneg %p6218_p11  ;;  %p6225_p12 = por %p6224_p7, %p6223_p0 }
  0x9e   : > { %p6226_p9 = pnand %p6225_p12, %p6219_p6 }
  0xa0   : > { %6229 = shalt.err (!%p6226_p9)
}
  0xa1   : > { %s7373_s1 = smov 12   ;;  %s7374_s3 = smov 192  }
  0xa2   : > { %s7375_s15 = sld [smem:[#allocation18_spill]]  ;;  %s7376_s13 = sld [smem:[#allocation26_spill]] }
  0xa3   : > { %5460 = dma.hbm_to_vmem [thread:$0]  (!%p6732_p5), %s6743_s11, 384, %s6738_s2, %s6745_s8, %s7374_s3, %s7374_s3, %s7373_s1  }
  0xa4   : > { %p7377_p0 = scmp.lt.s32.totalorder %s6615_s10, 3  ;;  %p7378_p6 = scmp.lt.s32.totalorder %s6617_s5, 3 }
  0xa5   : > { %s118_s12 = sadd.s32 1, %s6374_s20  ;;  %p125_p8 = scmp.ne.s32.totalorder %s6374_s20, %s6370_s19 }
  0xa6   : > { %s7431_s10 = smov (!%p7377_p0, %s6615_s10), 3  ;;  %s7433_s5 = smov (!%p7378_p6, %s6617_s5), 3 }
  0xa7   : > { %s114_s29 = ssub.s32 %s7431_s10, %s7433_s5  ;;  %p7379_p10 = scmp.eq.s32.totalorder %s6418_s6, 0 }
  0xa8   : > { %p131_p3 = scmp.ne.s32.totalorder %s6370_s19, %s7375_s15  ;;  %s115_s21 = sor.u32 %s114_s29, %s7376_s13 }
  0xa9   : > { %p127_p13 = por %p125_p8, %p7379_p10  ;;  %p116_p4 = scmp.eq.s32.totalorder %s115_s21, 0 }
  0xaa   : > { %p7380_p2 = scmp.eq.s32.totalorder %s6535_s7, 0  ;;  %s300_s9 = sand.u32 1, %s6374_s20  }
  0xab   : > { %s5426_s2 = smul.u32 3, %s7431_s10  ;;  %p7382_p5 = scmp.lt.s32.totalorder %s6418_s6, 4 }
  0xac   : > { %p6792_p11 = por %p131_p3, %p7380_p2  ;;  %s5425_s8 = smul.u32 12, %s300_s9 }
  0xad   : > { %s6798_s11 = scalar_select %p116_p4, %s6374_s20, %s118_s12  }
  0xae   : > { %s7381_s22 = scalar_select %p6792_p11, 1, 0 }
  0xaf   : > { %s312_s16 = sadd.s32 %s5426_s2, %s6624_s17  ;;  %p6803_p7 = pnand %p7382_p5, %p127_p13 }
  0xb0   : > { %s4690_s1 = sshll.u32 %s312_s16, 6  ;;  %s7384_s13 = sld [smem:[#allocation31_spill]] }
  0xb1   : > { %s302_s10 = scalar_lea.vmem [#allocation8], %s5425_s8  ;;  %p6232_p9 = pneg %p6803_p7 }
  0xb2   : > { %s316_s12 = sshll.u32 %s302_s10, 4  ;;  %s317_s12 = int_to_ptr.vmem [resolvable:$true] %s316_s12 }
  0xb6   : > { %s6810_s29 = scalar_lea.hbm %s7384_s13, %s4690_s1  ;;  %s6235_s2 = scalar_lea.hbm %s7384_s13, 1536 }
  0xb7   : > { %s6230_s17 = scalar_lea.hbm %s6810_s29, 192  ;;  %p6236_p8 = scmp.lt.u32.totalorder %s6810_s29, %s7384_s13 }
  0xb8   : > { %p6231_p12 = scmp.ne.s32.totalorder %s6810_s29, %s6230_s17  ;;  %p6237_p3 = scmp.lt.u32.totalorder %s6235_s2, %s6230_s17 }
  0xb9   : > { %p6239_p13 = scmp.lt.u32.totalorder %s6230_s17, %s6810_s29 }
  0xba   : > { %p6233_p0 = pnand %p6232_p9, %p6231_p12  ;;  %p6238_p10 = por %p6237_p3, %p6236_p8 }
  0xbc   : > { %p6234_p6 = pneg %p6233_p0  ;;  %p6240_p4 = por %p6239_p13, %p6238_p10 }
  0xbe   : > { %p6241_p2 = pnand %p6240_p4, %p6234_p6 }
  0xc0   : > { %6244 = shalt.err (!%p6241_p2)
}
  0xc1   : > { %s6245_s8 = scalar_lea.vmem %s317_s12, 192  ;;  %s6426_s3 = smov [#allocation8]  }
  0xc2   : > { %p6246_p5 = scmp.ne.s32.totalorder %s317_s12, %s6245_s8  ;;  %s6250_s15 = sshll.u32 %s6426_s3, 4  ;;  %s6251_s15 = int_to_ptr.vmem [resolvable:$false] %s6250_s15 }
  0xc3   : > { %s6252_s10 = scalar_lea.vmem %s6251_s15, 384  ;;  %p6253_p11 = scmp.lt.s32.totalorder %s317_s12, %s6251_s15 }
  0xc4   : > { %p6248_p12 = pnand %p6246_p5, %p6232_p9  ;;  %p6254_p1 = scmp.lt.s32.totalorder %s6252_s10, %s6245_s8 }
  0xc6   : > { %p6249_p0 = pneg %p6248_p12  ;;  %p6255_p3 = por %p6254_p1, %p6253_p11 }
  0xc8   : > { %p6256_p8 = pnand %p6255_p3, %p6249_p0 }
  0xca   : > { %6259 = shalt.err (!%p6256_p8)
}
  0xcb   : > { %5466 = dma.hbm_to_vmem [thread:$0]  (!%p6803_p7), %s6810_s29, 192, %s317_s12, %s6651_s23  }
  0xcc   : > { %s7385_s17 = sld [smem:[#allocation24_spill]] }
  0xd2   : > { %p7386_p6 = scmp.ne.s32.totalorder %s7385_s17, 0 }
  0xd3   : > { %s6837_s21 = sand.u32 (!%p7386_p6), 1, %s6394_s25   ;;  %p7387_p1 = scmp.ne.s32.totalorder (!%p7386_p6), %s7369_s18, 0 }
  0xd4   : > { %325 = sbr.rel (%p7386_p6) target bundleno = 1018 (0x3fa), region = 40  ;;  %s328_s2 = scalar_lea.sflag (!%p7386_p6), [#allocation4], %s6837_s21 }
  0xd5   : > { %s5428_s9 = smul.u32 (!%p7386_p6), 24, %s6837_s21 }
  0xd7   : > { %s331_s16 = scalar_lea.vmem (!%p7386_p6), [#allocation3], %s5428_s9 }
  0xdb   : > { %6345 = dma.done.wait (%p7387_p1), %s328_s2, 384  }
  0xdc   : > { %6347 = vsyncadd (%p7387_p1), %s328_s2, 4294966912  ;;  %s7388_s5 = sld [smem:[#allocation19_spill]]  ;;  %s7389_s23 = sld [smem:[#allocation28_spill]] }
  0xdd   : > { %s336_s29 = sand.u32 1, %s6535_s7  }
  0xde   : > { %s337_s8 = scalar_lea.sflag [#allocation7], %s336_s29 }
  0xe2   : > { %s338_s12 = sand.u32 1, %s7388_s5   ;;  %p7390_p11 = scmp.ne.s32.totalorder %s7389_s23, 0 }
  0xe3   : > { %s5429_s1 = smul.u32 12, %s338_s12 }
  0xe5   : > { %s340_s3 = scalar_lea.vmem [#allocation6], %s5429_s1 }
  0xe6   : > { %6349 = dma.done.wait (%p7390_p11), %s337_s8, 192  }
  0xe7   : > { %6351 = vsyncadd (%p7390_p11), %s337_s8, 4294967104  ;;  %s347_s15 = sand.u32 1, %s6370_s19   ;;  %p7391_p7 = scmp.ne.s32.totalorder %s7381_s22, 0 }
  0xe8   : > { %s6852_s10 = smul.u32 12, %s347_s15 }
  0xea   : > { %s349_s18 = scalar_lea.vmem [#allocation8], %s6852_s10 }
  0xeb   : > { %6353 = dma.done.wait (%p7391_p7), %s337_s8, 192  }
  0xec   : > { %6355 = vsyncadd (%p7391_p7), %s337_s8, 4294967104  ;;  %p7392_p9 = scmp.eq.s32.totalorder %s6535_s7, 0 }
  0xee   : > { %6357 = dma.done.wait (%p7392_p9), [#allocation10], 46128   ;;  %p7393_p10 = pmov %p7392_p9 }
  0xef   : > { %s5431_s17 = smul.u32 12, %s6837_s21  ;;  %v404_v0 = vld [vmem:[%s331_s16] sm:$0xff]  ;;  %v405_v1 = vld [vmem:[%s331_s16 + $0x8] sm:$0xf]  ;;  %v406_v2 = vld [vmem:[%s331_s16 + $0xc] sm:$0xff]  ;;  %s7394_s22 = sld [smem:[#allocation22_spill]] }
  0xf0   : > { %6359 = vsyncadd (%p7393_p10), [#allocation10], 4294921168  ;;  %408 = vst [vmem:[#allocation2 + $0x18] sm:$0xff] %v404_v0  ;;  %v407_v3 = vld [vmem:[%s331_s16 + $0x14] sm:$0xf] }
  0xf1   : > { %409 = vst [vmem:[#allocation2 + $0x20] sm:$0xf] %v405_v1  ;;  %410 = vst [vmem:[#allocation2 + $0x24] sm:$0xff] %v406_v2  ;;  %s6864_s9 = scalar_lea.vmem [#allocation12], %s5431_s17 }
  0xf2   : > { %411 = vst [vmem:[#allocation2 + $0x2c] sm:$0xf] %v407_v3 }
  0xf5   : > { %p4694_p13 = scmp.le.s32.totalorder %s7394_s22, 0 }
  0xf6   : > { %v416_v4 = vld [vmem:[%s340_s3] sm:$0xff] (!%p4694_p13)  ;;  %v417_v5 = vld [vmem:[%s340_s3 + $0x8] sm:$0xf] (!%p4694_p13) }
  0xf7   : > { %415 = sbr.rel (%p4694_p13) target bundleno = 254 (0xfe), region = 64  ;;  %418 = vst [vmem:[#allocation2 + $0xc] sm:$0xff] (!%p4694_p13), %v416_v4  ;;  %419 = vst [vmem:[#allocation2 + $0x14] sm:$0xf] (!%p4694_p13), %v417_v5 }
  0xfe PF: > { %s7395_s7 = sld [smem:[#allocation22_spill]] }
 0x104   : > { %p4695_p4 = scmp.ne.s32.totalorder %s7395_s7, 0 }
 0x105   : > { %v6427_v6 = vmov (!%p4695_p4), 0  }
 0x106   : > { %423 = sbr.rel (%p4695_p4) target bundleno = 269 (0x10d), region = 68  ;;  %424 = vst [vmem:[#allocation2 + $0xc] sm:$0xff] (!%p4695_p4), %v6427_v6  ;;  %425 = vst [vmem:[#allocation2 + $0x14] sm:$0xf] (!%p4695_p4), %v6427_v6 }
 0x10d PF: > { %s7396_s2 = sld [smem:[#allocation22_spill]] }
 0x113   : > { %p4696_p2 = scmp.ge.s32.totalorder %s7396_s2, 1 }
 0x114   : > { %v430_v7 = vld [vmem:[%s349_s18] sm:$0xff] (!%p4696_p2)  ;;  %v431_v8 = vld [vmem:[%s349_s18 + $0x8] sm:$0xf] (!%p4696_p2) }
 0x115   : > { %429 = sbr.rel (%p4696_p2) target bundleno = 284 (0x11c), region = 72  ;;  %432 = vst [vmem:[#allocation2 + $0x30] sm:$0xff] (!%p4696_p2), %v430_v7  ;;  %433 = vst [vmem:[#allocation2 + $0x38] sm:$0xf] (!%p4696_p2), %v431_v8 }
 0x11c PF: > { %s7397_s16 = sld [smem:[#allocation22_spill]] }
 0x122   : > { %p4697_p5 = scmp.ne.s32.totalorder %s7397_s16, 1 }
 0x123   : > { %v6428_v9 = vmov (!%p4697_p5), 0  }
 0x124   : > { %437 = sbr.rel (%p4697_p5) target bundleno = 299 (0x12b), region = 76  ;;  %438 = vst [vmem:[#allocation2 + $0x30] sm:$0xff] (!%p4697_p5), %v6428_v9  ;;  %439 = vst [vmem:[#allocation2 + $0x38] sm:$0xf] (!%p4697_p5), %v6428_v9 }
 0x12b PF: > { %v5599_v10 = vld [vmem:[#allocation9 + $0x244] ss:$12 sps:$4 sm:$0xff]   ;;  %v6429_v12 = vmov 0   ;;  %v5603_v13 = vld [vmem:[#allocation9 + $0x240] ss:$12 sps:$4 sm:$0xff]   ;;  %vm1277_vm1 = vcmask 1044480  }
 0x12c   : > { %v5601_v11 = vld [vmem:[#allocation9 + $0x3c4] ss:$12 sps:$4 sm:$0xff]   ;;  %1176 = vmatprep.mubr.bf16.mxu0 %v6429_v12  ;;  %1101 = vmatprep.subr.bf16.mxu1 %v5599_v10  ;;  %v5604_v14 = vld [vmem:[#allocation9 + $0x3c0] ss:$12 sps:$4 sm:$0xff]   ;;  %v5605_v15 = vld [vmem:[#allocation9 + $0x25c] ss:$12 sps:$4 sm:$0xff]  }
 0x12d   : > { %1144 = vmatprep.subr.bf16.mxu0 %v5601_v11  ;;  %1102 = vmatpush1.bf16.msra.mxu1 %v5603_v13  ;;  %v5607_v16 = vld [vmem:[#allocation9 + $0x3dc] ss:$12 sps:$4 sm:$0xff]   ;;  %v5609_v17 = vld [vmem:[#allocation9 + $0x258] ss:$12 sps:$4 sm:$0xff]   ;;  %v5611_v19 = vld [vmem:[#allocation9 + $0x274] ss:$12 sps:$4 sm:$0xff]  }
 0x12e   : > { %1145 = vmatpush1.bf16.msra.mxu0 %v5604_v14  ;;  %1103 = vmatprep.subr.bf16.mxu1 %v5605_v15  ;;  %v5610_v18 = vld [vmem:[#allocation9 + $0x3d8] ss:$12 sps:$4 sm:$0xff]   ;;  %v5613_v20 = vld [vmem:[#allocation9 + $0x3f4] ss:$12 sps:$4 sm:$0xff]   ;;  %v5615_v21 = vld [vmem:[#allocation9 + $0x270] ss:$12 sps:$4 sm:$0xff]  }
 0x12f   : > { %1146 = vmatprep.subr.bf16.mxu0 %v5607_v16  ;;  %v5616_v22 = vld [vmem:[#allocation9 + $0x3f0] ss:$12 sps:$4 sm:$0xff]   ;;  %v5617_v23 = vld [vmem:[#allocation9 + $0x28c] ss:$12 sps:$4 sm:$0xff]   ;;  %v5621_v25 = vld [vmem:[#allocation9 + $0x288] ss:$12 sps:$4 sm:$0xff]  }
 0x130   : > { %v5619_v24 = vld [vmem:[#allocation9 + $0x40c] ss:$12 sps:$4 sm:$0xff]   ;;  %v5622_v26 = vld [vmem:[#allocation9 + $0x408] ss:$12 sps:$4 sm:$0xff]   ;;  %v5623_v27 = vld [vmem:[#allocation9 + $0x2a4] ss:$12 sps:$4 sm:$0xff]  }
 0x131   : > { %1104 = vmatpush1.bf16.msra.mxu1 %v5609_v17  ;;  %v5625_v28 = vld [vmem:[#allocation9 + $0x424] ss:$12 sps:$4 sm:$0xff]   ;;  %v5627_v29 = vld [vmem:[#allocation9 + $0x2a0] ss:$12 sps:$4 sm:$0xff]   ;;  %v5629_v31 = vld [vmem:[#allocation9 + $0x2bc] ss:$12 sps:$4 sm:$0xff]  }
 0x132   : > { %1147 = vmatpush1.bf16.msra.mxu0 %v5610_v18  ;;  %1105 = vmatprep.subr.bf16.mxu1 %v5611_v19  ;;  %v5628_v30 = vld [vmem:[#allocation9 + $0x420] ss:$12 sps:$4 sm:$0xff]   ;;  %v5631_v32 = vld [vmem:[#allocation9 + $0x43c] ss:$12 sps:$4 sm:$0xff]   ;;  %v5633_v33 = vld [vmem:[#allocation9 + $0x2b8] ss:$12 sps:$4 sm:$0xff]  }
 0x133   : > { %1148 = vmatprep.subr.bf16.mxu0 %v5613_v20  ;;  %v5634_v34 = vld [vmem:[#allocation9 + $0x438] ss:$12 sps:$4 sm:$0xff]   ;;  %v5635_v35 = vld [vmem:[#allocation9 + $0x2d4] ss:$12 sps:$4 sm:$0xff]   ;;  %v5639_v37 = vld [vmem:[#allocation9 + $0x2d0] ss:$12 sps:$4 sm:$0xff]  }
 0x134   : > { %v5637_v36 = vld [vmem:[#allocation9 + $0x454] ss:$12 sps:$4 sm:$0xff]   ;;  %v5640_v38 = vld [vmem:[#allocation9 + $0x450] ss:$12 sps:$4 sm:$0xff]   ;;  %v5641_v39 = vld [vmem:[#allocation9 + $0x2ec] ss:$12 sps:$4 sm:$0xff]  }
 0x135   : > { %1106 = vmatpush1.bf16.msra.mxu1 %v5615_v21  ;;  %v441_v40 = vld [vmem:[#allocation2 + $0x14] sm:$0x8]  ;;  %v443_v41 = vld [vmem:[#allocation2 + $0x20] sm:$0xf]  ;;  %v543_v42 = vld [vmem:[#allocation2 + $0x2c] sm:$0xf] }
 0x136   : > { %1149 = vmatpush1.bf16.msra.mxu0 %v5616_v22  ;;  %1107 = vmatprep.subr.bf16.mxu1 %v5617_v23  ;;  %v5643_v43 = vld [vmem:[#allocation9 + $0x46c] ss:$12 sps:$4 sm:$0xff]   ;;  %v6875_v44 = vcombine.low %v441_v40, %v443_v41  ;;  %v4703_v45 = vcombine.low %v543_v42, %v543_v42  ;;  %v5645_v46 = vld [vmem:[#allocation9 + $0x2e8] ss:$12 sps:$4 sm:$0xff]   ;;  %v5647_v52 = vld [vmem:[#allocation9 + $0x304] ss:$12 sps:$4 sm:$0xff]  }
 0x137   : > { %1150 = vmatprep.subr.bf16.mxu0 %v5619_v24  ;;  %v5646_v47 = vld [vmem:[#allocation9 + $0x468] ss:$12 sps:$4 sm:$0xff]   ;;  %v5651_v53 = vld [vmem:[#allocation9 + $0x4] ss:$12 sps:$4 sm:$0xff]   ;;  %vm662_vm0 = vsmask.f32 4352 }
 0x138   : > { %v698_v48 = vshrl.u32 %v6875_v44, 16  ;;  %v701_v49 = vshll.u32 %v6875_v44, 16  ;;  %v706_v50 = vshrl.u32 %v4703_v45, 16  ;;  %v709_v51 = vshll.u32 %v4703_v45, 16  ;;  %v5649_v58 = vld [vmem:[#allocation9] ss:$12 sps:$4 sm:$0xff]  }
 0x139   : > { %1108 = vmatpush1.bf16.msra.mxu1 %v5621_v25  ;;  %v5652_v61 = vld [vmem:[#allocation9 + $0x300] ss:$12 sps:$4 sm:$0xff]   ;;  %v5655_v63 = vld [vmem:[#allocation9 + $0x31c] ss:$12 sps:$4 sm:$0xff]   ;;  %v5657_v1 = vld [vmem:[#allocation9 + $0x18] ss:$12 sps:$4 sm:$0xff]  }
 0x13a   : > { %1151 = vmatpush1.bf16.msra.mxu0 %v5622_v26  ;;  %1109 = vmatprep.subr.bf16.mxu1 %v5623_v27  ;;  %v700_v54 = vrot.slane %v698_v48, 3  ;;  %v703_v55 = vrot.slane %v701_v49, 4  ;;  %v708_v56 = vrot.slane %v706_v50, 3  ;;  %v711_v57 = vrot.slane %v709_v51, 4  ;;  %v5659_v0 = vld [vmem:[#allocation9 + $0x1c] ss:$12 sps:$4 sm:$0xff]  }
 0x13b   : > { %1152 = vmatprep.subr.bf16.mxu0 %v5625_v28  ;;  %v5660_v2 = vld [vmem:[#allocation9 + $0x318] ss:$12 sps:$4 sm:$0xff]   ;;  %v5661_v3 = vld [vmem:[#allocation9 + $0x334] ss:$12 sps:$4 sm:$0xff]   ;;  %v5663_v5 = vld [vmem:[#allocation9 + $0x30] ss:$12 sps:$4 sm:$0xff]  }
 0x13c   : > { %v704_v59 = vor.u32 %v703_v55, %v700_v54  ;;  %v712_v60 = vor.u32 %v711_v57, %v708_v56  ;;  %v5665_v4 = vld [vmem:[#allocation9 + $0x34] ss:$12 sps:$4 sm:$0xff]   ;;  %v5666_v6 = vld [vmem:[#allocation9 + $0x330] ss:$12 sps:$4 sm:$0xff]   ;;  %v5667_v7 = vld [vmem:[#allocation9 + $0x34c] ss:$12 sps:$4 sm:$0xff]  }
 0x13d   : > { %1110 = vmatpush1.bf16.msra.mxu1 %v5627_v29  ;;  %v5671_v8 = vld [vmem:[#allocation9 + $0x4c] ss:$12 sps:$4 sm:$0xff]   ;;  %v5669_v9 = vld [vmem:[#allocation9 + $0x48] ss:$12 sps:$4 sm:$0xff]   ;;  %v5673_v11 = vld [vmem:[#allocation9 + $0x364] ss:$12 sps:$4 sm:$0xff]  }
 0x13e   : > { %1153 = vmatpush1.bf16.msra.mxu0 %v5628_v30  ;;  %1111 = vmatprep.subr.bf16.mxu1 %v5629_v31  ;;  %v6880_v62 = vsel %vm662_vm0, %v704_v59, %v712_v60  ;;  %v5672_v10 = vld [vmem:[#allocation9 + $0x348] ss:$12 sps:$4 sm:$0xff]   ;;  %v5677_v13 = vld [vmem:[#allocation9 + $0x64] ss:$12 sps:$4 sm:$0xff]   ;;  %v6883_v15 = vld [vmem:[#allocation2 + $0x18] sm:$0xff]  ;;  %vm6431_vm2 = vmmov 0  }
 0x13f   : > { %1154 = vmatprep.subr.bf16.mxu0 %v5631_v32  ;;  %v440_v14 = vld [vmem:[#allocation2 + $0xc] sm:$0x88]  ;;  %v6885_v16 = vld [vmem:[#allocation2 + $0x24] sm:$0xff]  ;;  %v5681_v29 = vld [vmem:[#allocation9 + $0x78] ss:$12 sps:$4 sm:$0xff]   ;;  %vm3332_vm4 = vcmask 1046528  }
 0x140   : > { %v6888_v17 = vcombine.high %v440_v14, %v6883_v15  ;;  %v4702_v18 = vcombine.high %v6885_v16, %v6885_v16  ;;  %v5675_v19 = vld [vmem:[#allocation9 + $0x60] ss:$12 sps:$4 sm:$0xff]   ;;  %v6893_v20 = vcombine.low %v440_v14, %v6883_v15  ;;  %v4701_v21 = vcombine.low %v6885_v16, %v6885_v16  ;;  %v5679_v27 = vld [vmem:[#allocation9 + $0x37c] ss:$12 sps:$4 sm:$0xff]   ;;  %s7398_s5 = sld [smem:[#allocation22_spill]]  ;;  %s7399_s23 = sld [smem:[#allocation21_spill]] }
 0x141   : > { %1112 = vmatpush1.bf16.msra.mxu1 %v5633_v33  ;;  %v5678_v22 = vld [vmem:[#allocation9 + $0x360] ss:$12 sps:$4 sm:$0xff]   ;;  %v5683_v28 = vld [vmem:[#allocation9 + $0x7c] ss:$12 sps:$4 sm:$0xff]   ;;  %vm2627_vm3 = vsmask.f32 7424 }
 0x142   : > { %1155 = vmatpush1.bf16.msra.mxu0 %v5634_v34  ;;  %1113 = vmatprep.subr.bf16.mxu1 %v5635_v35  ;;  %v681_v23 = vshrl.u32 %v6888_v17, 16  ;;  %v684_v24 = vshll.u32 %v6888_v17, 16  ;;  %v689_v25 = vshrl.u32 %v4702_v18, 16  ;;  %v692_v26 = vshll.u32 %v4702_v18, 16  ;;  %v5684_v34 = vld [vmem:[#allocation9 + $0x378] ss:$12 sps:$4 sm:$0xff]  }
 0x143   : > { %1156 = vmatprep.subr.bf16.mxu0 %v5637_v36  ;;  %v5685_v35 = vld [vmem:[#allocation9 + $0x394] ss:$12 sps:$4 sm:$0xff]   ;;  %v664_v36 = vshrl.u32 %v6893_v20, 16  ;;  %v672_v40 = vshrl.u32 %v4701_v21, 16  ;;  %v675_v41 = vshll.u32 %v4701_v21, 16  ;;  %v1281_v18 = vrot.slane %v6888_v17, 3 }
 0x144   : > { %v683_v30 = vrot.slane %v681_v23, 3  ;;  %v686_v31 = vrot.slane %v684_v24, 4  ;;  %v691_v32 = vrot.slane %v689_v25, 3  ;;  %v694_v33 = vrot.slane %v692_v26, 4  ;;  %v5689_v42 = vld [vmem:[#allocation9 + $0x94] ss:$12 sps:$4 sm:$0xff]  }
 0x145   : > { %1114 = vmatpush1.bf16.msra.mxu1 %v5639_v37  ;;  %v667_v37 = vshll.u32 %v6893_v20, 16  ;;  %v674_v49 = vrot.slane %v672_v40, 3  ;;  %v677_v50 = vrot.slane %v675_v41, 4  ;;  %v5691_v51 = vld [vmem:[#allocation9 + $0x3ac] ss:$12 sps:$4 sm:$0xff]   ;;  %vm4184_vm5 = vcmask 1041408  }
 0x146   : > { %1157 = vmatpush1.bf16.msra.mxu0 %v5640_v38  ;;  %1115 = vmatprep.subr.bf16.mxu1 %v5641_v39  ;;  %v687_v38 = vor.u32 %v686_v31, %v683_v30  ;;  %v695_v39 = vor.u32 %v694_v33, %v691_v32  ;;  %v5696_v54 = vld [vmem:[#allocation9 + $0x3a8] ss:$12 sps:$4 sm:$0xff]   ;;  %v5700_v59 = vld [vmem:[#allocation9 + $0xc0] ss:$12 sps:$4 sm:$0xff]   ;;  %v5720_v14 = vld [vmem:[#allocation9 + $0x290] ss:$12 sps:$4 sm:$0xff]  }
 0x147   : > { %1158 = vmatprep.subr.bf16.mxu0 %v5643_v43  ;;  %v5687_v43 = vld [vmem:[#allocation9 + $0x90] ss:$12 sps:$4 sm:$0xff]   ;;  %v669_v48 = vrot.slane %v667_v37, 4  ;;  %v5699_v55 = vld [vmem:[#allocation9 + $0x308] ss:$12 sps:$4 sm:$0xff]   ;;  %v678_v57 = vor.u32 %v677_v50, %v674_v49  ;;  %v1278_v37 = vrot.slane %v6893_v20, 3 }
 0x148   : > { %v696_v45 = vsel %vm662_vm0, %v687_v38, %v695_v39  ;;  %v5705_v60 = vld [vmem:[#allocation9 + $0x248] ss:$12 sps:$4 sm:$0xff]   ;;  %v5726_v25 = vld [vmem:[#allocation9 + $0x380] ss:$12 sps:$4 sm:$0xff]   ;;  %v5731_v17 = vld [vmem:[#allocation9 + $0x398] ss:$12 sps:$4 sm:$0xff]  }
 0x149   : > { %1116 = vmatpush1.bf16.msra.mxu1 %v5645_v46  ;;  %v5690_v46 = vld [vmem:[#allocation9 + $0x390] ss:$12 sps:$4 sm:$0xff]   ;;  %1133 = vmatprep.mubr.bf16.mxu1 %v696_v45  ;;  %v5725_v23 = vld [vmem:[#allocation9 + $0x2a8] ss:$12 sps:$4 sm:$0xff]   ;;  %v5735_v31 = vld [vmem:[#allocation9 + $0x2d8] ss:$12 sps:$4 sm:$0xff]  }
 0x14a   : > { %1159 = vmatpush1.bf16.msra.mxu0 %v5646_v47  ;;  %1117 = vmatprep.subr.bf16.mxu1 %v5647_v52  ;;  %v666_v47 = vrot.slane %v664_v36, 3  ;;  %v5695_v52 = vld [vmem:[#allocation9 + $0xac] ss:$12 sps:$4 sm:$0xff]   ;;  %v5729_v26 = vld [vmem:[#allocation9 + $0x13c] ss:$12 sps:$4 sm:$0xff]   ;;  %vm4465_vm6 = vcmask 1041409  }
 0x14b   : > { %1674 = vmatprep.subr.bf16.mxu0 %v5651_v53  ;;  %v5693_v53 = vld [vmem:[#allocation9 + $0xa8] ss:$12 sps:$4 sm:$0xff]   ;;  %v5732_v30 = vld [vmem:[#allocation9 + $0x150] ss:$12 sps:$4 sm:$0xff]   ;;  %v5742_v40 = vld [vmem:[#allocation9 + $0x180] ss:$12 sps:$4 sm:$0xff]  }
 0x14c   : > { %v670_v56 = vor.u32 %v669_v48, %v666_v47  ;;  %v5736_v32 = vld [vmem:[#allocation9 + $0x3b0] ss:$12 sps:$4 sm:$0xff]   ;;  %v5745_v41 = vld [vmem:[#allocation9 + $0x3c8] ss:$12 sps:$4 sm:$0xff]   ;;  %v5747_v20 = vld [vmem:[#allocation9 + $0x198] ss:$12 sps:$4 sm:$0xff]  }
 0x14d   : > { %1177 = vmatmul.mubr.bf16.vlgmr.msra.gmra.mrb[0].mxu0 %v6880_v62  ;;  %1118 = vmatpush1.bf16.msra.mxu1 %v5652_v61  ;;  %v5740_v36 = vld [vmem:[#allocation9 + $0x2f0] ss:$12 sps:$4 sm:$0xff]   ;;  %v5753_v47 = vld [vmem:[#allocation9 + $0x1b4] ss:$12 sps:$4 sm:$0xff]   ;;  %v5754_v49 = vld [vmem:[#allocation9 + $0x3f8] ss:$12 sps:$4 sm:$0xff]  }
 0x14e   : > { %1675 = vmatpush1.bf16.msra.mxu0 %v5649_v58  ;;  %1119 = vmatprep.subr.bf16.mxu1 %v5655_v63  ;;  %v5702_v58 = vld [vmem:[#allocation9 + $0xc4] ss:$12 sps:$4 sm:$0xff]   ;;  %v6903_v61 = vsel %vm662_vm0, %v670_v56, %v678_v57  ;;  %v5706_v63 = vld [vmem:[#allocation9 + $0x320] ss:$12 sps:$4 sm:$0xff]   ;;  %v5765_v56 = vld [vmem:[#allocation9 + $0x1fc] ss:$12 sps:$4 sm:$0xff]  }
 0x14f   : > { %1676 = vmatprep.subr.bf16.mxu0 %v5659_v0  ;;  %v5709_v0 = vld [vmem:[#allocation9 + $0xdc] ss:$12 sps:$4 sm:$0xff]   ;;  %v5744_v39 = vld [vmem:[#allocation9 + $0x184] ss:$12 sps:$4 sm:$0xff]   ;;  %v5757_v50 = vld [vmem:[#allocation9 + $0x1cc] ss:$12 sps:$4 sm:$0xff]  }
 0x150   : > { %v5751_v48 = vld [vmem:[#allocation9 + $0x1b0] ss:$12 sps:$4 sm:$0xff]   ;;  %v5763_v57 = vld [vmem:[#allocation9 + $0x1f8] ss:$12 sps:$4 sm:$0xff]   ;;  %vm4467_vm7 = vcmask 1042434   ;;  %vm4469_vm8 = vcmask 1043459  }
 0x151   : > { %1120 = vmatpush1.bf16.msra.mxu1 %v5660_v2  ;;  %v6911_v2 = vcombine.low %v6883_v15, %v6885_v16  ;;  %vm4471_vm9 = vcmask 1044484   ;;  %vm4473_vm10 = vcmask 1045509   ;;  %vm4475_vm11 = vcmask 1046534   ;;  %s5432_s29 = smul.u32 3, %s7398_s5  ;;  %s4516_s3 = sshll.u32 %s6864_s9, 4  ;;  %s7232_s3 = int_to_ptr.vmem [resolvable:$true] %s4516_s3 }
 0x152   : > { %1677 = vmatpush1.bf16.msra.mxu0 %v5657_v1  ;;  %1121 = vmatprep.subr.bf16.mxu1 %v5661_v3  ;;  %v6907_v1 = vcombine.high %v6883_v15, %v6885_v16  ;;  %v5707_v3 = vld [vmem:[#allocation9 + $0xd8] ss:$12 sps:$4 sm:$0xff]   ;;  %v5721_v15 = vld [vmem:[#allocation9 + $0x368] ss:$12 sps:$4 sm:$0xff]   ;;  %s5433_s12 = smul.u32 6, %s7399_s23  ;;  %vm4477_vm12 = vcmask 1047559  }
 0x153   : > { %1678 = vmatprep.subr.bf16.mxu0 %v5665_v4  ;;  %v5710_v4 = vld [vmem:[#allocation9 + $0x260] ss:$12 sps:$4 sm:$0xff]   ;;  %s7400_s18 = sld [smem:[#allocation33_spill]]  ;;  %s4500_s7 = scalar_lea.sflag [#allocation5], %s6837_s21 }
 0x154   : > { %s4512_s1 = sadd.s32 %s5433_s12, %s5432_s29  ;;  %s6260_s2 = scalar_lea.vmem %s7232_s3, 192 }
 0x155   : > { %1122 = vmatpush1.bf16.msra.mxu1 %v5666_v6  ;;  %v5714_v6 = vld [vmem:[#allocation9 + $0xf4] ss:$12 sps:$4 sm:$0xff]   ;;  %s5103_s8 = sshll.u32 %s4512_s1, 6  ;;  %p6261_p12 = scmp.ne.s32.totalorder %s7232_s3, %s6260_s2 }
 0x156   : > { %1679 = vmatpush1.bf16.msra.mxu0 %v5663_v5  ;;  %1123 = vmatprep.subr.bf16.mxu1 %v5667_v7  ;;  %v5711_v5 = vld [vmem:[#allocation9 + $0x338] ss:$12 sps:$4 sm:$0xff]   ;;  %v5712_v7 = vld [vmem:[#allocation9 + $0xf0] ss:$12 sps:$4 sm:$0xff]   ;;  %p7402_p0 = scmp.ne.s32.totalorder %s7367_s28, 0  ;;  %s6433_s16 = smov [#allocation12]  }
 0x157   : > { %1680 = vmatprep.subr.bf16.mxu0 %v5671_v8  ;;  %v5715_v8 = vld [vmem:[#allocation9 + $0x278] ss:$12 sps:$4 sm:$0xff]   ;;  %s6264_s5 = sshll.u32 %s6433_s16, 4  ;;  %s6265_s5 = int_to_ptr.vmem [resolvable:$false] %s6264_s5 }
 0x158   : > { %p6262_p3 = pnand %p6261_p12, %p7402_p0  ;;  %s6266_s23 = scalar_lea.vmem %s6265_s5, 384 }
 0x159   : > { %1124 = vmatpush1.bf16.msra.mxu1 %v5672_v10  ;;  %v5719_v10 = vld [vmem:[#allocation9 + $0x10c] ss:$12 sps:$4 sm:$0xff]   ;;  %s7401_s17 = smov %s7400_s18  ;;  %s7230_s22 = scalar_lea.hbm %s7400_s18, %s5103_s8 }
 0x15a   : > { %1681 = vmatpush1.bf16.msra.mxu0 %v5669_v9  ;;  %1125 = vmatprep.subr.bf16.mxu1 %v5673_v11  ;;  %v5716_v9 = vld [vmem:[#allocation9 + $0x350] ss:$12 sps:$4 sm:$0xff]   ;;  %v5717_v11 = vld [vmem:[#allocation9 + $0x108] ss:$12 sps:$4 sm:$0xff]   ;;  %p6263_p8 = pneg %p6262_p3  ;;  %p6267_p6 = scmp.lt.s32.totalorder %s7232_s3, %s6265_s5 }
 0x15b   : > { %1682 = vmatprep.subr.bf16.mxu0 %v5677_v13  ;;  %v444_v13 = vld [vmem:[#allocation2 + $0x24] sm:$0x77]  ;;  %p6268_p1 = scmp.lt.s32.totalorder %s6266_s23, %s6260_s2 }
 0x15c   : > { %v4777_v16 = vcombine.high %v444_v13, %v444_v13  ;;  %v4776_v33 = vcombine.low %v444_v13, %v444_v13  ;;  %v5781_v13 = vld [vmem:[#allocation9 + $0xe0] ss:$12 sps:$4 sm:$0xff]  }
 0x15d   : > { %1126 = vmatpush1.bf16.msra.mxu1 %v5678_v22  ;;  %v5722_v22 = vld [vmem:[#allocation9 + $0x120] ss:$12 sps:$4 sm:$0xff]   ;;  %p6269_p11 = por %p6268_p1, %p6267_p6 }
 0x15e   : > { %1683 = vmatpush1.bf16.msra.mxu0 %v5675_v19  ;;  %1127 = vmatprep.subr.bf16.mxu1 %v5679_v27  ;;  %v5724_v19 = vld [vmem:[#allocation9 + $0x124] ss:$12 sps:$4 sm:$0xff]   ;;  %v1282_v21 = vrot.slane %v4777_v16, 3  ;;  %v1279_v38 = vrot.slane %v4776_v33, 3  ;;  %v5809_v33 = vld [vmem:[#allocation9 + $0x514] ss:$12 sps:$4 sm:$0xff]  }
 0x15f   : > { %1684 = vmatprep.subr.bf16.mxu0 %v5683_v28  ;;  %v5727_v27 = vld [vmem:[#allocation9 + $0x138] ss:$12 sps:$4 sm:$0xff]   ;;  %v5730_v28 = vld [vmem:[#allocation9 + $0x2c0] ss:$12 sps:$4 sm:$0xff]   ;;  %p6270_p7 = pnand %p6269_p11, %p6263_p8 }
 0x160   : > { %v6916_v24 = vsel %vm1277_vm1, %v1281_v18, %v1282_v21  ;;  %v5786_v16 = vld [vmem:[#allocation9 + $0xf8] ss:$12 sps:$4 sm:$0xff]   ;;  %v5789_v18 = vld [vmem:[#allocation9 + $0x4b4] ss:$12 sps:$4 sm:$0xff]  }
 0x161   : > { %1128 = vmatpush1.bf16.msra.mxu1 %v5684_v34  ;;  %1706 = vmatprep.mubr.bf16.mxu0 %v6916_v24  ;;  %v5739_v34 = vld [vmem:[#allocation9 + $0x16c] ss:$12 sps:$4 sm:$0xff]  }
 0x162   : > { %1685 = vmatpush1.bf16.msra.mxu0 %v5681_v29  ;;  %1129 = vmatprep.subr.bf16.mxu1 %v5685_v35  ;;  %v5734_v29 = vld [vmem:[#allocation9 + $0x154] ss:$12 sps:$4 sm:$0xff]   ;;  %v5790_v21 = vld [vmem:[#allocation9 + $0x38] ss:$12 sps:$4 sm:$0xff]  }
 0x163   : > { %1686 = vmatprep.subr.bf16.mxu0 %v5689_v42  ;;  %v5737_v35 = vld [vmem:[#allocation9 + $0x168] ss:$12 sps:$4 sm:$0xff]   ;;  %v6921_v42 = vsel %vm1277_vm1, %v1278_v37, %v1279_v38  ;;  %v5814_v37 = vld [vmem:[#allocation9 + $0x52c] ss:$12 sps:$4 sm:$0xff]  }
 0x164   : > { %v5812_v38 = vld [vmem:[#allocation9 + $0x528] ss:$12 sps:$4 sm:$0xff]  }
 0x165   : > { %1130 = vmatpush1.bf16.msra.mxu1 %v5690_v46  ;;  %v5750_v46 = vld [vmem:[#allocation9 + $0x3e0] ss:$12 sps:$4 sm:$0xff]  }
 0x166   : > { %1687 = vmatpush1.bf16.msra.mxu0 %v5687_v43  ;;  %1131 = vmatprep.subr.bf16.mxu1 %v5691_v51  ;;  %v6430_v43 = vmov 0.0   ;;  %v5755_v51 = vld [vmem:[#allocation9 + $0x1c8] ss:$12 sps:$4 sm:$0xff]  }
 0x167   : > { %1688 = vmatprep.subr.bf16.mxu0 %v5695_v52  ;;  %v5758_v52 = vld [vmem:[#allocation9 + $0x410] ss:$12 sps:$4 sm:$0xff]  }
 0x169   : > { %1132 = vmatpush1.bf16.msra.mxu1 %v5696_v54  ;;  %v5759_v54 = vld [vmem:[#allocation9 + $0x1e0] ss:$12 sps:$4 sm:$0xff]  }
 0x16a   : > { %1689 = vmatpush1.bf16.msra.mxu0 %v5693_v53  ;;  %5128 = vmatprep.subr.bf16.mxu1 %v5699_v55  ;;  %v5761_v53 = vld [vmem:[#allocation9 + $0x1e4] ss:$12 sps:$4 sm:$0xff]   ;;  %v5762_v55 = vld [vmem:[#allocation9 + $0x428] ss:$12 sps:$4 sm:$0xff]  }
 0x16b   : > { %1690 = vmatprep.subr.bf16.mxu0 %v5702_v58  ;;  %v5766_v58 = vld [vmem:[#allocation9 + $0x440] ss:$12 sps:$4 sm:$0xff]  }
 0x16c   : > { %1134 = vmatmul.mubr.bf16.vlgmr.msra.gmra.mrb[0].mxu1 %v6903_v61 }
 0x16d   : > { %5129 = vmatpush3.bf16.msra.mxu1 %v5705_v60  ;;  %1219 = vmatprep.mubr.bf16.mxu1 %v696_v45  ;;  %v5749_v45 = vld [vmem:[#allocation9 + $0x19c] ss:$12 sps:$4 sm:$0xff]  }
 0x16e   : > { %1691 = vmatpush1.bf16.msra.mxu0 %v5700_v59  ;;  %5130 = vmatprep.subr.bf16.mxu1 %v5706_v63  ;;  %v5769_v59 = vld [vmem:[#allocation9 + $0x214] ss:$12 sps:$4 sm:$0xff]   ;;  %v5767_v60 = vld [vmem:[#allocation9 + $0x210] ss:$12 sps:$4 sm:$0xff]  }
 0x16f   : > { %1692 = vmatprep.subr.bf16.mxu0 %v5709_v0  ;;  %v5779_v63 = vld [vmem:[#allocation2 + $0x2c] ss:$0 sps:$4 sm:$0x77]   ;;  %v5773_v0 = vld [vmem:[#allocation9 + $0x22c] ss:$12 sps:$4 sm:$0xff]  }
 0x171   : > { %5131 = vmatpush3.bf16.msra.mxu1 %v5710_v4  ;;  %v5774_v4 = vld [vmem:[#allocation9 + $0x470] ss:$12 sps:$4 sm:$0xff]  }
 0x172   : > { %1693 = vmatpush1.bf16.msra.mxu0 %v5707_v3  ;;  %5132 = vmatprep.subr.bf16.mxu1 %v5711_v5  ;;  %v5771_v3 = vld [vmem:[#allocation9 + $0x228] ss:$12 sps:$4 sm:$0xff]  }
 0x173   : > { %1694 = vmatprep.subr.bf16.mxu0 %v5714_v6  ;;  %v5775_v5 = vld [vmem:[#allocation9 + $0xc8] ss:$12 sps:$4 sm:$0xff]   ;;  %v1284_v6 = vrot.slane %v6875_v44, 3  ;;  %v5785_v44 = vld [vmem:[#allocation9 + $0x20] ss:$12 sps:$4 sm:$0xff]  }
 0x175   : > { %5133 = vmatpush3.bf16.msra.mxu1 %v5715_v8  ;;  %v5778_v8 = vld [vmem:[#allocation9 + $0x484] ss:$12 sps:$4 sm:$0xff]  }
 0x176   : > { %1695 = vmatpush1.bf16.msra.mxu0 %v5712_v7  ;;  %5134 = vmatprep.subr.bf16.mxu1 %v5716_v9  ;;  %v1285_v7 = vrot.slane %v5779_v63, 3  ;;  %v5776_v9 = vld [vmem:[#allocation9 + $0x480] ss:$12 sps:$4 sm:$0xff]  }
 0x177   : > { %1696 = vmatprep.subr.bf16.mxu0 %v5719_v10  ;;  %v5846_v63 = vld [vmem:[#allocation9 + $0x5ec] ss:$12 sps:$4 sm:$0xff]  }
 0x178   : > { %v6938_v10 = vsel %vm1277_vm1, %v1284_v6, %v1285_v7  ;;  %v5849_v6 = vld [vmem:[#allocation9 + $0x600] ss:$12 sps:$4 sm:$0xff]   ;;  %v5854_v7 = vld [vmem:[#allocation9 + $0x488] ss:$12 sps:$4 sm:$0xff]  }
 0x179   : > { %5135 = vmatpush3.bf16.msra.mxu1 %v5720_v14  ;;  %v5784_v14 = vld [vmem:[#allocation9 + $0x49c] ss:$12 sps:$4 sm:$0xff]  }
 0x17a   : > { %1697 = vmatpush1.bf16.msra.mxu0 %v5717_v11  ;;  %5136 = vmatprep.subr.bf16.mxu1 %v5721_v15  ;;  %v5780_v11 = vld [vmem:[#allocation9 + $0x8] ss:$12 sps:$4 sm:$0xff]   ;;  %v5782_v15 = vld [vmem:[#allocation9 + $0x498] ss:$12 sps:$4 sm:$0xff]  }
 0x17b   : > { %1698 = vmatprep.subr.bf16.mxu0 %v5724_v19  ;;  %v5787_v19 = vld [vmem:[#allocation9 + $0x4b0] ss:$12 sps:$4 sm:$0xff]  }
 0x17d   : > { %5137 = vmatpush3.bf16.msra.mxu1 %v5725_v23  ;;  %v5792_v23 = vld [vmem:[#allocation9 + $0x4c8] ss:$12 sps:$4 sm:$0xff]  }
 0x17e   : > { %1699 = vmatpush1.bf16.msra.mxu0 %v5722_v22  ;;  %5138 = vmatprep.subr.bf16.mxu1 %v5726_v25  ;;  %v5791_v22 = vld [vmem:[#allocation9 + $0x110] ss:$12 sps:$4 sm:$0xff]  }
 0x17f   : > { %1700 = vmatprep.subr.bf16.mxu0 %v5729_v26  ;;  %v5795_v25 = vld [vmem:[#allocation9 + $0x50] ss:$12 sps:$4 sm:$0xff]   ;;  %v5796_v26 = vld [vmem:[#allocation9 + $0x128] ss:$12 sps:$4 sm:$0xff]  }
 0x181   : > { %5139 = vmatpush3.bf16.msra.mxu1 %v5730_v28  ;;  %v5797_v28 = vld [vmem:[#allocation9 + $0x4e0] ss:$12 sps:$4 sm:$0xff]  }
 0x182   : > { %1701 = vmatpush1.bf16.msra.mxu0 %v5727_v27  ;;  %5140 = vmatprep.subr.bf16.mxu1 %v5731_v17  ;;  %v5799_v27 = vld [vmem:[#allocation9 + $0x4e4] ss:$12 sps:$4 sm:$0xff]   ;;  %v5801_v17 = vld [vmem:[#allocation9 + $0x140] ss:$12 sps:$4 sm:$0xff]  }
 0x183   : > { %1702 = vmatprep.subr.bf16.mxu0 %v5734_v29  ;;  %v5804_v29 = vld [vmem:[#allocation9 + $0x4fc] ss:$12 sps:$4 sm:$0xff]  }
 0x185   : > { %5141 = vmatpush3.bf16.msra.mxu1 %v5735_v31  ;;  %v5805_v31 = vld [vmem:[#allocation9 + $0x80] ss:$12 sps:$4 sm:$0xff]  }
 0x186   : > { %1703 = vmatpush1.bf16.msra.mxu0 %v5732_v30  ;;  %5142 = vmatprep.subr.bf16.mxu1 %v5736_v32  ;;  %v5802_v30 = vld [vmem:[#allocation9 + $0x4f8] ss:$12 sps:$4 sm:$0xff]  }
 0x187   : > { %1704 = vmatprep.subr.bf16.mxu0 %v5739_v34  ;;  %v5806_v32 = vld [vmem:[#allocation9 + $0x158] ss:$12 sps:$4 sm:$0xff]   ;;  %v5807_v34 = vld [vmem:[#allocation9 + $0x510] ss:$12 sps:$4 sm:$0xff]  }
 0x189   : > { %5143 = vmatpush3.bf16.msra.mxu1 %v5740_v36  ;;  %v5811_v36 = vld [vmem:[#allocation9 + $0x170] ss:$12 sps:$4 sm:$0xff]  }
 0x18a   : > { %1705 = vmatpush1.bf16.msra.mxu0 %v5737_v35  ;;  %5283 = vmatprep.subr.bf16.mxu1 %v6430_v43  ;;  %v5810_v35 = vld [vmem:[#allocation9 + $0x98] ss:$12 sps:$4 sm:$0xff]  }
 0x18b   : > { %1717 = vmatprep.subr.bf16.mxu0 %v5744_v39  ;;  %v5815_v39 = vld [vmem:[#allocation9 + $0xb0] ss:$12 sps:$4 sm:$0xff]  }
 0x18c   : > { %1220 = vmatmul.mubr.bf16.vlgmr.msra.gmra.mrb[4].mxu1 %v6903_v61  ;;  %v5770_v61 = vld [vmem:[#allocation9 + $0x458] ss:$12 sps:$4 sm:$0xff]  }
 0x18d   : > { %1707 = vmatmul.mubr.bf16.vlgmr.msra.gmra.mrb[0].mxu0 %v6921_v42  ;;  %5284 = vmatpush3.bf16.msra.mxu1 %v5745_v41  ;;  %v5816_v41 = vld [vmem:[#allocation9 + $0x540] ss:$12 sps:$4 sm:$0xff]  }
 0x18e   : > { %1718 = vmatpush1.bf16.msra.mxu0 %v5742_v40  ;;  %5285 = vmatprep.subr.bf16.mxu1 %v6430_v43  ;;  %v5818_v40 = vld [vmem:[#allocation9 + $0x544] ss:$12 sps:$4 sm:$0xff]  }
 0x18f   : > { %1719 = vmatprep.subr.bf16.mxu0 %v5749_v45  ;;  %5299 = vmatprep.mubr.msk.bf16.mxu1 %vm6431_vm2, %v6430_v43  ;;  %v5819_v45 = vld [vmem:[#allocation9 + $0x188] ss:$12 sps:$4 sm:$0xff]  }
 0x190   : > { %1749 = vmatprep.mubr.bf16.mxu0 %v6429_v12 }
 0x191   : > { %5286 = vmatpush3.bf16.msra.mxu1 %v5750_v46  ;;  %v5820_v46 = vld [vmem:[#allocation9 + $0x558] ss:$12 sps:$4 sm:$0xff]  }
 0x192   : > { %1720 = vmatpush1.bf16.msra.mxu0 %v5747_v20  ;;  %5287 = vmatprep.subr.bf16.mxu1 %v6430_v43  ;;  %v5822_v20 = vld [vmem:[#allocation9 + $0x55c] ss:$12 sps:$4 sm:$0xff]  }
 0x193   : > { %1721 = vmatprep.subr.bf16.mxu0 %v5753_v47  ;;  %v5823_v47 = vld [vmem:[#allocation9 + $0x1a0] ss:$12 sps:$4 sm:$0xff]  }
 0x195   : > { %5288 = vmatpush3.bf16.msra.mxu1 %v5754_v49  ;;  %v5824_v49 = vld [vmem:[#allocation9 + $0x570] ss:$12 sps:$4 sm:$0xff]  }
 0x196   : > { %1722 = vmatpush1.bf16.msra.mxu0 %v5751_v48  ;;  %5289 = vmatprep.subr.bf16.mxu1 %v6430_v43  ;;  %v5826_v48 = vld [vmem:[#allocation9 + $0x574] ss:$12 sps:$4 sm:$0xff]  }
 0x197   : > { %1723 = vmatprep.subr.bf16.mxu0 %v5757_v50  ;;  %v5827_v50 = vld [vmem:[#allocation9 + $0x1b8] ss:$12 sps:$4 sm:$0xff]  }
 0x199   : > { %5290 = vmatpush3.bf16.msra.mxu1 %v5758_v52  ;;  %v5831_v52 = vld [vmem:[#allocation9 + $0x1d0] ss:$12 sps:$4 sm:$0xff]  }
 0x19a   : > { %1724 = vmatpush1.bf16.msra.mxu0 %v5755_v51  ;;  %5291 = vmatprep.subr.bf16.mxu1 %v6430_v43  ;;  %v5830_v51 = vld [vmem:[#allocation9 + $0x58c] ss:$12 sps:$4 sm:$0xff]  }
 0x19b   : > { %1725 = vmatprep.subr.bf16.mxu0 %v5761_v53  ;;  %v5834_v53 = vld [vmem:[#allocation9 + $0x5a4] ss:$12 sps:$4 sm:$0xff]  }
 0x19d   : > { %5292 = vmatpush3.bf16.msra.mxu1 %v5762_v55  ;;  %v5835_v55 = vld [vmem:[#allocation9 + $0x1e8] ss:$12 sps:$4 sm:$0xff]  }
 0x19e   : > { %1726 = vmatpush1.bf16.msra.mxu0 %v5759_v54  ;;  %5293 = vmatprep.subr.bf16.mxu1 %v6430_v43  ;;  %v5832_v54 = vld [vmem:[#allocation9 + $0x5a0] ss:$12 sps:$4 sm:$0xff]  }
 0x19f   : > { %1727 = vmatprep.subr.bf16.mxu0 %v5765_v56  ;;  %v5838_v56 = vld [vmem:[#allocation9 + $0x5bc] ss:$12 sps:$4 sm:$0xff]  }
 0x1a1   : > { %5294 = vmatpush3.bf16.msra.mxu1 %v5766_v58  ;;  %v5839_v58 = vld [vmem:[#allocation9 + $0x200] ss:$12 sps:$4 sm:$0xff]  }
 0x1a2   : > { %1728 = vmatpush1.bf16.msra.mxu0 %v5763_v57  ;;  %5295 = vmatprep.subr.bf16.mxu1 %v6430_v43  ;;  %v5836_v57 = vld [vmem:[#allocation9 + $0x5b8] ss:$12 sps:$4 sm:$0xff]  }
 0x1a3   : > { %1729 = vmatprep.subr.bf16.mxu0 %v5769_v59  ;;  %v5842_v59 = vld [vmem:[#allocation9 + $0x5d4] ss:$12 sps:$4 sm:$0xff]  }
 0x1a5   : > { %5296 = vmatpush3.bf16.msra.mxu1 %v5770_v61  ;;  %v5843_v61 = vld [vmem:[#allocation9 + $0x218] ss:$12 sps:$4 sm:$0xff]  }
 0x1a6   : > { %1730 = vmatpush1.bf16.msra.mxu0 %v5767_v60  ;;  %5297 = vmatprep.subr.bf16.mxu1 %v6430_v43  ;;  %v5840_v60 = vld [vmem:[#allocation9 + $0x5d0] ss:$12 sps:$4 sm:$0xff]  }
 0x1a7   : > { %1731 = vmatprep.subr.bf16.mxu0 %v5773_v0  ;;  %v5844_v0 = vld [vmem:[#allocation9 + $0x5e8] ss:$12 sps:$4 sm:$0xff]  }
 0x1a9   : > { %5298 = vmatpush3.bf16.msra.mxu1 %v5774_v4  ;;  %v5851_v4 = vld [vmem:[#allocation9 + $0x604] ss:$12 sps:$4 sm:$0xff]  }
 0x1aa   : > { %1732 = vmatpush1.bf16.msra.mxu0 %v5771_v3  ;;  %5159 = vmatprep.subr.bf16.mxu1 %v5775_v5  ;;  %v5847_v3 = vld [vmem:[#allocation9 + $0x230] ss:$12 sps:$4 sm:$0xff]   ;;  %v5852_v5 = vld [vmem:[#allocation9 + $0x548] ss:$12 sps:$4 sm:$0xff]  }
 0x1ab   : > { %2329 = vmatprep.subr.bf16.mxu0 %v5778_v8  ;;  %v5857_v8 = vld [vmem:[#allocation9 + $0x61c] ss:$12 sps:$4 sm:$0xff]  }
 0x1ac   : > { %5300 = vmatmul.mubr.bf16.vlgmr.msra.gmra.mrb[8].mxu1 %v6880_v62  ;;  %v5794_v62 = vld [vmem:[#allocation9 + $0x4cc] ss:$12 sps:$4 sm:$0xff]  }
 0x1ad   : > { %1750 = vmatmul.mubr.bf16.vlgmr.msra.gmra.mrb[0].mxu0 %v6938_v10  ;;  %5160 = vmatpush3.bf16.msra.mxu1 %v5780_v11  ;;  %v5855_v11 = vld [vmem:[#allocation9 + $0x618] ss:$12 sps:$4 sm:$0xff]  }
 0x1ae   : > { %2330 = vmatpush1.bf16.msra.mxu0 %v5776_v9  ;;  %5161 = vmatprep.subr.bf16.mxu1 %v5781_v13  ;;  %v5858_v9 = vld [vmem:[#allocation9 + $0x560] ss:$12 sps:$4 sm:$0xff]  }
 0x1af   : > { %2331 = vmatprep.subr.bf16.mxu0 %v5784_v14  ;;  %1792 = vmatprep.mubr.bf16.mxu1 %v6916_v24  ;;  %v5800_v24 = vld [vmem:[#allocation9 + $0x68] ss:$12 sps:$4 sm:$0xff]   ;;  %v5859_v13 = vld [vmem:[#allocation9 + $0x4a0] ss:$12 sps:$4 sm:$0xff]  }
 0x1b0   : > { %2361 = vmatprep.mubr.bf16.mxu0 %v6907_v1  ;;  %v5862_v14 = vld [vmem:[#allocation9 + $0x634] ss:$12 sps:$4 sm:$0xff]  }
 0x1b1   : > { %5162 = vmatpush3.bf16.msra.mxu1 %v5785_v44  ;;  %v5860_v44 = vld [vmem:[#allocation9 + $0x630] ss:$12 sps:$4 sm:$0xff]  }
 0x1b2   : > { %2332 = vmatpush1.bf16.msra.mxu0 %v5782_v15  ;;  %5163 = vmatprep.subr.bf16.mxu1 %v5786_v16  ;;  %v5863_v15 = vld [vmem:[#allocation9 + $0x578] ss:$12 sps:$4 sm:$0xff]  }
 0x1b3   : > { %2333 = vmatprep.subr.bf16.mxu0 %v5789_v18  ;;  %v5864_v16 = vld [vmem:[#allocation9 + $0x4b8] ss:$12 sps:$4 sm:$0xff]  }
 0x1b4   : > { %v5867_v18 = vld [vmem:[#allocation9 + $0x64c] ss:$12 sps:$4 sm:$0xff]  }
 0x1b5   : > { %5164 = vmatpush3.bf16.msra.mxu1 %v5790_v21  ;;  %v5869_v21 = vld [vmem:[#allocation9 + $0x4d0] ss:$12 sps:$4 sm:$0xff]  }
 0x1b6   : > { %2334 = vmatpush1.bf16.msra.mxu0 %v5787_v19  ;;  %5165 = vmatprep.subr.bf16.mxu1 %v5791_v22  ;;  %v5865_v19 = vld [vmem:[#allocation9 + $0x648] ss:$12 sps:$4 sm:$0xff]   ;;  %v5872_v22 = vld [vmem:[#allocation9 + $0x664] ss:$12 sps:$4 sm:$0xff]  }
 0x1b7   : > { %2335 = vmatprep.subr.bf16.mxu0 %v5794_v62  ;;  %v5873_v62 = vld [vmem:[#allocation9 + $0x5a8] ss:$12 sps:$4 sm:$0xff]  }
 0x1b9   : > { %5166 = vmatpush3.bf16.msra.mxu1 %v5795_v25  ;;  %v5874_v25 = vld [vmem:[#allocation9 + $0x4e8] ss:$12 sps:$4 sm:$0xff]  }
 0x1ba   : > { %2336 = vmatpush1.bf16.msra.mxu0 %v5792_v23  ;;  %5167 = vmatprep.subr.bf16.mxu1 %v5796_v26  ;;  %v5870_v23 = vld [vmem:[#allocation9 + $0x660] ss:$12 sps:$4 sm:$0xff]  }
 0x1bb   : > { %2337 = vmatprep.subr.bf16.mxu0 %v5799_v27  ;;  %v5878_v26 = vld [vmem:[#allocation9 + $0x5c0] ss:$12 sps:$4 sm:$0xff]   ;;  %v5875_v27 = vld [vmem:[#allocation9 + $0x678] ss:$12 sps:$4 sm:$0xff]  }
 0x1bd   : > { %5168 = vmatpush3.bf16.msra.mxu1 %v5800_v24  ;;  %v5882_v24 = vld [vmem:[#allocation9 + $0x694] ss:$12 sps:$4 sm:$0xff]  }
 0x1be   : > { %2338 = vmatpush1.bf16.msra.mxu0 %v5797_v28  ;;  %5169 = vmatprep.subr.bf16.mxu1 %v5801_v17  ;;  %v5879_v28 = vld [vmem:[#allocation9 + $0x500] ss:$12 sps:$4 sm:$0xff]   ;;  %v5883_v17 = vld [vmem:[#allocation9 + $0x5d8] ss:$12 sps:$4 sm:$0xff]  }
 0x1bf   : > { %2339 = vmatprep.subr.bf16.mxu0 %v5804_v29  ;;  %v6959_v29 = vld [vmem:[#allocation2 + $0x18] sm:$0xff] }
 0x1c1   : > { %5170 = vmatpush3.bf16.msra.mxu1 %v5805_v31  ;;  %v6963_v31 = vld [vmem:[#allocation2 + $0x30] sm:$0x11] }
 0x1c2   : > { %2340 = vmatpush1.bf16.msra.mxu0 %v5802_v30  ;;  %5171 = vmatprep.subr.bf16.mxu1 %v5806_v32  ;;  %v6961_v30 = vld [vmem:[#allocation2 + $0x24] sm:$0xff] }
 0x1c3   : > { %2341 = vmatprep.subr.bf16.mxu0 %v5809_v33  ;;  %v4927_v32 = vcombine.high %v6959_v29, %v6961_v30  ;;  %v5880_v33 = vld [vmem:[#allocation9 + $0x690] ss:$12 sps:$4 sm:$0xff]  }
 0x1c5   : > { %5172 = vmatpush3.bf16.msra.mxu1 %v5810_v35  ;;  %v2643_v35 = vshll.u32 %v4927_v32, 16 }
 0x1c6   : > { %2342 = vmatpush1.bf16.msra.mxu0 %v5807_v34  ;;  %5173 = vmatprep.subr.bf16.mxu1 %v5811_v36  ;;  %v6969_v34 = vcombine.high %v6963_v31, %v6963_v31  ;;  %v5884_v36 = vld [vmem:[#allocation9 + $0x518] ss:$12 sps:$4 sm:$0xff]  }
 0x1c7   : > { %2343 = vmatprep.subr.bf16.mxu0 %v5814_v37  ;;  %v5887_v37 = vld [vmem:[#allocation9 + $0x6ac] ss:$12 sps:$4 sm:$0xff]  }
 0x1c9   : > { %5174 = vmatpush3.bf16.msra.mxu1 %v5815_v39  ;;  %v2641_v39 = vshrl.u32 %v4927_v32, 16 }
 0x1ca   : > { %2344 = vmatpush1.bf16.msra.mxu0 %v5812_v38  ;;  %5303 = vmatprep.subr.bf16.mxu1 %v6430_v43  ;;  %v5888_v38 = vld [vmem:[#allocation9 + $0x5f0] ss:$12 sps:$4 sm:$0xff]  }
 0x1cb   : > { %2345 = vmatprep.subr.bf16.mxu0 %v5818_v40  ;;  %v2645_v40 = vrot.slane %v2643_v35, 1  ;;  %v5941_v35 = vld [vmem:[#allocation9 + $0x7d0] ss:$12 sps:$4 sm:$0xff]  }
 0x1cc   : > { %1793 = vmatmul.mubr.bf16.vlgmr.msra.gmra.mrb[12].mxu1 %v6921_v42  ;;  %v5828_v42 = vld [vmem:[#allocation9 + $0x588] ss:$12 sps:$4 sm:$0xff]  }
 0x1cd   : > { %5304 = vmatpush3.bf16.msra.mxu1 %v5819_v45  ;;  %5319 = vmatprep.mubr.msk.bf16.mxu1 %vm6431_vm2, %v6430_v43  ;;  %v5885_v45 = vld [vmem:[#allocation9 + $0x6a8] ss:$12 sps:$4 sm:$0xff]  }
 0x1ce   : > { %2346 = vmatpush1.bf16.msra.mxu0 %v5816_v41  ;;  %5305 = vmatprep.subr.bf16.mxu1 %v6430_v43  ;;  %v2648_v41 = vshll.u32 %v6969_v34, 16 }
 0x1cf   : > { %2347 = vmatprep.subr.bf16.mxu0 %v5822_v20  ;;  %v5889_v20 = vld [vmem:[#allocation9 + $0x530] ss:$12 sps:$4 sm:$0xff]  }
 0x1d1   : > { %5306 = vmatpush3.bf16.msra.mxu1 %v5823_v47  ;;  %v5890_v47 = vld [vmem:[#allocation9 + $0x6c0] ss:$12 sps:$4 sm:$0xff]  }
 0x1d2   : > { %2348 = vmatpush1.bf16.msra.mxu0 %v5820_v46  ;;  %5307 = vmatprep.subr.bf16.mxu1 %v6430_v43  ;;  %v5892_v46 = vld [vmem:[#allocation9 + $0x6c4] ss:$12 sps:$4 sm:$0xff]  }
 0x1d3   : > { %2349 = vmatprep.subr.bf16.mxu0 %v5826_v48  ;;  %v6112_v48 = vld [vmem:[#allocation2 + $0x20] sm:$0xf] }
 0x1d5   : > { %5308 = vmatpush3.bf16.msra.mxu1 %v5827_v50 }
 0x1d6   : > { %2350 = vmatpush1.bf16.msra.mxu0 %v5824_v49  ;;  %5309 = vmatprep.subr.bf16.mxu1 %v6430_v43  ;;  %v6113_v49 = vld [vmem:[#allocation2 + $0x2c] sm:$0xf] }
 0x1d7   : > { %2351 = vmatprep.subr.bf16.mxu0 %v5830_v51  ;;  %v6972_v50 = vcombine.low %v6112_v48, %v6113_v49  ;;  %v2646_v51 = vor.u32 %v2645_v40, %v2641_v39  ;;  %v5945_v39 = vld [vmem:[#allocation9 + $0x7e4] ss:$12 sps:$4 sm:$0xff]   ;;  %v5951_v48 = vld [vmem:[#allocation9 + $0x800] ss:$12 sps:$4 sm:$0xff]  }
 0x1d8   : > { %v5948_v49 = vld [vmem:[#allocation9 + $0x7f8] ss:$12 sps:$4 sm:$0xff]  }
 0x1d9   : > { %5310 = vmatpush3.bf16.msra.mxu1 %v5831_v52  ;;  %v5894_v52 = vld [vmem:[#allocation9 + $0x608] ss:$12 sps:$4 sm:$0xff]  }
 0x1da   : > { %2352 = vmatpush1.bf16.msra.mxu0 %v5828_v42  ;;  %5311 = vmatprep.subr.bf16.mxu1 %v6430_v43  ;;  %v2650_v42 = vrot.slane %v2648_v41, 1  ;;  %v5946_v41 = vld [vmem:[#allocation9 + $0x7e8] ss:$12 sps:$4 sm:$0xff]  }
 0x1db   : > { %2353 = vmatprep.subr.bf16.mxu0 %v5834_v53  ;;  %v5897_v53 = vld [vmem:[#allocation9 + $0x6dc] ss:$12 sps:$4 sm:$0xff]  }
 0x1dd   : > { %5312 = vmatpush3.bf16.msra.mxu1 %v5835_v55  ;;  %v6978_v55 = vsel %vm2627_vm3, %v2646_v51, %v2650_v42  ;;  %v5955_v42 = vld [vmem:[#allocation9 + $0x814] ss:$12 sps:$4 sm:$0xff]  }
 0x1de   : > { %2354 = vmatpush1.bf16.msra.mxu0 %v5832_v54  ;;  %5313 = vmatprep.subr.bf16.mxu1 %v6430_v43  ;;  %v5895_v54 = vld [vmem:[#allocation9 + $0x6d8] ss:$12 sps:$4 sm:$0xff]  }
 0x1df   : > { %2355 = vmatprep.subr.bf16.mxu0 %v5838_v56  ;;  %v5898_v56 = vld [vmem:[#allocation9 + $0x620] ss:$12 sps:$4 sm:$0xff]  }
 0x1e1   : > { %5314 = vmatpush3.bf16.msra.mxu1 %v5839_v58  ;;  %v5899_v58 = vld [vmem:[#allocation9 + $0x6f0] ss:$12 sps:$4 sm:$0xff]  }
 0x1e2   : > { %2356 = vmatpush1.bf16.msra.mxu0 %v5836_v57  ;;  %5315 = vmatprep.subr.bf16.mxu1 %v6430_v43  ;;  %v5901_v57 = vld [vmem:[#allocation9 + $0x6f4] ss:$12 sps:$4 sm:$0xff]  }
 0x1e3   : > { %2357 = vmatprep.subr.bf16.mxu0 %v5842_v59  ;;  %v5905_v59 = vld [vmem:[#allocation9 + $0x70c] ss:$12 sps:$4 sm:$0xff]  }
 0x1e5   : > { %5316 = vmatpush3.bf16.msra.mxu1 %v5843_v61  ;;  %v5906_v61 = vld [vmem:[#allocation9 + $0x650] ss:$12 sps:$4 sm:$0xff]  }
 0x1e6   : > { %2358 = vmatpush1.bf16.msra.mxu0 %v5840_v60  ;;  %5317 = vmatprep.subr.bf16.mxu1 %v6430_v43  ;;  %v5903_v60 = vld [vmem:[#allocation9 + $0x708] ss:$12 sps:$4 sm:$0xff]  }
 0x1e7   : > { %2359 = vmatprep.subr.bf16.mxu0 %v5846_v63  ;;  %v5909_v63 = vld [vmem:[#allocation9 + $0x724] ss:$12 sps:$4 sm:$0xff]  }
 0x1e9   : > { %5318 = vmatpush3.bf16.msra.mxu1 %v5847_v3  ;;  %v5910_v3 = vld [vmem:[#allocation9 + $0x668] ss:$12 sps:$4 sm:$0xff]  }
 0x1ea   : > { %2360 = vmatpush1.bf16.msra.mxu0 %v5844_v0  ;;  %5190 = vmatprep.subr.bf16.mxu1 %v5852_v5  ;;  %v5907_v0 = vld [vmem:[#allocation9 + $0x720] ss:$12 sps:$4 sm:$0xff]   ;;  %v5911_v5 = vld [vmem:[#allocation9 + $0x738] ss:$12 sps:$4 sm:$0xff]  }
 0x1eb   : > { %2372 = vmatprep.subr.bf16.mxu0 %v5851_v4  ;;  %v5913_v4 = vld [vmem:[#allocation9 + $0x73c] ss:$12 sps:$4 sm:$0xff]  }
 0x1ec   : > { %5320 = vmatmul.mubr.bf16.vlgmr.msra.gmra.mrb[16].mxu1 %v6938_v10  ;;  %v5868_v10 = vld [vmem:[#allocation9 + $0x590] ss:$12 sps:$4 sm:$0xff]  }
 0x1ed   : > { %2362 = vmatmul.mubr.bf16.vlgmr.msra.gmra.mrb[0].mxu0 %v6911_v2  ;;  %5191 = vmatpush3.bf16.msra.mxu1 %v5854_v7  ;;  %v5917_v7 = vld [vmem:[#allocation9 + $0x754] ss:$12 sps:$4 sm:$0xff]  }
 0x1ee   : > { %2373 = vmatpush1.bf16.msra.mxu0 %v5849_v6  ;;  %5192 = vmatprep.subr.bf16.mxu1 %v5858_v9  ;;  %v5914_v6 = vld [vmem:[#allocation9 + $0x680] ss:$12 sps:$4 sm:$0xff]   ;;  %v5918_v9 = vld [vmem:[#allocation9 + $0x698] ss:$12 sps:$4 sm:$0xff]  }
 0x1ef   : > { %2374 = vmatprep.subr.bf16.mxu0 %v5857_v8  ;;  %2404 = vmatprep.mubr.bf16.mxu0 %v6429_v12  ;;  %v5915_v8 = vld [vmem:[#allocation9 + $0x750] ss:$12 sps:$4 sm:$0xff]  }
 0x1f0   : > { %2447 = vmatprep.mubr.bf16.mxu1 %v6907_v1  ;;  %v5877_v1 = vld [vmem:[#allocation9 + $0x67c] ss:$12 sps:$4 sm:$0xff]  }
 0x1f1   : > { %5193 = vmatpush3.bf16.msra.mxu1 %v5859_v13  ;;  %v5919_v13 = vld [vmem:[#allocation9 + $0x768] ss:$12 sps:$4 sm:$0xff]  }
 0x1f2   : > { %2375 = vmatpush1.bf16.msra.mxu0 %v5855_v11  ;;  %5194 = vmatprep.subr.bf16.mxu1 %v5863_v15  ;;  %v5921_v11 = vld [vmem:[#allocation9 + $0x76c] ss:$12 sps:$4 sm:$0xff]   ;;  %v5925_v15 = vld [vmem:[#allocation9 + $0x784] ss:$12 sps:$4 sm:$0xff]  }
 0x1f3   : > { %2376 = vmatprep.subr.bf16.mxu0 %v5862_v14  ;;  %v5922_v14 = vld [vmem:[#allocation9 + $0x6b0] ss:$12 sps:$4 sm:$0xff]  }
 0x1f5   : > { %5195 = vmatpush3.bf16.msra.mxu1 %v5864_v16  ;;  %v5923_v16 = vld [vmem:[#allocation9 + $0x780] ss:$12 sps:$4 sm:$0xff]  }
 0x1f6   : > { %2377 = vmatpush1.bf16.msra.mxu0 %v5860_v44  ;;  %5196 = vmatprep.subr.bf16.mxu1 %v5868_v10  ;;  %v5926_v44 = vld [vmem:[#allocation9 + $0x788] ss:$12 sps:$4 sm:$0xff]  }
 0x1f7   : > { %2378 = vmatprep.subr.bf16.mxu0 %v5867_v18  ;;  %v5927_v18 = vld [vmem:[#allocation9 + $0x6c8] ss:$12 sps:$4 sm:$0xff]  }
 0x1f8   : > { %v5930_v10 = vld [vmem:[#allocation9 + $0x79c] ss:$12 sps:$4 sm:$0xff]  }
 0x1f9   : > { %5197 = vmatpush3.bf16.msra.mxu1 %v5869_v21  ;;  %v5928_v21 = vld [vmem:[#allocation9 + $0x798] ss:$12 sps:$4 sm:$0xff]  }
 0x1fa   : > { %2379 = vmatpush1.bf16.msra.mxu0 %v5865_v19  ;;  %5198 = vmatprep.subr.bf16.mxu1 %v5873_v62  ;;  %v5931_v19 = vld [vmem:[#allocation9 + $0x7a0] ss:$12 sps:$4 sm:$0xff]  }
 0x1fb   : > { %2380 = vmatprep.subr.bf16.mxu0 %v5872_v22  ;;  %v5932_v22 = vld [vmem:[#allocation9 + $0x6e0] ss:$12 sps:$4 sm:$0xff]  }
 0x1fc   : > { %v5935_v62 = vld [vmem:[#allocation9 + $0x7b4] ss:$12 sps:$4 sm:$0xff]  }
 0x1fd   : > { %5199 = vmatpush3.bf16.msra.mxu1 %v5874_v25  ;;  %v5933_v25 = vld [vmem:[#allocation9 + $0x7b0] ss:$12 sps:$4 sm:$0xff]  }
 0x1fe   : > { %2381 = vmatpush1.bf16.msra.mxu0 %v5870_v23  ;;  %5200 = vmatprep.subr.bf16.mxu1 %v5878_v26  ;;  %v5936_v23 = vld [vmem:[#allocation9 + $0x7b8] ss:$12 sps:$4 sm:$0xff]  }
 0x1ff   : > { %2382 = vmatprep.subr.bf16.mxu0 %v5877_v1  ;;  %v6994_v1 = vcombine.low %v6963_v31, %v6963_v31  ;;  %v5937_v26 = vld [vmem:[#allocation9 + $0x6f8] ss:$12 sps:$4 sm:$0xff]  }
 0x201   : > { %5201 = vmatpush3.bf16.msra.mxu1 %v5879_v28  ;;  %v3334_v32 = vrot.slane %v6994_v1, 1 }
 0x202   : > { %2383 = vmatpush1.bf16.msra.mxu0 %v5875_v27  ;;  %5202 = vmatprep.subr.bf16.mxu1 %v5883_v17  ;;  %v3225_v27 = vld [vmem:[#allocation2 + $0x18] sm:$0xee] }
 0x203   : > { %2384 = vmatprep.subr.bf16.mxu0 %v5882_v24  ;;  %v5005_v28 = vcombine.high %v3225_v27, %v6961_v30  ;;  %v3337_v24 = vrot.slane %v6969_v34, 1  ;;  %v5004_v17 = vcombine.low %v3225_v27, %v6961_v30  ;;  %v5983_v27 = vld [vmem:[#allocation9 + $0x8a0] ss:$12 sps:$4 sm:$0xff]  }
 0x205   : > { %5203 = vmatpush3.bf16.msra.mxu1 %v5884_v36  ;;  %v3336_v36 = vrot.slane %v5005_v28, 1  ;;  %v3333_v31 = vrot.slane %v5004_v17, 1  ;;  %v5986_v28 = vld [vmem:[#allocation9 + $0x8a8] ss:$12 sps:$4 sm:$0xff]  }
 0x206   : > { %2385 = vmatpush1.bf16.msra.mxu0 %v5880_v33  ;;  %5204 = vmatprep.subr.bf16.mxu1 %v5888_v38  ;;  %v5940_v33 = vld [vmem:[#allocation9 + $0x7cc] ss:$12 sps:$4 sm:$0xff]   ;;  %v5942_v38 = vld [vmem:[#allocation9 + $0x710] ss:$12 sps:$4 sm:$0xff]  }
 0x207   : > { %2386 = vmatprep.subr.bf16.mxu0 %v5887_v37  ;;  %v5938_v37 = vld [vmem:[#allocation9 + $0x7c8] ss:$12 sps:$4 sm:$0xff]   ;;  %v7001_v40 = vsel %vm3332_vm4, %v3336_v36, %v3337_v24  ;;  %v7004_v34 = vsel %vm3332_vm4, %v3333_v31, %v3334_v32  ;;  %v5987_v32 = vld [vmem:[#allocation9 + $0x8b8] ss:$12 sps:$4 sm:$0xff]  }
 0x208   : > { %v5989_v17 = vld [vmem:[#allocation9 + $0x8bc] ss:$12 sps:$4 sm:$0xff]   ;;  %v5993_v36 = vld [vmem:[#allocation9 + $0x8d4] ss:$12 sps:$4 sm:$0xff]  }
 0x209   : > { %5205 = vmatpush3.bf16.msra.mxu1 %v5889_v20  ;;  %v5947_v20 = vld [vmem:[#allocation9 + $0x728] ss:$12 sps:$4 sm:$0xff]  }
 0x20a   : > { %2387 = vmatpush1.bf16.msra.mxu0 %v5885_v45  ;;  %5323 = vmatprep.subr.bf16.mxu1 %v6430_v43  ;;  %v5943_v45 = vld [vmem:[#allocation9 + $0x7e0] ss:$12 sps:$4 sm:$0xff]  }
 0x20b   : > { %3051 = vmatprep.subr.bf16.mxu0 %v5892_v46  ;;  %v5950_v46 = vld [vmem:[#allocation9 + $0x7fc] ss:$12 sps:$4 sm:$0xff]  }
 0x20c   : > { %2448 = vmatmul.mubr.bf16.vlgmr.msra.gmra.mrb[20].mxu1 %v6911_v2  ;;  %v5902_v2 = vld [vmem:[#allocation9 + $0x638] ss:$12 sps:$4 sm:$0xff]  }
 0x20d   : > { %2405 = vmatmul.mubr.bf16.vlgmr.msra.gmra.mrb[0].mxu0 %v6972_v50  ;;  %5324 = vmatpush3.bf16.msra.mxu1 %v5894_v52  ;;  %v5956_v52 = vld [vmem:[#allocation9 + $0x818] ss:$12 sps:$4 sm:$0xff]  }
 0x20e   : > { %3052 = vmatpush1.bf16.msra.mxu0 %v5890_v47  ;;  %5325 = vmatprep.subr.bf16.mxu1 %v6430_v43  ;;  %v4926_v47 = vcombine.low %v6959_v29, %v6961_v30  ;;  %v7012_v29 = vld [vmem:[#allocation2 + $0x38] ss:$0 sps:$4 sm:$0x11]  }
 0x20f   : > { %3053 = vmatprep.subr.bf16.mxu0 %v5897_v53  ;;  %5339 = vmatprep.mubr.msk.bf16.mxu1 %vm6431_vm2, %v6430_v43  ;;  %v5953_v53 = vld [vmem:[#allocation9 + $0x810] ss:$12 sps:$4 sm:$0xff]  }
 0x210   : > { %3083 = vmatprep.mubr.bf16.mxu0 %v6978_v55  ;;  %v2631_v51 = vshll.u32 %v4926_v47, 16 }
 0x211   : > { %5326 = vmatpush3.bf16.msra.mxu1 %v5898_v56  ;;  %v5960_v56 = vld [vmem:[#allocation9 + $0x82c] ss:$12 sps:$4 sm:$0xff]  }
 0x212   : > { %3054 = vmatpush1.bf16.msra.mxu0 %v5895_v54  ;;  %5327 = vmatprep.subr.bf16.mxu1 %v6430_v43  ;;  %v5957_v54 = vld [vmem:[#allocation9 + $0x758] ss:$12 sps:$4 sm:$0xff]   ;;  %v2633_v30 = vrot.slane %v2631_v51, 1  ;;  %v5995_v51 = vld [vmem:[#allocation9 + $0x8e8] ss:$12 sps:$4 sm:$0xff]  }
 0x213   : > { %3055 = vmatprep.subr.bf16.mxu0 %v5901_v57  ;;  %v2629_v57 = vshrl.u32 %v4926_v47, 16 }
 0x215   : > { %5328 = vmatpush3.bf16.msra.mxu1 %v5902_v2  ;;  %v2636_v2 = vshll.u32 %v6994_v1, 16  ;;  %v5985_v1 = vld [vmem:[#allocation9 + $0x8a4] ss:$12 sps:$4 sm:$0xff]  }
 0x216   : > { %3056 = vmatpush1.bf16.msra.mxu0 %v5899_v58  ;;  %5329 = vmatprep.subr.bf16.mxu1 %v6430_v43 }
 0x217   : > { %3057 = vmatprep.subr.bf16.mxu0 %v5905_v59 }
 0x219   : > { %5330 = vmatpush3.bf16.msra.mxu1 %v5906_v61 }
 0x21a   : > { %3058 = vmatpush1.bf16.msra.mxu0 %v5903_v60  ;;  %5331 = vmatprep.subr.bf16.mxu1 %v6430_v43  ;;  %v5961_v60 = vld [vmem:[#allocation9 + $0x830] ss:$12 sps:$4 sm:$0xff]  }
 0x21b   : > { %3059 = vmatprep.subr.bf16.mxu0 %v5909_v63  ;;  %v2506_v63 = vld [vmem:[#allocation2 + $0x2c] sm:$0xf] }
 0x21d   : > { %5332 = vmatpush3.bf16.msra.mxu1 %v5910_v3  ;;  %v5958_v3 = vld [vmem:[#allocation9 + $0x828] ss:$12 sps:$4 sm:$0xff]  }
 0x21e   : > { %3060 = vmatpush1.bf16.msra.mxu0 %v5907_v0  ;;  %5333 = vmatprep.subr.bf16.mxu1 %v6430_v43  ;;  %v3226_v0 = vld [vmem:[#allocation2 + $0x20] sm:$0xe] }
 0x21f   : > { %3061 = vmatprep.subr.bf16.mxu0 %v5913_v4  ;;  %v5006_v4 = vcombine.low %v3226_v0, %v2506_v63  ;;  %v6010_v0 = vld [vmem:[#allocation9 + $0x920] ss:$12 sps:$4 sm:$0xff]  }
 0x221   : > { %5334 = vmatpush3.bf16.msra.mxu1 %v5914_v6  ;;  %v5962_v6 = vld [vmem:[#allocation9 + $0x770] ss:$12 sps:$4 sm:$0xff]  }
 0x222   : > { %3062 = vmatpush1.bf16.msra.mxu0 %v5911_v5  ;;  %5335 = vmatprep.subr.bf16.mxu1 %v6430_v43  ;;  %v3340_v5 = vrot.slane %v7012_v29, 1 }
 0x223   : > { %3063 = vmatprep.subr.bf16.mxu0 %v5917_v7  ;;  %v2634_v7 = vor.u32 %v2633_v30, %v2629_v57  ;;  %v6005_v30 = vld [vmem:[#allocation9 + $0x908] ss:$12 sps:$4 sm:$0xff]  }
 0x225   : > { %5336 = vmatpush3.bf16.msra.mxu1 %v5918_v9  ;;  %v5967_v9 = vld [vmem:[#allocation9 + $0x844] ss:$12 sps:$4 sm:$0xff]  }
 0x226   : > { %3064 = vmatpush1.bf16.msra.mxu0 %v5915_v8  ;;  %5337 = vmatprep.subr.bf16.mxu1 %v6430_v43  ;;  %v2638_v8 = vrot.slane %v2636_v2, 1  ;;  %v6008_v2 = vld [vmem:[#allocation9 + $0x91c] ss:$12 sps:$4 sm:$0xff]  }
 0x227   : > { %3065 = vmatprep.subr.bf16.mxu0 %v5921_v11  ;;  %v3339_v11 = vrot.slane %v5006_v4, 1  ;;  %v6014_v4 = vld [vmem:[#allocation9 + $0x9f8] ss:$12 sps:$4 sm:$0xff]  }
 0x229   : > { %5338 = vmatpush3.bf16.msra.mxu1 %v5922_v14  ;;  %v7021_v14 = vsel %vm3332_vm4, %v3339_v11, %v3340_v5  ;;  %v6011_v5 = vld [vmem:[#allocation9 + $0x930] ss:$12 sps:$4 sm:$0xff]  }
 0x22a   : > { %3066 = vmatpush1.bf16.msra.mxu0 %v5919_v13  ;;  %5221 = vmatprep.subr.bf16.mxu1 %v5926_v44  ;;  %v5965_v13 = vld [vmem:[#allocation9 + $0x840] ss:$12 sps:$4 sm:$0xff]   ;;  %v5970_v44 = vld [vmem:[#allocation9 + $0x848] ss:$12 sps:$4 sm:$0xff]   ;;  %v6020_v11 = vld [vmem:[#allocation9 + $0x950] ss:$12 sps:$4 sm:$0xff]  }
 0x22b   : > { %3067 = vmatprep.subr.bf16.mxu0 %v5925_v15  ;;  %v2639_v15 = vsel %vm2627_vm3, %v2634_v7, %v2638_v8  ;;  %v6018_v7 = vld [vmem:[#allocation9 + $0x94c] ss:$12 sps:$4 sm:$0xff]   ;;  %v6019_v8 = vld [vmem:[#allocation9 + $0xa10] ss:$12 sps:$4 sm:$0xff]  }
 0x22c   : > { %5340 = vmatmul.mubr.bf16.vlgmr.msra.gmra.mrb[24].mxu1 %v6972_v50  ;;  %v5952_v50 = vld [vmem:[#allocation9 + $0x740] ss:$12 sps:$4 sm:$0xff]  }
 0x22d   : > { %5222 = vmatpush3.bf16.msra.mxu1 %v5927_v18  ;;  %3169 = vmatprep.mubr.bf16.mxu1 %v6978_v55  ;;  %v5971_v18 = vld [vmem:[#allocation9 + $0x858] ss:$12 sps:$4 sm:$0xff]  }
 0x22e   : > { %3068 = vmatpush1.bf16.msra.mxu0 %v5923_v16  ;;  %5223 = vmatprep.subr.bf16.mxu1 %v5931_v19  ;;  %v5973_v16 = vld [vmem:[#allocation9 + $0x85c] ss:$12 sps:$4 sm:$0xff]   ;;  %v5977_v19 = vld [vmem:[#allocation9 + $0x874] ss:$12 sps:$4 sm:$0xff]  }
 0x22f   : > { %3069 = vmatprep.subr.bf16.mxu0 %v5930_v10  ;;  %v5974_v10 = vld [vmem:[#allocation9 + $0x860] ss:$12 sps:$4 sm:$0xff]  }
 0x231   : > { %5224 = vmatpush3.bf16.msra.mxu1 %v5932_v22  ;;  %v5978_v22 = vld [vmem:[#allocation9 + $0x878] ss:$12 sps:$4 sm:$0xff]  }
 0x232   : > { %3070 = vmatpush1.bf16.msra.mxu0 %v5928_v21  ;;  %5225 = vmatprep.subr.bf16.mxu1 %v5936_v23  ;;  %v5975_v21 = vld [vmem:[#allocation9 + $0x870] ss:$12 sps:$4 sm:$0xff]   ;;  %v5979_v23 = vld [vmem:[#allocation9 + $0x888] ss:$12 sps:$4 sm:$0xff]  }
 0x233   : > { %3071 = vmatprep.subr.bf16.mxu0 %v5935_v62  ;;  %v5981_v62 = vld [vmem:[#allocation9 + $0x88c] ss:$12 sps:$4 sm:$0xff]  }
 0x235   : > { %5226 = vmatpush3.bf16.msra.mxu1 %v5937_v26  ;;  %v2504_v26 = vld [vmem:[#allocation2 + $0x20] sm:$0xf] }
 0x236   : > { %3072 = vmatpush1.bf16.msra.mxu0 %v5933_v25  ;;  %5227 = vmatprep.subr.bf16.mxu1 %v5941_v35  ;;  %v5982_v25 = vld [vmem:[#allocation9 + $0x890] ss:$12 sps:$4 sm:$0xff]   ;;  %v4928_v24 = vcombine.low %v2504_v26, %v2506_v63  ;;  %v6006_v63 = vld [vmem:[#allocation9 + $0x918] ss:$12 sps:$4 sm:$0xff]  }
 0x237   : > { %3073 = vmatprep.subr.bf16.mxu0 %v5940_v33  ;;  %v5990_v33 = vld [vmem:[#allocation9 + $0x8c0] ss:$12 sps:$4 sm:$0xff]   ;;  %v6031_v26 = vld [vmem:[#allocation9 + $0x990] ss:$12 sps:$4 sm:$0xff]  }
 0x238   : > { %v2655_v35 = vshll.u32 %v4928_v24, 16 }
 0x239   : > { %5228 = vmatpush3.bf16.msra.mxu1 %v5942_v38 }
 0x23a   : > { %3074 = vmatpush1.bf16.msra.mxu0 %v5938_v37  ;;  %5229 = vmatprep.subr.bf16.mxu1 %v5946_v41  ;;  %v5991_v37 = vld [vmem:[#allocation9 + $0x8d0] ss:$12 sps:$4 sm:$0xff]   ;;  %v2653_v41 = vshrl.u32 %v4928_v24, 16  ;;  %v6038_v24 = vld [vmem:[#allocation9 + $0x9ac] ss:$12 sps:$4 sm:$0xff]  }
 0x23b   : > { %3075 = vmatprep.subr.bf16.mxu0 %v5945_v39  ;;  %v5994_v39 = vld [vmem:[#allocation9 + $0x8d8] ss:$12 sps:$4 sm:$0xff]  }
 0x23d   : > { %5230 = vmatpush3.bf16.msra.mxu1 %v5947_v20  ;;  %v2660_v20 = vshll.u32 %v7012_v29, 16  ;;  %v6001_v29 = vld [vmem:[#allocation9 + $0x900] ss:$12 sps:$4 sm:$0xff]  }
 0x23e   : > { %3076 = vmatpush1.bf16.msra.mxu0 %v5943_v45  ;;  %5231 = vmatprep.subr.bf16.mxu1 %v5951_v48  ;;  %v2657_v45 = vrot.slane %v2655_v35, 1  ;;  %v5997_v48 = vld [vmem:[#allocation9 + $0x8ec] ss:$12 sps:$4 sm:$0xff]   ;;  %v6040_v35 = vld [vmem:[#allocation9 + $0x9b0] ss:$12 sps:$4 sm:$0xff]  }
 0x23f   : > { %3077 = vmatprep.subr.bf16.mxu0 %v5950_v46  ;;  %v7008_v55 = vpop.f32.mrb[0].mxu1 }
 0x240   : > { %v7010_v58 = vpop.f32.mrb[1].mxu1 }
 0x241   : > { %5232 = vmatpush3.bf16.msra.mxu1 %v5952_v50  ;;  %v7015_v59 = vpop.f32.mrb[2].mxu1 }
 0x242   : > { %3078 = vmatpush1.bf16.msra.mxu0 %v5948_v49  ;;  %5233 = vmatprep.subr.bf16.mxu1 %v5956_v52  ;;  %v7017_v61 = vpop.f32.mrb[3].mxu1  ;;  %v2658_v52 = vor.u32 %v2657_v45, %v2653_v41  ;;  %v6050_v41 = vld [vmem:[#allocation9 + $0xaa0] ss:$12 sps:$4 sm:$0xff]  }
 0x243   : > { %3079 = vmatprep.subr.bf16.mxu0 %v5955_v42  ;;  %v5998_v42 = vld [vmem:[#allocation9 + $0x8f0] ss:$12 sps:$4 sm:$0xff]   ;;  %v6053_v45 = vld [vmem:[#allocation9 + $0x9f4] ss:$12 sps:$4 sm:$0xff]  }
 0x245   : > { %5234 = vmatpush3.bf16.msra.mxu1 %v5957_v54  ;;  %v6003_v54 = vld [vmem:[#allocation9 + $0x904] ss:$12 sps:$4 sm:$0xff]  }
 0x246   : > { %3080 = vmatpush1.bf16.msra.mxu0 %v5953_v53  ;;  %5235 = vmatprep.subr.bf16.mxu1 %v5961_v60  ;;  %v2662_v53 = vrot.slane %v2660_v20, 1  ;;  %v6009_v60 = vld [vmem:[#allocation9 + $0x9e0] ss:$12 sps:$4 sm:$0xff]   ;;  %v6051_v20 = vld [vmem:[#allocation9 + $0x9f0] ss:$12 sps:$4 sm:$0xff]  }
 0x247   : > { %3081 = vmatprep.subr.bf16.mxu0 %v5960_v56  ;;  %v6004_v56 = vld [vmem:[#allocation9 + $0x9c8] ss:$12 sps:$4 sm:$0xff]  }
 0x248   : > { %v2663_v57 = vsel %vm2627_vm3, %v2658_v52, %v2662_v53  ;;  %v6065_v52 = vld [vmem:[#allocation9 + $0xa3c] ss:$12 sps:$4 sm:$0xff]   ;;  %v6063_v53 = vld [vmem:[#allocation9 + $0xa38] ss:$12 sps:$4 sm:$0xff]  }
 0x249   : > { %5236 = vmatpush3.bf16.msra.mxu1 %v5962_v6  ;;  %v6015_v6 = vld [vmem:[#allocation9 + $0x938] ss:$12 sps:$4 sm:$0xff]  }
 0x24a   : > { %3082 = vmatpush1.bf16.msra.mxu0 %v5958_v3  ;;  %5343 = vmatprep.subr.bf16.mxu1 %v6430_v43  ;;  %v6013_v3 = vld [vmem:[#allocation9 + $0x934] ss:$12 sps:$4 sm:$0xff]  }
 0x24b   : > { %3094 = vmatprep.subr.bf16.mxu0 %v5967_v9  ;;  %v6016_v9 = vld [vmem:[#allocation9 + $0x948] ss:$12 sps:$4 sm:$0xff]  }
 0x24c   : > { %3170 = vmatmul.mubr.bf16.vlgmr.msra.gmra.mrb[28].mxu1 %v2639_v15 }
 0x24d   : > { %3084 = vmatmul.mubr.bf16.vlgmr.msra.gmra.mrb[0].mxu0 %v2639_v15  ;;  %5344 = vmatpush3.bf16.msra.mxu1 %v5970_v44  ;;  %v6024_v15 = vld [vmem:[#allocation9 + $0xa28] ss:$12 sps:$4 sm:$0xff]   ;;  %v6021_v44 = vld [vmem:[#allocation9 + $0x960] ss:$12 sps:$4 sm:$0xff]  }
 0x24e   : > { %3095 = vmatpush1.bf16.msra.mxu0 %v5965_v13  ;;  %5345 = vmatprep.subr.bf16.mxu1 %v6430_v43  ;;  %v6023_v13 = vld [vmem:[#allocation9 + $0x964] ss:$12 sps:$4 sm:$0xff]  }
 0x24f   : > { %3096 = vmatprep.subr.bf16.mxu0 %v5973_v16  ;;  %5359 = vmatprep.mubr.msk.bf16.mxu1 %vm6431_vm2, %v6430_v43  ;;  %v6028_v16 = vld [vmem:[#allocation9 + $0x97c] ss:$12 sps:$4 sm:$0xff]  }
 0x250   : > { %3126 = vmatprep.mubr.bf16.mxu0 %v6429_v12 }
 0x251   : > { %5346 = vmatpush3.bf16.msra.mxu1 %v5974_v10  ;;  %v6026_v10 = vld [vmem:[#allocation9 + $0x978] ss:$12 sps:$4 sm:$0xff]  }
 0x252   : > { %3097 = vmatpush1.bf16.msra.mxu0 %v5971_v18  ;;  %5347 = vmatprep.subr.bf16.mxu1 %v6430_v43  ;;  %v6029_v18 = vld [vmem:[#allocation9 + $0xa40] ss:$12 sps:$4 sm:$0xff]  }
 0x253   : > { %3098 = vmatprep.subr.bf16.mxu0 %v5977_v19  ;;  %v6030_v19 = vld [vmem:[#allocation9 + $0x980] ss:$12 sps:$4 sm:$0xff]  }
 0x255   : > { %5348 = vmatpush3.bf16.msra.mxu1 %v5978_v22  ;;  %v6034_v22 = vld [vmem:[#allocation9 + $0xa58] ss:$12 sps:$4 sm:$0xff]  }
 0x256   : > { %3099 = vmatpush1.bf16.msra.mxu0 %v5975_v21  ;;  %5349 = vmatprep.subr.bf16.mxu1 %v6430_v43  ;;  %v6033_v21 = vld [vmem:[#allocation9 + $0x994] ss:$12 sps:$4 sm:$0xff]  }
 0x257   : > { %3100 = vmatprep.subr.bf16.mxu0 %v5981_v62 }
 0x259   : > { %5350 = vmatpush3.bf16.msra.mxu1 %v5982_v25 }
 0x25a   : > { %3101 = vmatpush1.bf16.msra.mxu0 %v5979_v23  ;;  %5351 = vmatprep.subr.bf16.mxu1 %v6430_v43 }
 0x25b   : > { %3102 = vmatprep.subr.bf16.mxu0 %v5985_v1 }
 0x25d   : > { %5352 = vmatpush3.bf16.msra.mxu1 %v5986_v28 }
 0x25e   : > { %3103 = vmatpush1.bf16.msra.mxu0 %v5983_v27  ;;  %5353 = vmatprep.subr.bf16.mxu1 %v6430_v43  ;;  %v6035_v27 = vld [vmem:[#allocation9 + $0x998] ss:$12 sps:$4 sm:$0xff]  }
 0x25f   : > { %3104 = vmatprep.subr.bf16.mxu0 %v5989_v17  ;;  %v5144_v31 = vpop.f32.mrb[4].mxu1  ;;  %v6039_v17 = vld [vmem:[#allocation9 + $0xa70] ss:$12 sps:$4 sm:$0xff]  }
 0x260   : > { %v5145_v38 = vpop.f32.mrb[5].mxu1 }
 0x261   : > { %5354 = vmatpush3.bf16.msra.mxu1 %v5990_v33  ;;  %v7034_v46 = vadd.f32 %v5145_v38, %v5144_v31  ;;  %v5147_v47 = vpop.f32.mrb[6].mxu1  ;;  %v6036_v33 = vld [vmem:[#allocation9 + $0x9a8] ss:$12 sps:$4 sm:$0xff]   ;;  %v6041_v31 = vld [vmem:[#allocation9 + $0x9c0] ss:$12 sps:$4 sm:$0xff]  }
 0x262   : > { %3105 = vmatpush1.bf16.msra.mxu0 %v5987_v32  ;;  %5355 = vmatprep.subr.bf16.mxu1 %v6430_v43  ;;  %v5148_v49 = vpop.f32.mrb[7].mxu1  ;;  %v6049_v38 = vld [vmem:[#allocation9 + $0x9dc] ss:$12 sps:$4 sm:$0xff]  }
 0x263   : > { %3106 = vmatprep.subr.bf16.mxu0 %v5993_v36  ;;  %v7037_v50 = vadd.f32 %v5148_v49, %v5147_v47  ;;  %v6043_v36 = vld [vmem:[#allocation9 + $0x9c4] ss:$12 sps:$4 sm:$0xff]   ;;  %v6057_v47 = vld [vmem:[#allocation9 + $0xa0c] ss:$12 sps:$4 sm:$0xff]  }
 0x264   : > { %v6058_v49 = vld [vmem:[#allocation9 + $0xad0] ss:$12 sps:$4 sm:$0xff]  }
 0x265   : > { %5356 = vmatpush3.bf16.msra.mxu1 %v5994_v39  ;;  %v6047_v39 = vld [vmem:[#allocation9 + $0x9d8] ss:$12 sps:$4 sm:$0xff]  }
 0x266   : > { %3107 = vmatpush1.bf16.msra.mxu0 %v5991_v37  ;;  %5357 = vmatprep.subr.bf16.mxu1 %v6430_v43  ;;  %v6046_v37 = vld [vmem:[#allocation9 + $0xa88] ss:$12 sps:$4 sm:$0xff]  }
 0x267   : > { %3108 = vmatprep.subr.bf16.mxu0 %v5997_v48  ;;  %v6055_v48 = vld [vmem:[#allocation9 + $0xa08] ss:$12 sps:$4 sm:$0xff]  }
 0x269   : > { %5358 = vmatpush3.bf16.msra.mxu1 %v5998_v42  ;;  %v6062_v42 = vld [vmem:[#allocation9 + $0xae8] ss:$12 sps:$4 sm:$0xff]  }
 0x26a   : > { %3109 = vmatpush1.bf16.msra.mxu0 %v5995_v51  ;;  %5252 = vmatprep.subr.bf16.mxu1 %v6004_v56  ;;  %v6059_v51 = vld [vmem:[#allocation9 + $0xa20] ss:$12 sps:$4 sm:$0xff]  }
 0x26b   : > { %3729 = vmatprep.subr.bf16.mxu0 %v6003_v54  ;;  %v6066_v54 = vld [vmem:[#allocation9 + $0xb00] ss:$12 sps:$4 sm:$0xff]  }
 0x26c   : > { %5360 = vmatmul.mubr.bf16.vlgmr.msra.gmra.mrb[32].mxu1 %v2663_v57  ;;  %v6069_v56 = vld [vmem:[#allocation9 + $0xa54] ss:$12 sps:$4 sm:$0xff]  }
 0x26d   : > { %3127 = vmatmul.mubr.bf16.vlgmr.msra.gmra.mrb[0].mxu0 %v2663_v57  ;;  %5253 = vmatpush3.bf16.msra.mxu1 %v6005_v30 }
 0x26e   : > { %3730 = vmatpush1.bf16.msra.mxu0 %v6001_v29  ;;  %5254 = vmatprep.subr.bf16.mxu1 %v6009_v60  ;;  %v6067_v60 = vld [vmem:[#allocation9 + $0xa50] ss:$12 sps:$4 sm:$0xff]  }
 0x26f   : > { %3731 = vmatprep.subr.bf16.mxu0 %v6008_v2  ;;  %3847 = vmatprep.mubr.bf16.mxu1 %v7001_v40 }
 0x270   : > { %3761 = vmatprep.mubr.bf16.mxu0 %v7001_v40  ;;  %v6025_v40 = vld [vmem:[#allocation9 + $0x968] ss:$12 sps:$4 sm:$0xff]  }
 0x271   : > { %5255 = vmatpush3.bf16.msra.mxu1 %v6010_v0 }
 0x272   : > { %3732 = vmatpush1.bf16.msra.mxu0 %v6006_v63  ;;  %5256 = vmatprep.subr.bf16.mxu1 %v6014_v4  ;;  %v6070_v63 = vld [vmem:[#allocation9 + $0xb18] ss:$12 sps:$4 sm:$0xff]  }
 0x273   : > { %3733 = vmatprep.subr.bf16.mxu0 %v6013_v3  ;;  %v6073_v3 = vld [vmem:[#allocation9 + $0xa6c] ss:$12 sps:$4 sm:$0xff]  }
 0x275   : > { %5257 = vmatpush3.bf16.msra.mxu1 %v6015_v6  ;;  %v6071_v6 = vld [vmem:[#allocation9 + $0xa68] ss:$12 sps:$4 sm:$0xff]  }
 0x276   : > { %3734 = vmatpush1.bf16.msra.mxu0 %v6011_v5  ;;  %5258 = vmatprep.subr.bf16.mxu1 %v6019_v8 }
 0x277   : > { %3735 = vmatprep.subr.bf16.mxu0 %v6018_v7  ;;  %v6074_v7 = vld [vmem:[#allocation9 + $0xb30] ss:$12 sps:$4 sm:$0xff]  }
 0x279   : > { %5259 = vmatpush3.bf16.msra.mxu1 %v6020_v11  ;;  %v6075_v11 = vld [vmem:[#allocation9 + $0xa80] ss:$12 sps:$4 sm:$0xff]  }
 0x27a   : > { %3736 = vmatpush1.bf16.msra.mxu0 %v6016_v9  ;;  %5260 = vmatprep.subr.bf16.mxu1 %v6024_v15  ;;  %v6077_v9 = vld [vmem:[#allocation9 + $0xa84] ss:$12 sps:$4 sm:$0xff]  }
 0x27b   : > { %3737 = vmatprep.subr.bf16.mxu0 %v6023_v13  ;;  %v6081_v13 = vld [vmem:[#allocation9 + $0xa9c] ss:$12 sps:$4 sm:$0xff]   ;;  %v6079_v15 = vld [vmem:[#allocation9 + $0xa98] ss:$12 sps:$4 sm:$0xff]  }
 0x27d   : > { %5261 = vmatpush3.bf16.msra.mxu1 %v6025_v40  ;;  %v6082_v40 = vld [vmem:[#allocation9 + $0xab0] ss:$12 sps:$4 sm:$0xff]  }
 0x27e   : > { %3738 = vmatpush1.bf16.msra.mxu0 %v6021_v44  ;;  %5262 = vmatprep.subr.bf16.mxu1 %v6029_v18  ;;  %v6084_v44 = vld [vmem:[#allocation9 + $0xab4] ss:$12 sps:$4 sm:$0xff]   ;;  %v6090_v18 = vld [vmem:[#allocation9 + $0xae4] ss:$12 sps:$4 sm:$0xff]  }
 0x27f   : > { %3739 = vmatprep.subr.bf16.mxu0 %v6028_v16  ;;  %v1262_v62 = vpop.f32.mrb[8].mxu1  ;;  %v6085_v16 = vld [vmem:[#allocation9 + $0xac8] ss:$12 sps:$4 sm:$0xff]  }
 0x280   : > { %v7044_v23 = vadd.f32 %v7034_v46, %v1262_v62  ;;  %v5301_v25 = vpop.f32.mrb[9].mxu1  ;;  %v6054_v46 = vld [vmem:[#allocation9 + $0xab8] ss:$12 sps:$4 sm:$0xff]  }
 0x281   : > { %5263 = vmatpush3.bf16.msra.mxu1 %v6030_v19  ;;  %v1265_v1 = vpop.f32.mrb[10].mxu1  ;;  %v6093_v19 = vld [vmem:[#allocation9 + $0xafc] ss:$12 sps:$4 sm:$0xff]  }
 0x282   : > { %3740 = vmatpush1.bf16.msra.mxu0 %v6026_v10  ;;  %v7047_v28 = vadd.f32 %v7037_v50, %v1265_v1  ;;  %5264 = vmatprep.subr.bf16.mxu1 %v6034_v22  ;;  %v5302_v32 = vpop.f32.mrb[11].mxu1  ;;  %v6061_v50 = vld [vmem:[#allocation9 + $0xa24] ss:$12 sps:$4 sm:$0xff]   ;;  %v6088_v10 = vld [vmem:[#allocation9 + $0xae0] ss:$12 sps:$4 sm:$0xff]  }
 0x283   : > { %3741 = vmatprep.subr.bf16.mxu0 %v6033_v21  ;;  %v6096_v21 = vld [vmem:[#allocation9 + $0xb14] ss:$12 sps:$4 sm:$0xff]   ;;  %v6094_v25 = vld [vmem:[#allocation9 + $0xb10] ss:$12 sps:$4 sm:$0xff]  }
 0x285   : > { %5265 = vmatpush3.bf16.msra.mxu1 %v6035_v27 }
 0x286   : > { %3742 = vmatpush1.bf16.msra.mxu0 %v6031_v26  ;;  %5266 = vmatprep.subr.bf16.mxu1 %v6039_v17  ;;  %v6099_v26 = vld [vmem:[#allocation9 + $0xb2c] ss:$12 sps:$4 sm:$0xff]  }
 0x287   : > { %3743 = vmatprep.subr.bf16.mxu0 %v6038_v24 }
 0x289   : > { %5267 = vmatpush3.bf16.msra.mxu1 %v6040_v35 }
 0x28a   : > { %3744 = vmatpush1.bf16.msra.mxu0 %v6036_v33  ;;  %5363 = vmatprep.subr.bf16.mxu1 %v6430_v43 }
 0x28b   : > { %3745 = vmatprep.subr.bf16.mxu0 %v6043_v36 }
 0x28c   : > { %3848 = vmatmul.mubr.bf16.vlgmr.msra.gmra.mrb[36].mxu1 %v7004_v34 }
 0x28d   : > { %5364 = vmatpush3.bf16.msra.mxu1 %v6046_v37  ;;  %5379 = vmatprep.mubr.msk.bf16.mxu1 %vm6431_vm2, %v6430_v43 }
 0x28e   : > { %3746 = vmatpush1.bf16.msra.mxu0 %v6041_v31  ;;  %5365 = vmatprep.subr.bf16.mxu1 %v6430_v43 }
 0x28f   : > { %3747 = vmatprep.subr.bf16.mxu0 %v6049_v38 }
 0x291   : > { %5366 = vmatpush3.bf16.msra.mxu1 %v6050_v41 }
 0x292   : > { %3748 = vmatpush1.bf16.msra.mxu0 %v6047_v39  ;;  %5367 = vmatprep.subr.bf16.mxu1 %v6430_v43 }
 0x293   : > { %3749 = vmatprep.subr.bf16.mxu0 %v6053_v45 }
 0x295   : > { %5368 = vmatpush3.bf16.msra.mxu1 %v6054_v46 }
 0x296   : > { %3750 = vmatpush1.bf16.msra.mxu0 %v6051_v20  ;;  %5369 = vmatprep.subr.bf16.mxu1 %v6430_v43 }
 0x297   : > { %3751 = vmatprep.subr.bf16.mxu0 %v6057_v47 }
 0x299   : > { %5370 = vmatpush3.bf16.msra.mxu1 %v6058_v49 }
 0x29a   : > { %3752 = vmatpush1.bf16.msra.mxu0 %v6055_v48  ;;  %5371 = vmatprep.subr.bf16.mxu1 %v6430_v43 }
 0x29b   : > { %3753 = vmatprep.subr.bf16.mxu0 %v6061_v50 }
 0x29d   : > { %5372 = vmatpush3.bf16.msra.mxu1 %v6062_v42 }
 0x29e   : > { %3754 = vmatpush1.bf16.msra.mxu0 %v6059_v51  ;;  %5373 = vmatprep.subr.bf16.mxu1 %v6430_v43 }
 0x29f   : > { %3755 = vmatprep.subr.bf16.mxu0 %v6065_v52  ;;  %v5175_v57 = vpop.f32.mrb[12].mxu1 }
 0x2a0   : > { %v5176_v29 = vpop.f32.mrb[13].mxu1 }
 0x2a1   : > { %v5177_v30 = vadd.f32 %v5176_v29, %v5175_v57  ;;  %v5178_v2 = vpop.f32.mrb[14].mxu1  ;;  %5374 = vmatpush3.bf16.msra.mxu1 %v6066_v54 }
 0x2a2   : > { %3756 = vmatpush1.bf16.msra.mxu0 %v6063_v53  ;;  %v5179_v0 = vpop.f32.mrb[15].mxu1  ;;  %5375 = vmatprep.subr.bf16.mxu1 %v6430_v43 }
 0x2a3   : > { %3757 = vmatprep.subr.bf16.mxu0 %v6069_v56  ;;  %v5180_v4 = vadd.f32 %v5179_v0, %v5178_v2  ;;  %v1795_v5 = vadd.f32 %v5177_v30, %v7044_v23 }
 0x2a5   : > { %5376 = vmatpush3.bf16.msra.mxu1 %v6070_v63  ;;  %v1798_v8 = vadd.f32 %v5180_v4, %v7047_v28  ;;  %v6097_v28 = vld [vmem:[#allocation9 + $0xb28] ss:$12 sps:$4 sm:$0xff]  }
 0x2a6   : > { %3758 = vmatpush1.bf16.msra.mxu0 %v6067_v60  ;;  %5377 = vmatprep.subr.bf16.mxu1 %v6430_v43  ;;  %v6087_v43 = vld [vmem:[#allocation9 + $0xacc] ss:$12 sps:$4 sm:$0xff]  }
 0x2a7   : > { %3759 = vmatprep.subr.bf16.mxu0 %v6073_v3 }
 0x2a9   : > { %5378 = vmatpush3.bf16.msra.mxu1 %v6074_v7 }
 0x2aa   : > { %3760 = vmatpush1.bf16.msra.mxu0 %v6071_v6 }
 0x2ab   : > { %3772 = vmatprep.subr.bf16.mxu0 %v6077_v9 }
 0x2ac   : > { %5380 = vmatmul.mubr.bf16.vlgmr.msra.gmra.mrb[40].mxu1 %v7021_v14 }
 0x2ad   : > { %3762 = vmatmul.mubr.bf16.vlgmr.msra.gmra.mrb[0].mxu0 %v7004_v34  ;;  %v6091_v34 = vld [vmem:[#allocation9 + $0xaf8] ss:$12 sps:$4 sm:$0xff]  }
 0x2ae   : > { %3773 = vmatpush1.bf16.msra.mxu0 %v6075_v11  ;;  %3804 = vmatprep.mubr.bf16.mxu0 %v6429_v12 }
 0x2af   : > { %3774 = vmatprep.subr.bf16.mxu0 %v6081_v13 }
 0x2b2   : > { %3775 = vmatpush1.bf16.msra.mxu0 %v6079_v15 }
 0x2b3   : > { %3776 = vmatprep.subr.bf16.mxu0 %v6084_v44 }
 0x2b6   : > { %3777 = vmatpush1.bf16.msra.mxu0 %v6082_v40 }
 0x2b7   : > { %3778 = vmatprep.subr.bf16.mxu0 %v6087_v43 }
 0x2ba   : > { %3779 = vmatpush1.bf16.msra.mxu0 %v6085_v16 }
 0x2bb   : > { %3780 = vmatprep.subr.bf16.mxu0 %v6090_v18 }
 0x2be   : > { %3781 = vmatpush1.bf16.msra.mxu0 %v6088_v10 }
 0x2bf   : > { %3782 = vmatprep.subr.bf16.mxu0 %v6093_v19  ;;  %v1835_v22 = vpop.f32.mrb[16].mxu1 }
 0x2c0   : > { %v1836_v12 = vadd.f32 %v1835_v22, %v1795_v5  ;;  %v5321_v62 = vpop.f32.mrb[17].mxu1  ;;  %v3905_v5 = vlaneseq  ;;  %v6432_v22 = vmov 1983009808  }
 0x2c1   : > { %v1838_v23 = vpop.f32.mrb[18].mxu1 }
 0x2c2   : > { %3783 = vmatpush1.bf16.msra.mxu0 %v6091_v34  ;;  %v1839_v1 = vadd.f32 %v1838_v23, %v1798_v8  ;;  %v5322_v27 = vpop.f32.mrb[19].mxu1  ;;  %v3906_v6 = vshrl.u32 %v3905_v5, 7  ;;  %v3903_v8 = vld [vmem:[#allocation11] sm:$0x7] }
 0x2c3   : > { %3784 = vmatprep.subr.bf16.mxu0 %v6096_v21 }
 0x2c4   : > { %v3915_v7 = vsub.s32 2, %v3906_v6 }
 0x2c6   : > { %3785 = vmatpush1.bf16.msra.mxu0 %v6094_v25  ;;  %v3916_v13 = vrot.slane %v3903_v8, %v3915_v7 }
 0x2c7   : > { %3786 = vmatprep.subr.bf16.mxu0 %v6099_v26 }
 0x2ca   : > { %3787 = vmatpush1.bf16.msra.mxu0 %v6097_v28 }
 0x2cd   : > { %3805 = vmatmul.mubr.bf16.vlgmr.msra.gmra.mrb[0].mxu0 %v7021_v14 }
 0x2df   : > { %v5206_v24 = vpop.f32.mrb[20].mxu1 }
 0x2e0   : > { %v5207_v17 = vpop.f32.mrb[21].mxu1 }
 0x2e1   : > { %v5208_v32 = vadd.f32 %v5207_v17, %v5206_v24  ;;  %v5209_v33 = vpop.f32.mrb[22].mxu1 }
 0x2e2   : > { %v5210_v35 = vpop.f32.mrb[23].mxu1 }
 0x2e3   : > { %v5211_v36 = vadd.f32 %v5210_v35, %v5209_v33 }
 0x2ff   : > { %v2490_v31 = vpop.f32.mrb[24].mxu1 }
 0x300   : > { %v2491_v37 = vadd.f32 %v5208_v32, %v2490_v31  ;;  %v5341_v38 = vpop.f32.mrb[25].mxu1 }
 0x301   : > { %v2493_v39 = vpop.f32.mrb[26].mxu1 }
 0x302   : > { %v2499_v41 = vadd.f32 %v2491_v37, %v1836_v12  ;;  %v2494_v45 = vadd.f32 %v5211_v36, %v2493_v39  ;;  %v5342_v20 = vpop.f32.mrb[27].mxu1  ;;  %v3966_v12 = vunpack.c.l.s4 %v6432_v22  ;;  %v3907_v36 = vsub.s32 0, %v3906_v6 }
 0x304   : > { %v2502_v46 = vadd.f32 %v2494_v45, %v1839_v1  ;;  %v3967_v62 = vunpack.c.0.s8 %v3966_v12  ;;  %v3911_v45 = vsub.s32 1, %v3906_v6 }
 0x306   : > { %v7066_v26 = vsub.s32 %v3967_v62, %v3906_v6 }
 0x31f   : > { %v5237_v47 = vpop.f32.mrb[28].mxu1 }
 0x320   : > { %v5238_v48 = vpop.f32.mrb[29].mxu1 }
 0x321   : > { %v5239_v49 = vadd.f32 %v5238_v48, %v5237_v47  ;;  %v5240_v50 = vpop.f32.mrb[30].mxu1 }
 0x322   : > { %v5241_v51 = vpop.f32.mrb[31].mxu1 }
 0x323   : > { %v5242_v14 = vadd.f32 %v5241_v51, %v5240_v50  ;;  %v3908_v51 = vrot.slane %v3903_v8, %v3907_v36 }
 0x33f   : > { %v3212_v42 = vpop.f32.mrb[32].mxu1 }
 0x340   : > { %v3213_v52 = vadd.f32 %v5239_v49, %v3212_v42  ;;  %v5361_v53 = vpop.f32.mrb[33].mxu1 }
 0x341   : > { %v3215_v54 = vpop.f32.mrb[34].mxu1 }
 0x342   : > { %v3221_v56 = vadd.f32 %v3213_v52, %v2499_v41  ;;  %v3216_v57 = vadd.f32 %v5242_v14, %v3215_v54  ;;  %v5362_v29 = vpop.f32.mrb[35].mxu1 }
 0x343   : > { %v3912_v29 = vrot.slane %v3903_v8, %v3911_v45 }
 0x344   : > { %v3224_v30 = vadd.f32 %v3216_v57, %v2502_v46 }
 0x35f   : > { %v5268_v2 = vpop.f32.mrb[36].mxu1 }
 0x360   : > { %v5269_v60 = vpop.f32.mrb[37].mxu1 }
 0x361   : > { %v5270_v63 = vadd.f32 %v5269_v60, %v5268_v2  ;;  %v5271_v0 = vpop.f32.mrb[38].mxu1 }
 0x362   : > { %v5272_v3 = vpop.f32.mrb[39].mxu1 }
 0x363   : > { %v5273_v4 = vadd.f32 %v5272_v3, %v5271_v0 }
 0x37f   : > { %v3890_v9 = vpop.f32.mrb[40].mxu1 }
 0x380   : > { %v3891_v11 = vadd.f32 %v5270_v63, %v3890_v9  ;;  %v5381_v15 = vpop.f32.mrb[41].mxu1 }
 0x381   : > { %v3893_v44 = vpop.f32.mrb[42].mxu1 }
 0x382   : > { %v3899_v40 = vadd.f32 %v3891_v11, %v3221_v56  ;;  %v3894_v43 = vadd.f32 %v5273_v4, %v3893_v44  ;;  %v5382_v16 = vpop.f32.mrb[43].mxu1 }
 0x384   : > { %v3922_v18 = vadd.f32 %v3916_v13, %v3899_v40  ;;  %v3902_v10 = vadd.f32 %v3894_v43, %v3224_v30 }
 0x386   : > { %v3934_v19 = vmul.f32 0.70710677, %v3922_v18  ;;  %v3925_v34 = vadd.f32 %v3916_v13, %v3902_v10  ;;  %v3928_v25 = vmul.f32 0.5, %v3922_v18 }
 0x388   : > { %6100 = verf.f32 %v3934_v19  ;;  %v3937_v21 = vmul.f32 0.70710677, %v3925_v34  ;;  %v3931_v24 = vmul.f32 0.5, %v3925_v34 }
 0x38a   : > { %6102 = verf.f32 %v3937_v21 }
 0x392   : > { %v6101_v23 = vpop.eup %6100 }
 0x393   : > { %v3946_v1 = vadd.f32 1.0, %v6101_v23 }
 0x394   : > { %v6103_v27 = vpop.eup %6102 }
 0x395   : > { %v3952_v28 = vmul.f32 %v3946_v1, %v3928_v25  ;;  %v3949_v17 = vadd.f32 1.0, %v6103_v27 }
 0x397   : > { %v3964_v32 = vcombine.high %v3952_v28, %v3952_v28  ;;  %v7069_v33 = vrot.slane %v3952_v28, %v7066_v26  ;;  %v3955_v35 = vmul.f32 %v3949_v17, %v3931_v24 }
 0x399   : > { %v7072_v31 = vrot.slane %v3964_v32, %v7066_v26  ;;  %v5079_v37 = vcombine.low %v7069_v33, %v7069_v33  ;;  %v5080_v38 = vcombine.high %v7069_v33, %v7069_v33  ;;  %v3999_v39 = vcombine.high %v3955_v35, %v3955_v35 }
 0x39a   : > { %v7079_v41 = vrot.slane %v3955_v35, %v7066_v26 }
 0x39b   : > { %v4046_v20 = vrot.slane %v5079_v37, %v7066_v26  ;;  %v4062_v46 = vrot.slane %v5080_v38, %v7066_v26  ;;  %v5081_v47 = vcombine.low %v7072_v31, %v7072_v31  ;;  %v5082_v48 = vcombine.high %v7072_v31, %v7072_v31 }
 0x39c   : > { %v7088_v49 = vrot.slane %v3999_v39, %v7066_v26  ;;  %v5083_v50 = vcombine.low %v7079_v41, %v7079_v41  ;;  %v5084_v60 = vcombine.high %v7079_v41, %v7079_v41 }
 0x39d   : > { %v4078_v14 = vrot.slane %v5081_v47, %v7066_v26  ;;  %v4094_v42 = vrot.slane %v5082_v48, %v7066_v26  ;;  %v4199_v52 = vsel %vm4184_vm5, %v4046_v20, -inf  ;;  %v4220_v53 = vsel %vm4184_vm5, %v4062_v46, -inf }
 0x39e   : > { %v4200_v54 = vrot.slane %v4199_v52, 4  ;;  %v4221_v56 = vrot.slane %v4220_v53, 4  ;;  %v4110_v57 = vrot.slane %v5083_v50, %v7066_v26  ;;  %v5085_v63 = vcombine.low %v7088_v49, %v7088_v49 }
 0x39f   : > { %v4241_v30 = vsel %vm4184_vm5, %v4078_v14, -inf  ;;  %v4262_v2 = vsel %vm4184_vm5, %v4094_v42, -inf  ;;  %v5086_v6 = vcombine.high %v7088_v49, %v7088_v49  ;;  %v4126_v62 = vrot.slane %v5084_v60, %v7066_v26 }
 0x3a0   : > { %v3806_v0 = vpop.f32.mrb[0].mxu0  ;;  %v4201_v3 = vmax.f32 %v4199_v52, %v4200_v54  ;;  %v4222_v4 = vmax.f32 %v4220_v53, %v4221_v56  ;;  %v4242_v5 = vrot.slane %v4241_v30, 4  ;;  %v4263_v9 = vrot.slane %v4262_v2, 4 }
 0x3a1   : > { %v3808_v7 = vpop.f32.mrb[1].mxu0  ;;  %v4283_v8 = vsel %vm4184_vm5, %v4110_v57, -inf  ;;  %v5383_v11 = vadd.f32 %v3806_v0, %v7008_v55  ;;  %v4158_v1 = vrot.slane %v5086_v6, %v7066_v26  ;;  %v4304_v48 = vsel %vm4184_vm5, %v4126_v62, -inf }
 0x3a2   : > { %v5384_v13 = vadd.f32 %v3808_v7, %v7010_v58  ;;  %v3810_v15 = vpop.f32.mrb[2].mxu0  ;;  %v4202_v44 = vrot.slane %v4201_v3, 2  ;;  %v4223_v40 = vrot.slane %v4222_v4, 2  ;;  %v4243_v43 = vmax.f32 %v4241_v30, %v4242_v5 }
 0x3a3   : > { %v4284_v16 = vrot.slane %v4283_v8, 4  ;;  %v3812_v18 = vpop.f32.mrb[3].mxu0  ;;  %v3920_v10 = vadd.f32 %v5383_v11, %v3908_v51  ;;  %v5385_v34 = vadd.f32 %v3810_v15, %v7015_v59  ;;  %v4142_v58 = vrot.slane %v5085_v63, %v7066_v26 }
 0x3a4   : > { %v3921_v19 = vadd.f32 %v5384_v13, %v3912_v29  ;;  %v5386_v21 = vadd.f32 %v3812_v18, %v7017_v61  ;;  %v4203_v22 = vmax.f32 %v4201_v3, %v4202_v44  ;;  %v4224_v12 = vmax.f32 %v4222_v4, %v4223_v40 }
 0x3a5   : > { %v4244_v23 = vrot.slane %v4243_v43, 2  ;;  %v3932_v55 = vmul.f32 0.70710677, %v3920_v10  ;;  %v3923_v27 = vadd.f32 %v5385_v34, %v3908_v51  ;;  %v4264_v61 = vmax.f32 %v4262_v2, %v4263_v9 }
 0x3a6   : > { %v3933_v25 = vmul.f32 0.70710677, %v3921_v19  ;;  %v7113_v28 = vadd.f32 %v5386_v21, %v3912_v29  ;;  %v4204_v24 = vrot.slane %v4203_v22, 1  ;;  %v4225_v17 = vrot.slane %v4224_v12, 1 }
 0x3a7   : > { %6104 = verf.f32 %v3932_v55  ;;  %v4245_v59 = vmax.f32 %v4243_v43, %v4244_v23  ;;  %v4285_v32 = vmax.f32 %v4283_v8, %v4284_v16  ;;  %v3926_v35 = vmul.f32 0.5, %v3920_v10 }
 0x3a8   : > { %v3927_v36 = vmul.f32 0.5, %v3921_v19  ;;  %6106 = verf.f32 %v3933_v25  ;;  %v3935_v37 = vmul.f32 0.70710677, %v3923_v27  ;;  %v3936_v38 = vmul.f32 0.70710677, %v7113_v28 }
 0x3a9   : > { %v4205_v39 = vmax.f32 %v4203_v22, %v4204_v24  ;;  %v4226_v45 = vmax.f32 %v4224_v12, %v4225_v17  ;;  %v4246_v20 = vrot.slane %v4245_v59, 1  ;;  %v4265_v46 = vrot.slane %v4264_v61, 2 }
 0x3aa   : > { %6108 = verf.f32 %v3935_v37  ;;  %v4286_v47 = vrot.slane %v4285_v32, 2  ;;  %v4305_v51 = vrot.slane %v4304_v48, 4  ;;  %v4325_v14 = vsel %vm4184_vm5, %v4142_v58, -inf }
 0x3ab   : > { %6110 = verf.f32 %v3936_v38  ;;  %v4247_v50 = vmax.f32 %v4245_v59, %v4246_v20  ;;  %v4266_v42 = vmax.f32 %v4264_v61, %v4265_v46  ;;  %v4326_v53 = vrot.slane %v4325_v14, 4 }
 0x3ac   : > { %v4287_v52 = vmax.f32 %v4285_v32, %v4286_v47  ;;  %v4346_v54 = vsel %vm4184_vm5, %v4158_v1, -inf  ;;  %v4306_v56 = vmax.f32 %v4304_v48, %v4305_v51  ;;  %v5113_v29 = vpack.c.bf16 %v4205_v39, %v4205_v39 }
 0x3ad   : > { %v4347_v57 = vrot.slane %v4346_v54, 4  ;;  %v5115_v30 = vpack.c.bf16 %v4226_v45, %v4226_v45  ;;  %v4267_v2 = vrot.slane %v4266_v42, 1  ;;  %v4327_v63 = vmax.f32 %v4325_v14, %v4326_v53 }
 0x3ae   : > { %v4288_v60 = vrot.slane %v4287_v52, 1  ;;  %v5117_v0 = vpack.c.bf16 %v4247_v50, %v4247_v50  ;;  %v4307_v3 = vrot.slane %v4306_v56, 2  ;;  %v4443_v5 = vunpack.c.l.b16 %v5113_v29 }
 0x3af   : > { %v4348_v4 = vmax.f32 %v4346_v54, %v4347_v57  ;;  %v4446_v6 = vunpack.c.l.b16 %v5115_v30  ;;  %v4268_v7 = vmax.f32 %v4266_v42, %v4267_v2  ;;  %v4328_v8 = vrot.slane %v4327_v63, 2 }
 0x3b0   : > { %v4289_v9 = vmax.f32 %v4287_v52, %v4288_v60  ;;  %v4449_v11 = vunpack.c.l.b16 %v5117_v0  ;;  %v3929_v15 = vmul.f32 0.5, %v3923_v27  ;;  %v4308_v44 = vmax.f32 %v4306_v56, %v4307_v3 }
 0x3b1   : > { %v6105_v13 = vpop.eup %6104  ;;  %v4349_v40 = vrot.slane %v4348_v4, 2  ;;  %v4486_v43 = vsel %vm4465_vm6, %v4446_v6, %v4443_v5  ;;  %v4329_v10 = vmax.f32 %v4327_v63, %v4328_v8  ;;  %v5119_v19 = vpack.c.bf16 %v4268_v7, %v4268_v7 }
 0x3b2   : > { %v6107_v16 = vpop.eup %6106  ;;  %v3944_v18 = vadd.f32 1.0, %v6105_v13  ;;  %v5121_v34 = vpack.c.bf16 %v4289_v9, %v4289_v9  ;;  %v4309_v22 = vrot.slane %v4308_v44, 1  ;;  %v4487_v62 = vsel %vm4467_vm7, %v4449_v11, %v4486_v43 }
 0x3b3   : > { %v3945_v21 = vadd.f32 1.0, %v6107_v16  ;;  %v4350_v12 = vmax.f32 %v4348_v4, %v4349_v40  ;;  %v3930_v25 = vmul.f32 0.5, %v7113_v28  ;;  %v4330_v58 = vrot.slane %v4329_v10, 1 }
 0x3b4   : > { %v6109_v23 = vpop.eup %6108  ;;  %v3950_v55 = vmul.f32 %v3944_v18, %v3926_v35  ;;  %v4452_v1 = vunpack.c.l.b16 %v5119_v19  ;;  %v4310_v59 = vmax.f32 %v4308_v44, %v4309_v22  ;;  %v4455_v38 = vunpack.c.l.b16 %v5121_v34 }
 0x3b5   : > { %v6111_v27 = vpop.eup %6110  ;;  %v3951_v24 = vmul.f32 %v3945_v21, %v3927_v36  ;;  %v3947_v17 = vadd.f32 1.0, %v6109_v23  ;;  %v4351_v61 = vrot.slane %v4350_v12, 1  ;;  %v7122_v37 = vmax.f32 %v4329_v10, %v4330_v58 }
 0x3b6   : > { %v3948_v32 = vadd.f32 1.0, %v6111_v27  ;;  %v4488_v39 = vsel %vm4469_vm8, %v4452_v1, %v4487_v62  ;;  %v5123_v28 = vpack.c.bf16 %v4310_v59, %v4310_v59 }
 0x3b7   : > { %v3962_v45 = vcombine.low %v3950_v55, %v3951_v24  ;;  %v3963_v20 = vcombine.high %v3950_v55, %v3951_v24  ;;  %v3953_v46 = vmul.f32 %v3947_v17, %v3929_v15  ;;  %v7125_v35 = vmax.f32 %v4350_v12, %v4351_v61 }
 0x3b8   : > { %v3954_v47 = vmul.f32 %v3948_v32, %v3930_v25  ;;  %v4489_v48 = vsel %vm4471_vm9, %v4455_v38, %v4488_v39  ;;  %v5125_v42 = vpack.c.bf16 %v7122_v37, %v7122_v37  ;;  %v4458_v52 = vunpack.c.l.b16 %v5123_v28 }
 0x3b9   : > { %v3971_v36 = vrot.slane %v3962_v45, %v7066_v26  ;;  %v3978_v50 = vrot.slane %v3963_v20, %v7066_v26  ;;  %v5127_v2 = vpack.c.bf16 %v7125_v35, %v7125_v35 }
 0x3ba   : > { %v3997_v51 = vcombine.low %v3953_v46, %v3954_v47  ;;  %v3998_v14 = vcombine.high %v3953_v46, %v3954_v47  ;;  %v7145_v60 = vsel %vm4473_vm10, %v4458_v52, %v4489_v48 }
 0x3bb   : > { %v3993_v53 = vcombine.low %v3971_v36, %v7069_v33  ;;  %v3994_v54 = vcombine.high %v3971_v36, %v7069_v33  ;;  %v3995_v56 = vcombine.low %v3978_v50, %v7072_v31  ;;  %v3996_v57 = vcombine.high %v3978_v50, %v7072_v31 }
 0x3bc   : > { %v7137_v29 = vrot.slane %v3997_v51, %v7066_v26  ;;  %v7140_v30 = vrot.slane %v3998_v14, %v7066_v26 }
 0x3bd   : > { %v4039_v63 = vrot.slane %v3993_v53, %v7066_v26  ;;  %v4055_v33 = vrot.slane %v3994_v54, %v7066_v26  ;;  %v4071_v0 = vrot.slane %v3995_v56, %v7066_v26  ;;  %v4087_v31 = vrot.slane %v3996_v57, %v7066_v26 }
 0x3be   : > { %v4028_v3 = vcombine.low %v7137_v29, %v7079_v41  ;;  %v4029_v4 = vcombine.high %v7137_v29, %v7079_v41  ;;  %v4030_v5 = vcombine.low %v7140_v30, %v7088_v49  ;;  %v4031_v6 = vcombine.high %v7140_v30, %v7088_v49 }
 0x3bf   : > { %v4047_v7 = vcombine.high %v4039_v63, %v4039_v63  ;;  %v4063_v9 = vcombine.high %v4055_v33, %v4055_v33  ;;  %v4079_v8 = vcombine.high %v4071_v0, %v4071_v0  ;;  %v4095_v11 = vcombine.high %v4087_v31, %v4087_v31 }
 0x3c0   : > { %v4185_v13 = vsel %vm4184_vm5, %v4039_v63, -inf  ;;  %v4206_v15 = vsel %vm4184_vm5, %v4055_v33, -inf  ;;  %v4227_v44 = vsel %vm4184_vm5, %v4071_v0, -inf  ;;  %v4248_v40 = vsel %vm4184_vm5, %v4087_v31, -inf }
 0x3c1   : > { %v4186_v43 = vrot.slane %v4185_v13, 4  ;;  %v4192_v41 = vsel %vm4184_vm5, %v4047_v7, -inf  ;;  %v4207_v16 = vrot.slane %v4206_v15, 4  ;;  %v4213_v18 = vsel %vm4184_vm5, %v4063_v9, -inf }
 0x3c2   : > { %v4193_v10 = vrot.slane %v4192_v41, 4  ;;  %v4214_v19 = vrot.slane %v4213_v18, 4  ;;  %v4228_v34 = vrot.slane %v4227_v44, 4  ;;  %v4234_v21 = vsel %vm4184_vm5, %v4079_v8, -inf }
 0x3c3   : > { %v4187_v22 = vmax.f32 %v4185_v13, %v4186_v43  ;;  %v4208_v12 = vmax.f32 %v4206_v15, %v4207_v16  ;;  %v4235_v62 = vrot.slane %v4234_v21, 4  ;;  %v4249_v23 = vrot.slane %v4248_v40, 4 }
 0x3c4   : > { %v4194_v55 = vmax.f32 %v4192_v41, %v4193_v10  ;;  %v4215_v25 = vmax.f32 %v4213_v18, %v4214_v19  ;;  %v4229_v58 = vmax.f32 %v4227_v44, %v4228_v34  ;;  %v4255_v1 = vsel %vm4184_vm5, %v4095_v11, -inf }
 0x3c5   : > { %v4188_v27 = vrot.slane %v4187_v22, 2  ;;  %v4209_v24 = vrot.slane %v4208_v12, 2  ;;  %v4236_v17 = vmax.f32 %v4234_v21, %v4235_v62  ;;  %v4250_v59 = vmax.f32 %v4248_v40, %v4249_v23 }
 0x3c6   : > { %v4195_v61 = vrot.slane %v4194_v55, 2  ;;  %v4216_v32 = vrot.slane %v4215_v25, 2  ;;  %v4230_v38 = vrot.slane %v4229_v58, 2  ;;  %v4256_v39 = vrot.slane %v4255_v1, 4 }
 0x3c7   : > { %v4189_v45 = vmax.f32 %v4187_v22, %v4188_v27  ;;  %v4210_v20 = vmax.f32 %v4208_v12, %v4209_v24  ;;  %v4237_v46 = vrot.slane %v4236_v17, 2  ;;  %v4251_v47 = vrot.slane %v4250_v59, 2 }
 0x3c8   : > { %v4196_v28 = vmax.f32 %v4194_v55, %v4195_v61  ;;  %v4217_v48 = vmax.f32 %v4215_v25, %v4216_v32  ;;  %v4231_v36 = vmax.f32 %v4229_v58, %v4230_v38  ;;  %v4257_v50 = vmax.f32 %v4255_v1, %v4256_v39 }
 0x3c9   : > { %v4190_v51 = vrot.slane %v4189_v45, 1  ;;  %v4211_v14 = vrot.slane %v4210_v20, 1  ;;  %v4238_v52 = vmax.f32 %v4236_v17, %v4237_v46  ;;  %v4252_v53 = vmax.f32 %v4250_v59, %v4251_v47 }
 0x3ca   : > { %v4197_v54 = vrot.slane %v4196_v28, 1  ;;  %v4218_v56 = vrot.slane %v4217_v48, 1  ;;  %v4232_v57 = vrot.slane %v4231_v36, 1  ;;  %v4258_v29 = vrot.slane %v4257_v50, 2 }
 0x3cb   : > { %v4191_v63 = vmax.f32 %v4189_v45, %v4190_v51  ;;  %v4212_v33 = vmax.f32 %v4210_v20, %v4211_v14  ;;  %v4239_v0 = vrot.slane %v4238_v52, 1  ;;  %v4253_v31 = vrot.slane %v4252_v53, 1 }
 0x3cc   : > { %v4198_v7 = vmax.f32 %v4196_v28, %v4197_v54  ;;  %v4219_v9 = vmax.f32 %v4217_v48, %v4218_v56  ;;  %v4233_v8 = vmax.f32 %v4231_v36, %v4232_v57  ;;  %v4259_v11 = vmax.f32 %v4257_v50, %v4258_v29 }
 0x3cd   : > { %v4240_v13 = vmax.f32 %v4238_v52, %v4239_v0  ;;  %v7167_v15 = vmax.f32 %v4252_v53, %v4253_v31  ;;  %v4103_v44 = vrot.slane %v4028_v3, %v7066_v26  ;;  %v4119_v40 = vrot.slane %v4029_v4, %v7066_v26 }
 0x3ce   : > { %v4260_v43 = vrot.slane %v4259_v11, 1  ;;  %v7171_v41 = vpack.c.bf16 %v4198_v7, %v4191_v63  ;;  %v7173_v16 = vpack.c.bf16 %v4219_v9, %v4212_v33  ;;  %v4135_v18 = vrot.slane %v4030_v5, %v7066_v26 }
 0x3cf   : > { %v7179_v10 = vpack.c.bf16 %v4240_v13, %v4233_v8  ;;  %v4111_v19 = vcombine.high %v4103_v44, %v4103_v44  ;;  %v4127_v34 = vcombine.high %v4119_v40, %v4119_v40  ;;  %v4151_v3 = vrot.slane %v4031_v6, %v7066_v26 }
 0x3d0   : > { %v4261_v4 = vmax.f32 %v4259_v11, %v4260_v43  ;;  %v4143_v21 = vcombine.high %v4135_v18, %v4135_v18  ;;  %v4269_v22 = vsel %vm4184_vm5, %v4103_v44, -inf  ;;  %v4290_v12 = vsel %vm4184_vm5, %v4119_v40, -inf }
 0x3d1   : > { %v4159_v62 = vcombine.high %v4151_v3, %v4151_v3  ;;  %v4270_v23 = vrot.slane %v4269_v22, 4  ;;  %v4276_v55 = vsel %vm4184_vm5, %v4111_v19, -inf  ;;  %v4291_v5 = vrot.slane %v4290_v12, 4 }
 0x3d2   : > { %v4277_v25 = vrot.slane %v4276_v55, 4  ;;  %v4297_v58 = vsel %vm4184_vm5, %v4127_v34, -inf  ;;  %v4311_v1 = vsel %vm4184_vm5, %v4135_v18, -inf  ;;  %v4318_v27 = vsel %vm4184_vm5, %v4143_v21, -inf }
 0x3d3   : > { %v4271_v49 = vmax.f32 %v4269_v22, %v4270_v23  ;;  %v4292_v26 = vmax.f32 %v4290_v12, %v4291_v5  ;;  %v4298_v30 = vrot.slane %v4297_v58, 4  ;;  %v4312_v6 = vrot.slane %v4311_v1, 4 }
 0x3d4   : > { %v4278_v24 = vmax.f32 %v4276_v55, %v4277_v25  ;;  %v4319_v17 = vrot.slane %v4318_v27, 4  ;;  %v4332_v59 = vsel %vm4184_vm5, %v4151_v3, -inf  ;;  %v4339_v61 = vsel %vm4184_vm5, %v4159_v62, -inf }
 0x3d5   : > { %v4272_v32 = vrot.slane %v4271_v49, 2  ;;  %v4293_v38 = vrot.slane %v4292_v26, 2  ;;  %v4299_v39 = vmax.f32 %v4297_v58, %v4298_v30  ;;  %v4313_v45 = vmax.f32 %v4311_v1, %v4312_v6 }
 0x3d6   : > { %v4279_v20 = vrot.slane %v4278_v24, 2  ;;  %v4320_v46 = vmax.f32 %v4318_v27, %v4319_v17  ;;  %v4333_v47 = vrot.slane %v4332_v59, 4  ;;  %v4340_v28 = vrot.slane %v4339_v61, 4 }
 0x3d7   : > { %v4273_v48 = vmax.f32 %v4271_v49, %v4272_v32  ;;  %v4294_v36 = vmax.f32 %v4292_v26, %v4293_v38  ;;  %v4300_v50 = vrot.slane %v4299_v39, 2  ;;  %v4314_v51 = vrot.slane %v4313_v45, 2 }
 0x3d8   : > { %v4280_v14 = vmax.f32 %v4278_v24, %v4279_v20  ;;  %v4321_v52 = vrot.slane %v4320_v46, 2  ;;  %v4334_v53 = vmax.f32 %v4332_v59, %v4333_v47  ;;  %v4341_v54 = vmax.f32 %v4339_v61, %v4340_v28 }
 0x3d9   : > { %v4274_v56 = vrot.slane %v4273_v48, 1  ;;  %v4295_v57 = vrot.slane %v4294_v36, 1  ;;  %v4301_v29 = vmax.f32 %v4299_v39, %v4300_v50  ;;  %v4315_v63 = vmax.f32 %v4313_v45, %v4314_v51 }
 0x3da   : > { %v4281_v33 = vrot.slane %v4280_v14, 1  ;;  %v4335_v0 = vrot.slane %v4334_v53, 2  ;;  %v4322_v31 = vmax.f32 %v4320_v46, %v4321_v52  ;;  %v4342_v7 = vrot.slane %v4341_v54, 2 }
 0x3db   : > { %v4275_v9 = vmax.f32 %v4273_v48, %v4274_v56  ;;  %v4296_v8 = vmax.f32 %v4294_v36, %v4295_v57  ;;  %v4302_v11 = vrot.slane %v4301_v29, 1  ;;  %v4316_v13 = vrot.slane %v4315_v63, 1 }
 0x3dc   : > { %v4282_v44 = vmax.f32 %v4280_v14, %v4281_v33  ;;  %v4323_v40 = vrot.slane %v4322_v31, 1  ;;  %v4336_v43 = vmax.f32 %v4334_v53, %v4335_v0  ;;  %v4343_v18 = vmax.f32 %v4341_v54, %v4342_v7 }
 0x3dd   : > { %v4303_v19 = vmax.f32 %v4301_v29, %v4302_v11  ;;  %v4317_v34 = vmax.f32 %v4315_v63, %v4316_v13  ;;  %v5118_v3 = vpack.c.bf16 %v4261_v4, %v7167_v15  ;;  %v4441_v21 = vunpack.c.l.b16 %v7171_v41 }
 0x3de   : > { %v4324_v22 = vmax.f32 %v4322_v31, %v4323_v40  ;;  %v4337_v12 = vrot.slane %v4336_v43, 1  ;;  %v4344_v62 = vrot.slane %v4343_v18, 1  ;;  %v5120_v23 = vpack.c.bf16 %v4282_v44, %v4275_v9 }
 0x3df   : > { %v5122_v55 = vpack.c.bf16 %v4303_v19, %v4296_v8  ;;  %v4442_v5 = vunpack.c.h.b16 %v7171_v41  ;;  %v4444_v25 = vunpack.c.l.b16 %v7173_v16  ;;  %v4445_v58 = vunpack.c.h.b16 %v7173_v16 }
 0x3e0   : > { %v4338_v1 = vmax.f32 %v4336_v43, %v4337_v12  ;;  %v4345_v27 = vmax.f32 %v4343_v18, %v4344_v62  ;;  %v5124_v49 = vpack.c.bf16 %v4324_v22, %v4317_v34  ;;  %v4447_v26 = vunpack.c.l.b16 %v7179_v10 }
 0x3e1   : > { %v4448_v15 = vunpack.c.h.b16 %v7179_v10  ;;  %v4461_v4 = vunpack.c.l.b16 %v5125_v42  ;;  %v4464_v41 = vunpack.c.l.b16 %v5127_v2  ;;  %v4450_v16 = vunpack.c.l.b16 %v5118_v3 }
 0x3e2   : > { %v5126_v30 = vpack.c.bf16 %v4345_v27, %v4338_v1  ;;  %v4453_v6 = vunpack.c.l.b16 %v5120_v23  ;;  %v4454_v24 = vunpack.c.h.b16 %v5120_v23  ;;  %v4451_v17 = vunpack.c.h.b16 %v5118_v3 }
 0x3e3   : > { %v4456_v59 = vunpack.c.l.b16 %v5122_v55  ;;  %v4466_v61 = vsel %vm4465_vm6, %v4444_v25, %v4441_v21  ;;  %v4479_v32 = vsel %vm4465_vm6, %v4445_v58, %v4442_v5  ;;  %v4457_v10 = vunpack.c.h.b16 %v5122_v55 }
 0x3e4   : > { %v4459_v38 = vunpack.c.l.b16 %v5124_v49  ;;  %v4468_v37 = vsel %vm4467_vm7, %v4447_v26, %v4466_v61  ;;  %v4480_v42 = vsel %vm4467_vm7, %v4448_v15, %v4479_v32  ;;  %v4460_v35 = vunpack.c.h.b16 %v5124_v49 }
 0x3e5   : > { %v4470_v2 = vsel %vm4469_vm8, %v4450_v16, %v4468_v37  ;;  %v4481_v39 = vsel %vm4469_vm8, %v4451_v17, %v4480_v42  ;;  %v4491_v45 = vsel %vm4475_vm11, %v4461_v4, %v7145_v60  ;;  %v4462_v20 = vunpack.c.l.b16 %v5126_v30 }
 0x3e6   : > { %v4472_v46 = vsel %vm4471_vm9, %v4453_v6, %v4470_v2  ;;  %v4482_v47 = vsel %vm4471_vm9, %v4454_v24, %v4481_v39  ;;  %v4492_v28 = vsel %vm4477_vm12, %v4464_v41, %v4491_v45  ;;  %v4463_v48 = vunpack.c.h.b16 %v5126_v30 }
 0x3e7   : > { %v4474_v36 = vsel %vm4473_vm10, %v4456_v59, %v4472_v46  ;;  %v4483_v50 = vsel %vm4473_vm10, %v4457_v10, %v4482_v47  ;;  %v4494_v51 = vpack.c.b16 %v4492_v28, %v4492_v28 }
 0x3e8   : > { %v4476_v60 = vsel %vm4475_vm11, %v4459_v38, %v4474_v36  ;;  %v4484_v14 = vsel %vm4475_vm11, %v4460_v35, %v4483_v50 }
 0x3e9   : > { %v4478_v52 = vsel %vm4477_vm12, %v4462_v20, %v4476_v60  ;;  %v4485_v53 = vsel %vm4477_vm12, %v4463_v48, %v4484_v14  ;;  %4498 = vst [vmem:[%s6864_s9 + $0x8] sm:$0xf] %v4494_v51 }
 0x3ea   : > { %v4493_v54 = vpack.c.b16 %v4485_v53, %v4478_v52 }
 0x3ec   : > { %4497 = vst [vmem:[%s6864_s9] sm:$0xff] %v4493_v54 }
 0x3ed   : > { %6273 = shalt.err (!%p6270_p7)
}
 0x3ee   : > { %s6274_s21 = scalar_lea.hbm %s7230_s22, 192  ;;  %s6278_s12 = scalar_lea.hbm %s7401_s17, 768 }
 0x3ef   : > { %p6275_p9 = scmp.ne.s32.totalorder %s7230_s22, %s6274_s21  ;;  %p6279_p4 = scmp.lt.u32.totalorder %s7230_s22, %s7401_s17 }
 0x3f0   : > { %p6280_p2 = scmp.lt.u32.totalorder %s6278_s12, %s6274_s21  ;;  %p6282_p12 = scmp.lt.u32.totalorder %s6274_s21, %s7230_s22 }
 0x3f1   : > { %p6276_p10 = pnand %p6275_p9, %p7402_p0 }
 0x3f2   : > { %p6281_p5 = por %p6280_p2, %p6279_p4 }
 0x3f3   : > { %p6277_p13 = pneg %p6276_p10 }
 0x3f4   : > { %p6283_p3 = por %p6282_p12, %p6281_p5 }
 0x3f6   : > { %p6284_p8 = pnand %p6283_p3, %p6277_p13 }
 0x3f8   : > { %6287 = shalt.err (!%p6284_p8)
}
 0x3f9   : > { %5448 = dma.vmem_to_hbm [thread:$0]  (%p7402_p0), %s7232_s3, 192, %s7230_s22, %s4500_s7  }
 0x3fa PF: > { %p5476_p6 = scmp.ge.s32.totalorder %s6418_s6, 2  ;;  %s4528_s15 = sand.u32 1, %s6390_s24  }
 0x3fb   : > { %p7403_p1 = scmp.ne.s32.totalorder %s7370_s27, 0  ;;  %s4529_s10 = scalar_lea.sflag [#allocation5], %s4528_s15 }
 0x3fd   : > { %p5468_p11 = pnand %p5476_p6, %p7403_p1 }
 0x3ff   : > { %6361 = dma.done.wait (!%p5468_p11), %s4529_s10, 192  }
 0x400   : > { %6363 = vsyncadd (!%p5468_p11), %s4529_s10, 4294967104  ;;  %s25_s6 = sadd.s32 1, %s6418_s6   ;;  %s7405_s21 = sld [smem:[#allocation19_spill]] }
 0x401   : > { %p7262_p7 = scmp.ge.s32.totalorder %s25_s6, 6   ;;  %s7406_s22 = sld [smem:[#allocation20_spill]] }
 0x402   : > { %s7407_s23 = sld [smem:[#allocation29_spill]]  ;;  %s7408_s27 = sld [smem:[#allocation23_spill]] }
 0x403   : > { %s7409_s29 = sld [smem:[#allocation25_spill]]  ;;  %s7410_s3 = sld [smem:[#allocation27_spill]] }
 0x404   : > { %s7412_s18 = smov %s6370_s19  ;;  %s7413_s19 = smov %s6374_s20 }
 0x405   : > { %s7414_s20 = smov %s6798_s11  ;;  %s7415_s24 = smov %s6394_s25 }
 0x406   : > { %s7416_s25 = smov %s6398_s26  ;;  %s7417_s26 = smov %s6707_s14 }
 0x407   : > { %s7418_s28 = smov %s6414_s30  ;;  %24 = sbr.rel (!%p7262_p7) target bundleno = 18 (0x12), region = 137 }
 0x409   : > { %s7419_s30 = smov %s7410_s3 }
 0x40e   :  { %4534 = vsyncpa [#allocation4], 1 }
 0x40f   :  { %4536 = vsyncpa [#allocation4 + $0x1], 1 }
 0x410   :  { %4537 = vsyncpa [#allocation7], 1 }
 0x411   :  { %4539 = vsyncpa [#allocation7 + $0x1], 1 }
 0x412   :  { %4540 = vsyncpa [#allocation10], 1 }
 0x413   :  { %4541 = vsyncpa [#allocation5], 1 }
 0x414   :  { %4543 = vsyncpa [#allocation5 + $0x1], 1 }

</bundles_post_ra>
